<compile_context>
chip_gen: v7x
topology: tpu7x:2x2x1
jax: 0.10.0
libtpu: 0.0.40
codegen_flags: <defaults>
</compile_context>

<pallas_src>
from functools import partial

import jax
import jax.numpy as jnp
from jax.experimental import pallas as pl
from jax.experimental.pallas import tpu as pltpu

_LANE = 128


# ---------------- Pallas kernels (hot path) ----------------

def _make_conv_stats_kernel(tm, cc, tap_offsets):
    """Conv GEMM with in-VMEM patch assembly + fused masked BN batch-stat partials.

    Per grid step i (a tile of tm flattened output rows):
      x0_ref  (tm, cc)   bf16  rows [i*tm, (i+1)*tm) of the flattened padded NHWC image
      x1_ref  (tm, cc)   bf16  rows [(i+1)*tm, (i+2)*tm)  (halo for the shifted taps)
      w_ref   (T*cc,OCp) bf16  conv weight, tap-major / channel-minor, OC lane-padded
      msk_ref (tm, 1)    bf16  1.0 for real conv-output rows, 0.0 for halo/pad rows
      y_ref   (tm, OCp)  bf16  conv output (bias omitted -- it cancels under BN)
      psum/psq (1,1,OCp) f32   per-tile partial sums for the BN batch statistics
      patch_ref (tm,T*cc) f32  VMEM scratch: im2col row block assembled in-kernel
    """

    def kernel(x0_ref, x1_ref, w_ref, msk_ref, y_ref, psum_ref, psq_ref, patch_ref):
        # f32 working copies: unpacked layout, so the statically shifted row slices
        # below are plain sublane shifts (no packed-dtype alignment restrictions).
        x0 = x0_ref[...].astype(jnp.float32)
        x1 = x1_ref[...].astype(jnp.float32)

        # In-VMEM im2col: tap t with flat offset d needs window rows [d, d+tm) of
        # (x0 ++ x1); place them in lanes [t*cc, (t+1)*cc) of the patch scratch.
        for t, d in enumerate(tap_offsets):
            c0 = t * cc
            n0 = tm - d                      # rows sourced from x0, rest from x1
            if n0 > 0:
                patch_ref[0:n0, c0:c0 + cc] = x0[d:tm, :]
            if d > 0:
                patch_ref[n0:tm, c0:c0 + cc] = x1[0:d, :]

        # One MXU GEMM over the full K = T*cc contraction (bf16 x bf16 -> f32).
        z = jnp.dot(patch_ref[...].astype(jnp.bfloat16), w_ref[...],
                    preferred_element_type=jnp.float32)
        y_ref[...] = z.astype(y_ref.dtype)

        # BN batch statistics: masked per-tile partials (combined on the XLA side).
        zm = z * msk_ref[...].astype(jnp.float32)
        psum_ref[...] = jnp.sum(zm, axis=0, keepdims=True)[None]
        psq_ref[...] = jnp.sum(zm * z, axis=0, keepdims=True)[None]

    return kernel


def _bn_relu_kernel(y_ref, scale_ref, shift_ref, o_ref):
    # Fused BatchNorm affine (precomputed per-channel scale/shift) + ReLU,
    # computed in f32, stored bf16 in place over y (aliased).
    o = y_ref[...].astype(jnp.float32) * scale_ref[...] + shift_ref[...]
    o_ref[...] = jnp.maximum(o, 0.0).astype(o_ref.dtype)


# ---------------- wrapper ----------------

@partial(jax.jit, static_argnames=("stride", "padding", "eps", "tm_max"))
def conv2d_bn_relu(x, w, b, gamma, beta, *, stride=1, padding=0, eps=1e-5, tm_max=512):
    del b  # conv bias cancels exactly under train-mode BatchNorm (see header note)

    N, C, H, W = x.shape
    OC, IC, KH, KW = w.shape
    assert IC == C
    s = stride
    OH = (H + 2 * padding - KH) // s + 1
    OW = (W + 2 * padding - KW) // s + 1

    # ---- canonicalize to a stride-1 "VALID" conv in NHWC bf16 -------------------
    # Pad spatially, go NHWC, round spatial dims up to a multiple of the stride.
    Hp = -(-(H + 2 * padding) // s) * s
    Wp = -(-(W + 2 * padding) // s) * s
    xp = jnp.pad(x.astype(jnp.bfloat16).transpose(0, 2, 3, 1),
                 ((0, 0), (padding, Hp - H - padding),
                  (padding, Wp - W - padding), (0, 0)))
    Hq, Wq = Hp // s, Wp // s
    Cc = C * s * s
    KHq, KWq = -(-KH // s), -(-KW // s)
    # Space-to-depth (identity when stride == 1): a strided conv equals a stride-1
    # conv on the rearranged input with a rearranged, zero-padded kernel.
    xs = xp.reshape(N, Hq, s, Wq, s, C).transpose(0, 1, 3, 2, 4, 5).reshape(N, Hq, Wq, Cc)
    wp = jnp.pad(w.astype(jnp.bfloat16),
                 ((0, 0), (0, 0), (0, KHq * s - KH), (0, KWq * s - KW)))
    ws = wp.reshape(OC, C, KHq, s, KWq, s).transpose(2, 4, 3, 5, 1, 0)  # (KHq,KWq,s,s,C,OC)

    # GEMM weight: tap-major / channel-minor rows, OC lane-padded to a multiple of 128
    # so stores are lane-dense.  (TODO(synk): 256-pad + OC tiling for v6e/v7x MXU fill.)
    OCp = -(-OC // _LANE) * _LANE
    Kc = KHq * KWq * Cc
    w2 = jnp.pad(ws.reshape(Kc, OC), ((0, 0), (0, OCp - OC)))

    # ---- shifted-window GEMM form ------------------------------------------------
    M_out = N * Hq * Wq          # output rows incl. spatial halo ("garbage") rows
    M_valid = N * OH * OW        # real conv output rows (used for BN statistics)
    taps = [i2 * Wq + j2 for i2 in range(KHq) for j2 in range(KWq)]
    d_max = taps[-1]

    # M tile: large for streaming efficiency, small enough that the f32 patch scratch
    # stays well inside scoped VMEM, and >= d_max so the tap window fits in two blocks.
    tm = min(tm_max, -(-M_out // 16) * 16)
    tm = min(tm, max(64, (8 * 1024 * 1024 // (Kc * 4)) // 16 * 16))
    tm = max(tm, -(-d_max // 16) * 16, 16)
    n_tiles = -(-M_out // tm)
    # Kernel 2 is a pure streaming pass: group several kernel-1 tiles per step.
    group = 4 if n_tiles % 4 == 0 else (2 if n_tiles % 2 == 0 else 1)
    Mp = n_tiles * tm
    tm2 = group * tm

    xflat = xs.reshape(M_out, Cc)
    xflat = jnp.pad(xflat, ((0, Mp + tm - M_out), (0, 0)))   # + halo block for last tile

    # Validity mask: 1.0 where (oh < OH) & (ow < OW); 0.0 on halo / padded rows.
    ok = (jnp.arange(Hq) < OH)[:, None] & (jnp.arange(Wq) < OW)[None, :]
    mask = jnp.broadcast_to(ok[None], (N, Hq, Wq)).reshape(M_out, 1).astype(jnp.bfloat16)
    mask = jnp.pad(mask, ((0, Mp - M_out), (0, 0)))

    # ---- kernel 1: conv GEMM + fused masked BN batch-stat partials ---------------
    kern = _make_conv_stats_kernel(tm, Cc, taps)
    y, psum, psq = pl.pallas_call(
        kern,
        out_shape=(jax.ShapeDtypeStruct((Mp, OCp), jnp.bfloat16),
                   jax.ShapeDtypeStruct((n_tiles, 1, OCp), jnp.float32),
                   jax.ShapeDtypeStruct((n_tiles, 1, OCp), jnp.float32)),
        grid_spec=pltpu.PrefetchScalarGridSpec(
            num_scalar_prefetch=0,
            grid=(n_tiles,),
            in_specs=[pl.BlockSpec((tm, Cc), lambda i: (i, 0)),
                      pl.BlockSpec((tm, Cc), lambda i: (i + 1, 0)),
                      # grid-invariant weight: constant index map => DMA'd only once
                      pl.BlockSpec((Kc, OCp), lambda i: (0, 0)),
                      pl.BlockSpec((tm, 1), lambda i: (i, 0))],
            out_specs=(pl.BlockSpec((tm, OCp), lambda i: (i, 0)),
                       pl.BlockSpec((1, 1, OCp), lambda i: (i, 0, 0)),
                       pl.BlockSpec((1, 1, OCp), lambda i: (i, 0, 0))),
            scratch_shapes=[pltpu.VMEM((tm, Kc), jnp.float32)]),
        compiler_params=pltpu.CompilerParams(
            dimension_semantics=("parallel",)),
    )(xflat, xflat, w2, mask)

    # ---- combine partial stats; fold BN affine into per-channel scale/shift -------
    cnt = float(M_valid)
    ssum = jnp.sum(psum, axis=(0, 1))                       # (OCp,)
    ssq = jnp.sum(psq, axis=(0, 1))
    mean = ssum / cnt
    # Biased batch variance (BatchNorm2d training mode); z is ~zero-mean (no bias),
    # the clamp only guards f32 rounding.
    var = jnp.maximum(ssq / cnt - mean * mean, 0.0)
    gamma_p = jnp.pad(gamma.astype(jnp.float32), (0, OCp - OC))
    beta_p = jnp.pad(beta.astype(jnp.float32), (0, OCp - OC))
    inv_std = jax.lax.rsqrt(var + eps)
    scale = (gamma_p * inv_std).reshape(1, OCp)
    shift = (beta_p - mean * gamma_p * inv_std).reshape(1, OCp)

    # ---- kernel 2: fused BN affine + ReLU, in place over y (aliased, bf16) --------
    n2 = Mp // tm2
    out = pl.pallas_call(
        _bn_relu_kernel,
        out_shape=jax.ShapeDtypeStruct((Mp, OCp), jnp.bfloat16),
        grid_spec=pltpu.PrefetchScalarGridSpec(
            num_scalar_prefetch=0,
            grid=(n2,),
            in_specs=[pl.BlockSpec((tm2, OCp), lambda i: (i, 0)),
                      pl.BlockSpec((1, OCp), lambda i: (0, 0)),
                      pl.BlockSpec((1, OCp), lambda i: (0, 0))],
            out_specs=pl.BlockSpec((tm2, OCp), lambda i: (i, 0))),
        input_output_aliases={0: 0},
        compiler_params=pltpu.CompilerParams(
            dimension_semantics=("parallel",)),
    )(y, scale, shift)

    # ---- drop halo/pad rows + padded channels; NCHW f32 only at the module boundary
    out = out[:M_out].reshape(N, Hq, Wq, OCp)[:, :OH, :OW, :OC]
    return out.astype(jnp.float32).transpose(0, 3, 1, 2)


# ---------------- pure-JAX f32 reference for a correctness check ----------------

def _reference(x, w, b, gamma, beta, stride, padding, eps):
    y = jax.lax.conv_general_dilated(
        x, w, window_strides=(stride, stride),
        padding=[(padding, padding), (padding, padding)],
        dimension_numbers=("NCHW", "OIHW", "NCHW"))
    y = y + b.reshape(1, -1, 1, 1)
    mean = y.mean(axis=(0, 2, 3), keepdims=True)
    var = y.var(axis=(0, 2, 3), keepdims=True)       # biased, as BN uses in training
    y = (y - mean) / jnp.sqrt(var + eps)
    y = y * gamma.reshape(1, -1, 1, 1) + beta.reshape(1, -1, 1, 1)
    return jnp.maximum(y, 0.0)


if __name__ == "__main__":
    # Conv2dLayer(in_channels=4, out_channels=8, kernel_size=3, stride=1, padding=1)
    N, C, H, W = 2, 4, 16, 16
    OC, KH, KW = 8, 3, 3
    stride, padding, eps = 1, 1, 1e-5

    key = jax.random.PRNGKey(0)
    kx, kw, kb = jax.random.split(key, 3)
    x = jax.random.normal(kx, (N, C, H, W), dtype=jnp.float32)
    conv_w = 0.1 * jax.random.normal(kw, (OC, C, KH, KW), dtype=jnp.float32)
    conv_b = 0.1 * jax.random.normal(kb, (OC,), dtype=jnp.float32)
    bn_gamma = jnp.ones((OC,), jnp.float32)   # BatchNorm2d default init
    bn_beta = jnp.zeros((OC,), jnp.float32)

    out = conv2d_bn_relu(x, conv_w, conv_b, bn_gamma, bn_beta,
                         stride=stride, padding=padding, eps=eps)
    out = jax.block_until_ready(out)

    ref = _reference(x, conv_w, conv_b, bn_gamma, bn_beta, stride, padding, eps)
    assert out.shape == (N, OC, H, W), out.shape
    # bf16 GEMM inputs / bf16 y storage with f32 accumulation vs. f32 reference.
    assert jnp.allclose(out, ref, atol=2e-2, rtol=2e-2), float(jnp.abs(out - ref).max())

    print("KERNEL_OK")
</pallas_src>

<mosaic_0001>
module attributes {stable_mosaic.version = 11 : i64} {
  func.func @kernel(%arg0: i32, %arg1: memref<512x4xbf16, #tpu.memory_space<vmem>>, %arg2: memref<512x4xbf16, #tpu.memory_space<vmem>>, %arg3: memref<36x128xbf16, #tpu.memory_space<vmem>>, %arg4: memref<512x1xbf16, #tpu.memory_space<vmem>>, %arg5: memref<512x128xbf16, #tpu.memory_space<vmem>>, %arg6: memref<1x1x128xf32, #tpu.memory_space<vmem>>, %arg7: memref<1x1x128xf32, #tpu.memory_space<vmem>>, %arg8: memref<512x36xf32, #tpu.memory_space<vmem>>) attributes {dimension_semantics = [#tpu.dimension_semantics<parallel>], iteration_bounds = array<i64: 2>, scalar_prefetch = 0 : i64, scratch_operands = 1 : i64, tpu.core_type = #tpu.core_type<tc>, window_params = [{transform_indices = @transform_0, window_bounds = array<i64: 512, 4>}, {transform_indices = @transform_1, window_bounds = array<i64: 512, 4>}, {pipeline_mode = #tpu.pipeline_mode<synchronous>, transform_indices = @transform_2, window_bounds = array<i64: 36, 128>}, {transform_indices = @transform_3, window_bounds = array<i64: 512, 1>}, {transform_indices = @transform_4, window_bounds = array<i64: 512, 128>}, {transform_indices = @transform_5, window_bounds = array<i64: 1, 1, 128>}, {transform_indices = @transform_6, window_bounds = array<i64: 1, 1, 128>}]} {
    %c0 = arith.constant 0 : index
    %c0_0 = arith.constant 0 : index
    %0 = vector.load %arg1[%c0, %c0_0] : memref<512x4xbf16, #tpu.memory_space<vmem>>, vector<512x4xbf16>
    %1 = arith.extf %0 : vector<512x4xbf16> to vector<512x4xf32>
    %c0_1 = arith.constant 0 : index
    %c0_2 = arith.constant 0 : index
    %2 = vector.load %arg2[%c0_1, %c0_2] : memref<512x4xbf16, #tpu.memory_space<vmem>>, vector<512x4xbf16>
    %3 = arith.extf %2 : vector<512x4xbf16> to vector<512x4xf32>
    %c0_3 = arith.constant 0 : index
    %c0_4 = arith.constant 0 : index
    %4 = vector.load %arg8[%c0_3, %c0_4] : memref<512x36xf32, #tpu.memory_space<vmem>>, vector<512x4xf32>
    tpu.vector_store %arg8[%c0_3, %c0_4], %1 {strides = array<i32>} : memref<512x36xf32, #tpu.memory_space<vmem>>, vector<512x4xf32>,
    %5 = vector.extract_strided_slice %1 {offsets = [1, 0], sizes = [511, 4], strides = [1, 1]} : vector<512x4xf32> to vector<511x4xf32>
    %c0_5 = arith.constant 0 : index
    %c4 = arith.constant 4 : index
    %6 = vector.load %arg8[%c0_5, %c4] : memref<512x36xf32, #tpu.memory_space<vmem>>, vector<511x4xf32>
    tpu.vector_store %arg8[%c0_5, %c4], %5 {strides = array<i32>} : memref<512x36xf32, #tpu.memory_space<vmem>>, vector<511x4xf32>,
    %7 = vector.extract_strided_slice %3 {offsets = [0, 0], sizes = [1, 4], strides = [1, 1]} : vector<512x4xf32> to vector<1x4xf32>
    %c511 = arith.constant 511 : index
    %c4_6 = arith.constant 4 : index
    %8 = vector.load %arg8[%c511, %c4_6] : memref<512x36xf32, #tpu.memory_space<vmem>>, vector<1x4xf32>
    tpu.vector_store %arg8[%c511, %c4_6], %7 {strides = array<i32>} : memref<512x36xf32, #tpu.memory_space<vmem>>, vector<1x4xf32>,
    %9 = vector.extract_strided_slice %1 {offsets = [2, 0], sizes = [510, 4], strides = [1, 1]} : vector<512x4xf32> to vector<510x4xf32>
    %c0_7 = arith.constant 0 : index
    %c8 = arith.constant 8 : index
    %10 = vector.load %arg8[%c0_7, %c8] : memref<512x36xf32, #tpu.memory_space<vmem>>, vector<510x4xf32>
    tpu.vector_store %arg8[%c0_7, %c8], %9 {strides = array<i32>} : memref<512x36xf32, #tpu.memory_space<vmem>>, vector<510x4xf32>,
    %11 = vector.extract_strided_slice %3 {offsets = [0, 0], sizes = [2, 4], strides = [1, 1]} : vector<512x4xf32> to vector<2x4xf32>
    %c510 = arith.constant 510 : index
    %c8_8 = arith.constant 8 : index
    %12 = vector.load %arg8[%c510, %c8_8] : memref<512x36xf32, #tpu.memory_space<vmem>>, vector<2x4xf32>
    tpu.vector_store %arg8[%c510, %c8_8], %11 {strides = array<i32>} : memref<512x36xf32, #tpu.memory_space<vmem>>, vector<2x4xf32>,
    %13 = vector.extract_strided_slice %1 {offsets = [18, 0], sizes = [494, 4], strides = [1, 1]} : vector<512x4xf32> to vector<494x4xf32>
    %c0_9 = arith.constant 0 : index
    %c12 = arith.constant 12 : index
    %14 = vector.load %arg8[%c0_9, %c12] : memref<512x36xf32, #tpu.memory_space<vmem>>, vector<494x4xf32>
    tpu.vector_store %arg8[%c0_9, %c12], %13 {strides = array<i32>} : memref<512x36xf32, #tpu.memory_space<vmem>>, vector<494x4xf32>,
    %15 = vector.extract_strided_slice %3 {offsets = [0, 0], sizes = [18, 4], strides = [1, 1]} : vector<512x4xf32> to vector<18x4xf32>
    %c494 = arith.constant 494 : index
    %c12_10 = arith.constant 12 : index
    %16 = vector.load %arg8[%c494, %c12_10] : memref<512x36xf32, #tpu.memory_space<vmem>>, vector<18x4xf32>
    tpu.vector_store %arg8[%c494, %c12_10], %15 {strides = array<i32>} : memref<512x36xf32, #tpu.memory_space<vmem>>, vector<18x4xf32>,
    %17 = vector.extract_strided_slice %1 {offsets = [19, 0], sizes = [493, 4], strides = [1, 1]} : vector<512x4xf32> to vector<493x4xf32>
    %c0_11 = arith.constant 0 : index
    %c16 = arith.constant 16 : index
    %18 = vector.load %arg8[%c0_11, %c16] : memref<512x36xf32, #tpu.memory_space<vmem>>, vector<493x4xf32>
    tpu.vector_store %arg8[%c0_11, %c16], %17 {strides = array<i32>} : memref<512x36xf32, #tpu.memory_space<vmem>>, vector<493x4xf32>,
    %19 = vector.extract_strided_slice %3 {offsets = [0, 0], sizes = [19, 4], strides = [1, 1]} : vector<512x4xf32> to vector<19x4xf32>
    %c493 = arith.constant 493 : index
    %c16_12 = arith.constant 16 : index
    %20 = vector.load %arg8[%c493, %c16_12] : memref<512x36xf32, #tpu.memory_space<vmem>>, vector<19x4xf32>
    tpu.vector_store %arg8[%c493, %c16_12], %19 {strides = array<i32>} : memref<512x36xf32, #tpu.memory_space<vmem>>, vector<19x4xf32>,
    %21 = vector.extract_strided_slice %1 {offsets = [20, 0], sizes = [492, 4], strides = [1, 1]} : vector<512x4xf32> to vector<492x4xf32>
    %c0_13 = arith.constant 0 : index
    %c20 = arith.constant 20 : index
    %22 = vector.load %arg8[%c0_13, %c20] : memref<512x36xf32, #tpu.memory_space<vmem>>, vector<492x4xf32>
    tpu.vector_store %arg8[%c0_13, %c20], %21 {strides = array<i32>} : memref<512x36xf32, #tpu.memory_space<vmem>>, vector<492x4xf32>,
    %23 = vector.extract_strided_slice %3 {offsets = [0, 0], sizes = [20, 4], strides = [1, 1]} : vector<512x4xf32> to vector<20x4xf32>
    %c492 = arith.constant 492 : index
    %c20_14 = arith.constant 20 : index
    %24 = vector.load %arg8[%c492, %c20_14] : memref<512x36xf32, #tpu.memory_space<vmem>>, vector<20x4xf32>
    tpu.vector_store %arg8[%c492, %c20_14], %23 {strides = array<i32>} : memref<512x36xf32, #tpu.memory_space<vmem>>, vector<20x4xf32>,
    %25 = vector.extract_strided_slice %1 {offsets = [36, 0], sizes = [476, 4], strides = [1, 1]} : vector<512x4xf32> to vector<476x4xf32>
    %c0_15 = arith.constant 0 : index
    %c24 = arith.constant 24 : index
    %26 = vector.load %arg8[%c0_15, %c24] : memref<512x36xf32, #tpu.memory_space<vmem>>, vector<476x4xf32>
    tpu.vector_store %arg8[%c0_15, %c24], %25 {strides = array<i32>} : memref<512x36xf32, #tpu.memory_space<vmem>>, vector<476x4xf32>,
    %27 = vector.extract_strided_slice %3 {offsets = [0, 0], sizes = [36, 4], strides = [1, 1]} : vector<512x4xf32> to vector<36x4xf32>
    %c476 = arith.constant 476 : index
    %c24_16 = arith.constant 24 : index
    %28 = vector.load %arg8[%c476, %c24_16] : memref<512x36xf32, #tpu.memory_space<vmem>>, vector<36x4xf32>
    tpu.vector_store %arg8[%c476, %c24_16], %27 {strides = array<i32>} : memref<512x36xf32, #tpu.memory_space<vmem>>, vector<36x4xf32>,
    %29 = vector.extract_strided_slice %1 {offsets = [37, 0], sizes = [475, 4], strides = [1, 1]} : vector<512x4xf32> to vector<475x4xf32>
    %c0_17 = arith.constant 0 : index
    %c28 = arith.constant 28 : index
    %30 = vector.load %arg8[%c0_17, %c28] : memref<512x36xf32, #tpu.memory_space<vmem>>, vector<475x4xf32>
    tpu.vector_store %arg8[%c0_17, %c28], %29 {strides = array<i32>} : memref<512x36xf32, #tpu.memory_space<vmem>>, vector<475x4xf32>,
    %31 = vector.extract_strided_slice %3 {offsets = [0, 0], sizes = [37, 4], strides = [1, 1]} : vector<512x4xf32> to vector<37x4xf32>
    %c475 = arith.constant 475 : index
    %c28_18 = arith.constant 28 : index
    %32 = vector.load %arg8[%c475, %c28_18] : memref<512x36xf32, #tpu.memory_space<vmem>>, vector<37x4xf32>
    tpu.vector_store %arg8[%c475, %c28_18], %31 {strides = array<i32>} : memref<512x36xf32, #tpu.memory_space<vmem>>, vector<37x4xf32>,
    %33 = vector.extract_strided_slice %1 {offsets = [38, 0], sizes = [474, 4], strides = [1, 1]} : vector<512x4xf32> to vector<474x4xf32>
    %c0_19 = arith.constant 0 : index
    %c32 = arith.constant 32 : index
    %34 = vector.load %arg8[%c0_19, %c32] : memref<512x36xf32, #tpu.memory_space<vmem>>, vector<474x4xf32>
    tpu.vector_store %arg8[%c0_19, %c32], %33 {strides = array<i32>} : memref<512x36xf32, #tpu.memory_space<vmem>>, vector<474x4xf32>,
    %35 = vector.extract_strided_slice %3 {offsets = [0, 0], sizes = [38, 4], strides = [1, 1]} : vector<512x4xf32> to vector<38x4xf32>
    %c474 = arith.constant 474 : index
    %c32_20 = arith.constant 32 : index
    %36 = vector.load %arg8[%c474, %c32_20] : memref<512x36xf32, #tpu.memory_space<vmem>>, vector<38x4xf32>
    tpu.vector_store %arg8[%c474, %c32_20], %35 {strides = array<i32>} : memref<512x36xf32, #tpu.memory_space<vmem>>, vector<38x4xf32>,
    %c0_21 = arith.constant 0 : index
    %c0_22 = arith.constant 0 : index
    %37 = vector.load %arg8[%c0_21, %c0_22] : memref<512x36xf32, #tpu.memory_space<vmem>>, vector<512x36xf32>
    %38 = arith.truncf %37 : vector<512x36xf32> to vector<512x36xbf16>
    %c0_23 = arith.constant 0 : index
    %c0_24 = arith.constant 0 : index
    %39 = vector.load %arg3[%c0_23, %c0_24] : memref<36x128xbf16, #tpu.memory_space<vmem>>, vector<36x128xbf16>
    %cst = arith.constant dense<0.000000e+00> : vector<512x128xf32>
    %40 = tpu.matmul %38, %39, %cst {dimension_numbers = #tpu.dot_dimension_numbers<[1], [0], [0], [1], [0, 0, 1, 1], [], []>} : vector<512x36xbf16>, vector<36x128xbf16>, vector<512x128xf32> -> vector<512x128xf32>
    %41 = arith.truncf %40 : vector<512x128xf32> to vector<512x128xbf16>
    %c0_25 = arith.constant 0 : index
    %c0_26 = arith.constant 0 : index
    %42 = vector.load %arg5[%c0_25, %c0_26] : memref<512x128xbf16, #tpu.memory_space<vmem>>, vector<512x128xbf16>
    tpu.vector_store %arg5[%c0_25, %c0_26], %41 {strides = array<i32>} : memref<512x128xbf16, #tpu.memory_space<vmem>>, vector<512x128xbf16>,
    %c0_27 = arith.constant 0 : index
    %c0_28 = arith.constant 0 : index
    %43 = vector.load %arg4[%c0_27, %c0_28] : memref<512x1xbf16, #tpu.memory_space<vmem>>, vector<512x1xbf16>
    %44 = arith.extf %43 : vector<512x1xbf16> to vector<512x1xf32>
    %45 = vector.broadcast %44 : vector<512x1xf32> to vector<512x128xf32>
    %46 = arith.mulf %40, %45 : vector<512x128xf32>
    %cst_29 = arith.constant dense<0.000000e+00> : vector<128xf32>
    %47 = vector.multi_reduction <add>, %46, %cst_29 [0] : vector<512x128xf32> to vector<128xf32>
    %48 = vector.shape_cast %47 : vector<128xf32> to vector<1x128xf32>
    %49 = vector.shape_cast %48 : vector<1x128xf32> to vector<1x1x128xf32>
    %c0_30 = arith.constant 0 : index
    %c0_31 = arith.constant 0 : index
    %c0_32 = arith.constant 0 : index
    %50 = vector.load %arg6[%c0_30, %c0_31, %c0_32] : memref<1x1x128xf32, #tpu.memory_space<vmem>>, vector<1x1x128xf32>
    tpu.vector_store %arg6[%c0_30, %c0_31, %c0_32], %49 {strides = array<i32>} : memref<1x1x128xf32, #tpu.memory_space<vmem>>, vector<1x1x128xf32>,
    %51 = arith.mulf %46, %40 : vector<512x128xf32>
    %cst_33 = arith.constant dense<0.000000e+00> : vector<128xf32>
    %52 = vector.multi_reduction <add>, %51, %cst_33 [0] : vector<512x128xf32> to vector<128xf32>
    %53 = vector.shape_cast %52 : vector<128xf32> to vector<1x128xf32>
    %54 = vector.shape_cast %53 : vector<1x128xf32> to vector<1x1x128xf32>
    %c0_34 = arith.constant 0 : index
    %c0_35 = arith.constant 0 : index
    %c0_36 = arith.constant 0 : index
    %55 = vector.load %arg7[%c0_34, %c0_35, %c0_36] : memref<1x1x128xf32, #tpu.memory_space<vmem>>, vector<1x1x128xf32>
    tpu.vector_store %arg7[%c0_34, %c0_35, %c0_36], %54 {strides = array<i32>} : memref<1x1x128xf32, #tpu.memory_space<vmem>>, vector<1x1x128xf32>,
    return
  }
  func.func @transform_0(%arg0: i32) -> (i32, i32) {
    %c0_i32 = arith.constant 0 : i32
    %c0_i32_0 = arith.constant 0 : i32
    return %arg0, %c0_i32 : i32, i32
  }
  func.func @transform_1(%arg0: i32) -> (i32, i32) {
    %c1_i32 = arith.constant 1 : i32
    %0 = arith.addi %arg0, %c1_i32 : i32
    %c0_i32 = arith.constant 0 : i32
    %c0_i32_0 = arith.constant 0 : i32
    return %0, %c0_i32 : i32, i32
  }
  func.func @transform_2(%arg0: i32) -> (i32, i32) {
    %c0_i32 = arith.constant 0 : i32
    %c0_i32_0 = arith.constant 0 : i32
    %c0_i32_1 = arith.constant 0 : i32
    return %c0_i32, %c0_i32_0 : i32, i32
  }
  func.func @transform_3(%arg0: i32) -> (i32, i32) {
    %c0_i32 = arith.constant 0 : i32
    %c0_i32_0 = arith.constant 0 : i32
    return %arg0, %c0_i32 : i32, i32
  }
  func.func @transform_4(%arg0: i32) -> (i32, i32) {
    %c0_i32 = arith.constant 0 : i32
    %c0_i32_0 = arith.constant 0 : i32
    return %arg0, %c0_i32 : i32, i32
  }
  func.func @transform_5(%arg0: i32) -> (i32, i32, i32) {
    %c0_i32 = arith.constant 0 : i32
    %c0_i32_0 = arith.constant 0 : i32
    %c0_i32_1 = arith.constant 0 : i32
    return %arg0, %c0_i32, %c0_i32_0 : i32, i32, i32
  }
  func.func @transform_6(%arg0: i32) -> (i32, i32, i32) {
    %c0_i32 = arith.constant 0 : i32
    %c0_i32_0 = arith.constant 0 : i32
    %c0_i32_1 = arith.constant 0 : i32
    return %arg0, %c0_i32, %c0_i32_0 : i32, i32, i32
  }
}

module attributes {stable_mosaic.version = 11 : i64} {
  func.func @_bn_relu_kernel(%arg0: i32, %arg1: memref<1024x128xbf16, #tpu.memory_space<vmem>>, %arg2: memref<1x128xf32, #tpu.memory_space<vmem>>, %arg3: memref<1x128xf32, #tpu.memory_space<vmem>>, %arg4: memref<1024x128xbf16, #tpu.memory_space<vmem>>) attributes {dimension_semantics = [#tpu.dimension_semantics<parallel>], iteration_bounds = array<i64: 1>, scalar_prefetch = 0 : i64, scratch_operands = 0 : i64, tpu.core_type = #tpu.core_type<tc>, window_params = [{transform_indices = @transform_0, window_bounds = array<i64: 1024, 128>}, {pipeline_mode = #tpu.pipeline_mode<synchronous>, transform_indices = @transform_1, window_bounds = array<i64: 1, 128>}, {pipeline_mode = #tpu.pipeline_mode<synchronous>, transform_indices = @transform_2, window_bounds = array<i64: 1, 128>}, {transform_indices = @transform_3, window_bounds = array<i64: 1024, 128>}]} {
    %c0 = arith.constant 0 : index
    %c0_0 = arith.constant 0 : index
    %0 = vector.load %arg1[%c0, %c0_0] : memref<1024x128xbf16, #tpu.memory_space<vmem>>, vector<1024x128xbf16>
    %1 = arith.extf %0 : vector<1024x128xbf16> to vector<1024x128xf32>
    %c0_1 = arith.constant 0 : index
    %c0_2 = arith.constant 0 : index
    %2 = vector.load %arg2[%c0_1, %c0_2] : memref<1x128xf32, #tpu.memory_space<vmem>>, vector<1x128xf32>
    %3 = vector.broadcast %2 : vector<1x128xf32> to vector<1024x128xf32>
    %4 = arith.mulf %1, %3 : vector<1024x128xf32>
    %c0_3 = arith.constant 0 : index
    %c0_4 = arith.constant 0 : index
    %5 = vector.load %arg3[%c0_3, %c0_4] : memref<1x128xf32, #tpu.memory_space<vmem>>, vector<1x128xf32>
    %6 = vector.broadcast %5 : vector<1x128xf32> to vector<1024x128xf32>
    %7 = arith.addf %4, %6 : vector<1024x128xf32>
    %cst = arith.constant 0.000000e+00 : f32
    %8 = vector.broadcast %cst : f32 to vector<1024x128xf32>
    %9 = arith.maximumf %7, %8 : vector<1024x128xf32>
    %10 = arith.truncf %9 : vector<1024x128xf32> to vector<1024x128xbf16>
    %c0_5 = arith.constant 0 : index
    %c0_6 = arith.constant 0 : index
    %11 = vector.load %arg4[%c0_5, %c0_6] : memref<1024x128xbf16, #tpu.memory_space<vmem>>, vector<1024x128xbf16>
    tpu.vector_store %arg4[%c0_5, %c0_6], %10 {strides = array<i32>} : memref<1024x128xbf16, #tpu.memory_space<vmem>>, vector<1024x128xbf16>,
    return
  }
  func.func @transform_0(%arg0: i32) -> (i32, i32) {
    %c0_i32 = arith.constant 0 : i32
    %c0_i32_0 = arith.constant 0 : i32
    return %arg0, %c0_i32 : i32, i32
  }
  func.func @transform_1(%arg0: i32) -> (i32, i32) {
    %c0_i32 = arith.constant 0 : i32
    %c0_i32_0 = arith.constant 0 : i32
    %c0_i32_1 = arith.constant 0 : i32
    return %c0_i32, %c0_i32_0 : i32, i32
  }
  func.func @transform_2(%arg0: i32) -> (i32, i32) {
    %c0_i32 = arith.constant 0 : i32
    %c0_i32_0 = arith.constant 0 : i32
    %c0_i32_1 = arith.constant 0 : i32
    return %c0_i32, %c0_i32_0 : i32, i32
  }
  func.func @transform_3(%arg0: i32) -> (i32, i32) {
    %c0_i32 = arith.constant 0 : i32
    %c0_i32_0 = arith.constant 0 : i32
    return %arg0, %c0_i32 : i32, i32
  }
}

</mosaic_0001>

<bundles_post_ra>
// kernel: conv2d_bn_relu.3
= control target key start
LH: loop header
LB: loop body
LE: loop exit
PB: predicated region body
PF: predicated region fallthrough
CT: control target
= control target key end

     0   :  { %s2954_s0 = inlined_call_operand.vmem [shape: bf16[1024,128], index: 0, kind: input, shape index: {}, may-alias: {0,3}]   ;;  %s2955_s1 = inlined_call_operand.vmem [shape: f32[1,128], index: 1, kind: input, shape index: {}]   ;;  %s2956_s2 = inlined_call_operand.vmem [shape: f32[1,128], index: 2, kind: input, shape index: {}]   ;;  %s2957_s3 = inlined_call_operand.vmem [shape: bf16[1024,128], index: 3, kind: output, shape index: {}, may-alias: {0,3}]  }
   0x1   :  { %v1571_v0 = vld [vmem:[%s2954_s0] sm:$0xff]   ;;  %v2146_v4 = vld [vmem:[%s2954_s0 + $0x8] sm:$0xff]   ;;  %v2147_v5 = vld [vmem:[%s2954_s0 + $0x10] sm:$0xff]  }
   0x2   :  { %v2300_v1 = vld [vmem:[%s2955_s1] ss:$0 sm:$0xff]  ;;  %v1572_v2 = vunpack.c.l.bf16 %v1571_v0  ;;  %v1573_v3 = vunpack.c.h.bf16 %v1571_v0  ;;  %v2148_v6 = vld [vmem:[%s2954_s0 + $0x18] sm:$0xff]   ;;  %v1576_v8 = vunpack.c.l.bf16 %v2146_v4  ;;  %v1577_v9 = vunpack.c.h.bf16 %v2146_v4  ;;  %v2150_v33 = vld [vmem:[%s2954_s0 + $0x28] sm:$0xff]  }
   0x3   :  { %v2314_v7 = vld [vmem:[%s2956_s2] ss:$0 sm:$0xff]  ;;  %v1580_v10 = vunpack.c.l.bf16 %v2147_v5  ;;  %v1581_v11 = vunpack.c.h.bf16 %v2147_v5  ;;  %v1584_v14 = vunpack.c.l.bf16 %v2148_v6  ;;  %v1585_v15 = vunpack.c.h.bf16 %v2148_v6  ;;  %v2151_v38 = vld [vmem:[%s2954_s0 + $0x30] sm:$0xff]   ;;  %v2152_v43 = vld [vmem:[%s2954_s0 + $0x38] sm:$0xff]  }
   0x4   :  { %v277_v12 = vmul.f32 %v1572_v2, %v2300_v1  ;;  %v278_v13 = vmul.f32 %v1573_v3, %v2300_v1  ;;  %v279_v16 = vmul.f32 %v1576_v8, %v2300_v1  ;;  %v280_v17 = vmul.f32 %v1577_v9, %v2300_v1  ;;  %v2149_v28 = vld [vmem:[%s2954_s0 + $0x20] sm:$0xff]  }
   0x5   :  { %v281_v18 = vmul.f32 %v1580_v10, %v2300_v1  ;;  %v282_v19 = vmul.f32 %v1581_v11, %v2300_v1  ;;  %v283_v22 = vmul.f32 %v1584_v14, %v2300_v1  ;;  %v284_v23 = vmul.f32 %v1585_v15, %v2300_v1 }
   0x6   :  { %v412_v20 = vadd.f32 %v2314_v7, %v277_v12  ;;  %v413_v21 = vadd.f32 %v2314_v7, %v278_v13  ;;  %v414_v24 = vadd.f32 %v2314_v7, %v279_v16  ;;  %v415_v25 = vadd.f32 %v2314_v7, %v280_v17 }
   0x7   :  { %v416_v26 = vadd.f32 %v2314_v7, %v281_v18  ;;  %v417_v27 = vadd.f32 %v2314_v7, %v282_v19  ;;  %v418_v31 = vadd.f32 %v2314_v7, %v283_v22  ;;  %v419_v32 = vadd.f32 %v2314_v7, %v284_v23 }
   0x8   :  { %v540_v29 = vmax.f32 %v412_v20, 0.0  ;;  %v541_v30 = vmax.f32 %v413_v21, 0.0  ;;  %v542_v34 = vmax.f32 %v414_v24, 0.0  ;;  %v543_v35 = vmax.f32 %v415_v25, 0.0 }
   0x9   :  { %v544_v36 = vmax.f32 %v416_v26, 0.0  ;;  %v545_v37 = vmax.f32 %v417_v27, 0.0  ;;  %v546_v40 = vmax.f32 %v418_v31, 0.0  ;;  %v547_v41 = vmax.f32 %v419_v32, 0.0 }
   0xa   :  { %v1829_v39 = vpack.c.bf16 %v541_v30, %v540_v29  ;;  %v1588_v42 = vunpack.c.l.bf16 %v2149_v28  ;;  %v1834_v44 = vpack.c.bf16 %v543_v35, %v542_v34  ;;  %v1589_v46 = vunpack.c.h.bf16 %v2149_v28 }
   0xb   :  { %v1839_v45 = vpack.c.bf16 %v545_v37, %v544_v36  ;;  %v1592_v47 = vunpack.c.l.bf16 %v2150_v33  ;;  %v1844_v48 = vpack.c.bf16 %v547_v41, %v546_v40  ;;  %v1593_v50 = vunpack.c.h.bf16 %v2150_v33 }
   0xc   :  { %1830 = vst [vmem:[%s2957_s3] sm:$0xff] %v1829_v39   ;;  %v285_v49 = vmul.f32 %v1588_v42, %v2300_v1  ;;  %v1596_v51 = vunpack.c.l.bf16 %v2151_v38  ;;  %2209 = vst [vmem:[%s2957_s3 + $0x8] sm:$0xff] %v1834_v44   ;;  %v286_v52 = vmul.f32 %v1589_v46, %v2300_v1  ;;  %v1597_v54 = vunpack.c.h.bf16 %v2151_v38 }
   0xd   :  { %2210 = vst [vmem:[%s2957_s3 + $0x10] sm:$0xff] %v1839_v45   ;;  %v287_v53 = vmul.f32 %v1592_v47, %v2300_v1  ;;  %v1600_v55 = vunpack.c.l.bf16 %v2152_v43  ;;  %2211 = vst [vmem:[%s2957_s3 + $0x18] sm:$0xff] %v1844_v48   ;;  %v288_v57 = vmul.f32 %v1593_v50, %v2300_v1  ;;  %v1601_v59 = vunpack.c.h.bf16 %v2152_v43 }
   0xe   :  { %v420_v56 = vadd.f32 %v2314_v7, %v285_v49  ;;  %v289_v58 = vmul.f32 %v1596_v51, %v2300_v1  ;;  %v421_v60 = vadd.f32 %v2314_v7, %v286_v52  ;;  %v290_v62 = vmul.f32 %v1597_v54, %v2300_v1 }
   0xf   :  { %v422_v61 = vadd.f32 %v2314_v7, %v287_v53  ;;  %v291_v63 = vmul.f32 %v1600_v55, %v2300_v1  ;;  %v423_v3 = vadd.f32 %v2314_v7, %v288_v57  ;;  %v292_v5 = vmul.f32 %v1601_v59, %v2300_v1 }
  0x10   :  { %v548_v2 = vmax.f32 %v420_v56, 0.0  ;;  %v424_v4 = vadd.f32 %v2314_v7, %v289_v58  ;;  %v549_v6 = vmax.f32 %v421_v60, 0.0  ;;  %v425_v9 = vadd.f32 %v2314_v7, %v290_v62 }
  0x11   :  { %v550_v8 = vmax.f32 %v422_v61, 0.0  ;;  %v426_v10 = vadd.f32 %v2314_v7, %v291_v63  ;;  %v551_v12 = vmax.f32 %v423_v3, 0.0  ;;  %v427_v14 = vadd.f32 %v2314_v7, %v292_v5 }
  0x12   :  { %v552_v13 = vmax.f32 %v424_v4, 0.0  ;;  %v1849_v17 = vpack.c.bf16 %v549_v6, %v548_v2  ;;  %v553_v18 = vmax.f32 %v425_v9, 0.0 }
  0x13   :  { %v554_v19 = vmax.f32 %v426_v10, 0.0  ;;  %v1854_v21 = vpack.c.bf16 %v551_v12, %v550_v8  ;;  %v555_v22 = vmax.f32 %v427_v14, 0.0 }
  0x14   :  { %v2153_v0 = vld [vmem:[%s2954_s0 + $0x40] sm:$0xff]   ;;  %v2154_v11 = vld [vmem:[%s2954_s0 + $0x48] sm:$0xff]   ;;  %v2155_v16 = vld [vmem:[%s2954_s0 + $0x50] sm:$0xff]   ;;  %v1859_v26 = vpack.c.bf16 %v553_v18, %v552_v13 }
  0x15   :  { %v1604_v15 = vunpack.c.l.bf16 %v2153_v0  ;;  %v1605_v20 = vunpack.c.h.bf16 %v2153_v0  ;;  %v1608_v24 = vunpack.c.l.bf16 %v2154_v11  ;;  %v2156_v25 = vld [vmem:[%s2954_s0 + $0x58] sm:$0xff]   ;;  %v1609_v28 = vunpack.c.h.bf16 %v2154_v11 }
  0x16   :  { %2212 = vst [vmem:[%s2957_s3 + $0x20] sm:$0xff] %v1849_v17   ;;  %v1612_v29 = vunpack.c.l.bf16 %v2155_v16  ;;  %2213 = vst [vmem:[%s2957_s3 + $0x28] sm:$0xff] %v1854_v21   ;;  %v1864_v30 = vpack.c.bf16 %v555_v22, %v554_v19  ;;  %v1613_v33 = vunpack.c.h.bf16 %v2155_v16  ;;  %v1616_v37 = vunpack.c.l.bf16 %v2156_v25 }
  0x17   :  { %v293_v23 = vmul.f32 %v1604_v15, %v2300_v1  ;;  %v294_v27 = vmul.f32 %v1605_v20, %v2300_v1  ;;  %v295_v32 = vmul.f32 %v1608_v24, %v2300_v1  ;;  %2214 = vst [vmem:[%s2957_s3 + $0x30] sm:$0xff] %v1859_v26   ;;  %v296_v35 = vmul.f32 %v1609_v28, %v2300_v1 }
  0x18   :  { %v297_v36 = vmul.f32 %v1612_v29, %v2300_v1  ;;  %v298_v41 = vmul.f32 %v1613_v33, %v2300_v1  ;;  %v1617_v42 = vunpack.c.h.bf16 %v2156_v25  ;;  %v299_v46 = vmul.f32 %v1616_v37, %v2300_v1 }
  0x19   :  { %v428_v31 = vadd.f32 %v2314_v7, %v293_v23  ;;  %v429_v34 = vadd.f32 %v2314_v7, %v294_v27  ;;  %v430_v40 = vadd.f32 %v2314_v7, %v295_v32  ;;  %v431_v44 = vadd.f32 %v2314_v7, %v296_v35 }
  0x1a   :  { %v432_v45 = vadd.f32 %v2314_v7, %v297_v36  ;;  %v433_v48 = vadd.f32 %v2314_v7, %v298_v41  ;;  %v300_v49 = vmul.f32 %v1617_v42, %v2300_v1  ;;  %v434_v55 = vadd.f32 %v2314_v7, %v299_v46 }
  0x1b   :  { %v556_v39 = vmax.f32 %v428_v31, 0.0  ;;  %v557_v43 = vmax.f32 %v429_v34, 0.0  ;;  %v558_v47 = vmax.f32 %v430_v40, 0.0  ;;  %v559_v53 = vmax.f32 %v431_v44, 0.0 }
  0x1c   :  { %v560_v54 = vmax.f32 %v432_v45, 0.0  ;;  %v561_v56 = vmax.f32 %v433_v48, 0.0  ;;  %v435_v57 = vadd.f32 %v2314_v7, %v300_v49  ;;  %v562_v62 = vmax.f32 %v434_v55, 0.0 }
  0x1d   :  { %v1869_v52 = vpack.c.bf16 %v557_v43, %v556_v39  ;;  %v1874_v61 = vpack.c.bf16 %v559_v53, %v558_v47 }
  0x1e   :  { %v2157_v38 = vld [vmem:[%s2954_s0 + $0x60] sm:$0xff]   ;;  %v1879_v3 = vpack.c.bf16 %v561_v56, %v560_v54  ;;  %v563_v4 = vmax.f32 %v435_v57, 0.0 }
  0x1f   :  { %2215 = vst [vmem:[%s2957_s3 + $0x38] sm:$0xff] %v1864_v30   ;;  %v1620_v50 = vunpack.c.l.bf16 %v2157_v38  ;;  %v1621_v58 = vunpack.c.h.bf16 %v2157_v38 }
  0x20   :  { %v1884_v13 = vpack.c.bf16 %v563_v4, %v562_v62 }
  0x21   :  { %v301_v59 = vmul.f32 %v1620_v50, %v2300_v1  ;;  %v302_v5 = vmul.f32 %v1621_v58, %v2300_v1 }
  0x23   :  { %v436_v6 = vadd.f32 %v2314_v7, %v301_v59  ;;  %v437_v14 = vadd.f32 %v2314_v7, %v302_v5 }
  0x25   :  { %v564_v15 = vmax.f32 %v436_v6, 0.0  ;;  %v565_v21 = vmax.f32 %v437_v14, 0.0 }
  0x26   :  { %v2158_v51 = vld [vmem:[%s2954_s0 + $0x68] sm:$0xff]   ;;  %v2159_v60 = vld [vmem:[%s2954_s0 + $0x70] sm:$0xff]  }
  0x27   :  { %2216 = vst [vmem:[%s2957_s3 + $0x40] sm:$0xff] %v1869_v52   ;;  %v1624_v63 = vunpack.c.l.bf16 %v2158_v51  ;;  %v1625_v0 = vunpack.c.h.bf16 %v2158_v51  ;;  %v1628_v10 = vunpack.c.l.bf16 %v2159_v60  ;;  %v1629_v11 = vunpack.c.h.bf16 %v2159_v60 }
  0x28   :  { %v1889_v30 = vpack.c.bf16 %v565_v21, %v564_v15 }
  0x29   :  { %v303_v8 = vmul.f32 %v1624_v63, %v2300_v1  ;;  %v304_v9 = vmul.f32 %v1625_v0, %v2300_v1  ;;  %v305_v19 = vmul.f32 %v1628_v10, %v2300_v1  ;;  %v306_v20 = vmul.f32 %v1629_v11, %v2300_v1 }
  0x2b   :  { %v438_v17 = vadd.f32 %v2314_v7, %v303_v8  ;;  %v439_v18 = vadd.f32 %v2314_v7, %v304_v9  ;;  %v440_v27 = vadd.f32 %v2314_v7, %v305_v19  ;;  %v441_v28 = vadd.f32 %v2314_v7, %v306_v20 }
  0x2d   :  { %v566_v25 = vmax.f32 %v438_v17, 0.0  ;;  %v567_v26 = vmax.f32 %v439_v18, 0.0  ;;  %v568_v36 = vmax.f32 %v440_v27, 0.0  ;;  %v569_v37 = vmax.f32 %v441_v28, 0.0 }
  0x2e   :  { %v2160_v2 = vld [vmem:[%s2954_s0 + $0x78] sm:$0xff]  }
  0x2f   :  { %2217 = vst [vmem:[%s2957_s3 + $0x48] sm:$0xff] %v1874_v61   ;;  %v1632_v16 = vunpack.c.l.bf16 %v2160_v2  ;;  %v1633_v22 = vunpack.c.h.bf16 %v2160_v2  ;;  %v1894_v35 = vpack.c.bf16 %v567_v26, %v566_v25  ;;  %v1899_v44 = vpack.c.bf16 %v569_v37, %v568_v36 }
  0x31   :  { %v307_v23 = vmul.f32 %v1632_v16, %v2300_v1  ;;  %v308_v31 = vmul.f32 %v1633_v22, %v2300_v1 }
  0x33   :  { %v442_v32 = vadd.f32 %v2314_v7, %v307_v23  ;;  %v443_v39 = vadd.f32 %v2314_v7, %v308_v31 }
  0x35   :  { %v570_v40 = vmax.f32 %v442_v32, 0.0  ;;  %v571_v48 = vmax.f32 %v443_v39, 0.0 }
  0x36   :  { %v2161_v12 = vld [vmem:[%s2954_s0 + $0x80] sm:$0xff]  }
  0x37   :  { %2218 = vst [vmem:[%s2957_s3 + $0x50] sm:$0xff] %v1879_v3   ;;  %2219 = vst [vmem:[%s2957_s3 + $0x58] sm:$0xff] %v1884_v13   ;;  %v1636_v24 = vunpack.c.l.bf16 %v2161_v12  ;;  %v1637_v33 = vunpack.c.h.bf16 %v2161_v12  ;;  %v1904_v57 = vpack.c.bf16 %v571_v48, %v570_v40 }
  0x39   :  { %v309_v38 = vmul.f32 %v1636_v24, %v2300_v1  ;;  %v310_v41 = vmul.f32 %v1637_v33, %v2300_v1 }
  0x3b   :  { %v444_v45 = vadd.f32 %v2314_v7, %v309_v38  ;;  %v445_v49 = vadd.f32 %v2314_v7, %v310_v41 }
  0x3d   :  { %v572_v52 = vmax.f32 %v444_v45, 0.0  ;;  %v573_v58 = vmax.f32 %v445_v49, 0.0 }
  0x3e   :  { %v2162_v29 = vld [vmem:[%s2954_s0 + $0x88] sm:$0xff]   ;;  %v2163_v34 = vld [vmem:[%s2954_s0 + $0x90] sm:$0xff]  }
  0x3f   :  { %2220 = vst [vmem:[%s2957_s3 + $0x60] sm:$0xff] %v1889_v30   ;;  %v1640_v42 = vunpack.c.l.bf16 %v2162_v29  ;;  %v1641_v46 = vunpack.c.h.bf16 %v2162_v29  ;;  %v1644_v47 = vunpack.c.l.bf16 %v2163_v34  ;;  %v1645_v51 = vunpack.c.h.bf16 %v2163_v34 }
  0x40   :  { %v1909_v3 = vpack.c.bf16 %v573_v58, %v572_v52 }
  0x41   :  { %v311_v50 = vmul.f32 %v1640_v42, %v2300_v1  ;;  %v312_v53 = vmul.f32 %v1641_v46, %v2300_v1  ;;  %v313_v54 = vmul.f32 %v1644_v47, %v2300_v1  ;;  %v314_v60 = vmul.f32 %v1645_v51, %v2300_v1 }
  0x43   :  { %v446_v59 = vadd.f32 %v2314_v7, %v311_v50  ;;  %v447_v61 = vadd.f32 %v2314_v7, %v312_v53  ;;  %v448_v62 = vadd.f32 %v2314_v7, %v313_v54  ;;  %v449_v5 = vadd.f32 %v2314_v7, %v314_v60 }
  0x45   :  { %v574_v4 = vmax.f32 %v446_v59, 0.0  ;;  %v575_v8 = vmax.f32 %v447_v61, 0.0  ;;  %v576_v9 = vmax.f32 %v448_v62, 0.0  ;;  %v577_v12 = vmax.f32 %v449_v5, 0.0 }
  0x46   :  { %v2164_v43 = vld [vmem:[%s2954_s0 + $0x98] sm:$0xff]  }
  0x47   :  { %2221 = vst [vmem:[%s2957_s3 + $0x68] sm:$0xff] %v1894_v35   ;;  %2222 = vst [vmem:[%s2957_s3 + $0x70] sm:$0xff] %v1899_v44   ;;  %v1648_v55 = vunpack.c.l.bf16 %v2164_v43  ;;  %v1649_v63 = vunpack.c.h.bf16 %v2164_v43  ;;  %v1914_v17 = vpack.c.bf16 %v575_v8, %v574_v4  ;;  %v1919_v22 = vpack.c.bf16 %v577_v12, %v576_v9 }
  0x49   :  { %v315_v0 = vmul.f32 %v1648_v55, %v2300_v1  ;;  %v316_v10 = vmul.f32 %v1649_v63, %v2300_v1 }
  0x4b   :  { %v450_v11 = vadd.f32 %v2314_v7, %v315_v0  ;;  %v451_v18 = vadd.f32 %v2314_v7, %v316_v10 }
  0x4d   :  { %v578_v19 = vmax.f32 %v450_v11, 0.0  ;;  %v579_v26 = vmax.f32 %v451_v18, 0.0 }
  0x4e   :  { %v2165_v56 = vld [vmem:[%s2954_s0 + $0xa0] sm:$0xff]   ;;  %v2166_v2 = vld [vmem:[%s2954_s0 + $0xa8] sm:$0xff]  }
  0x4f   :  { %2223 = vst [vmem:[%s2957_s3 + $0x78] sm:$0xff] %v1904_v57   ;;  %v1652_v6 = vunpack.c.l.bf16 %v2165_v56  ;;  %2224 = vst [vmem:[%s2957_s3 + $0x80] sm:$0xff] %v1909_v3   ;;  %v1653_v13 = vunpack.c.h.bf16 %v2165_v56  ;;  %v1656_v15 = vunpack.c.l.bf16 %v2166_v2  ;;  %v1657_v20 = vunpack.c.h.bf16 %v2166_v2 }
  0x50   :  { %v1924_v35 = vpack.c.bf16 %v579_v26, %v578_v19 }
  0x51   :  { %v317_v14 = vmul.f32 %v1652_v6, %v2300_v1  ;;  %v318_v23 = vmul.f32 %v1653_v13, %v2300_v1  ;;  %v319_v25 = vmul.f32 %v1656_v15, %v2300_v1  ;;  %v320_v27 = vmul.f32 %v1657_v20, %v2300_v1 }
  0x53   :  { %v452_v24 = vadd.f32 %v2314_v7, %v317_v14  ;;  %v453_v30 = vadd.f32 %v2314_v7, %v318_v23  ;;  %v454_v32 = vadd.f32 %v2314_v7, %v319_v25  ;;  %v455_v36 = vadd.f32 %v2314_v7, %v320_v27 }
  0x55   :  { %v580_v31 = vmax.f32 %v452_v24, 0.0  ;;  %v581_v39 = vmax.f32 %v453_v30, 0.0  ;;  %v582_v40 = vmax.f32 %v454_v32, 0.0  ;;  %v583_v43 = vmax.f32 %v455_v36, 0.0 }
  0x56   :  { %v2167_v16 = vld [vmem:[%s2954_s0 + $0xb0] sm:$0xff]   ;;  %v2168_v21 = vld [vmem:[%s2954_s0 + $0xb8] sm:$0xff]  }
  0x57   :  { %2225 = vst [vmem:[%s2957_s3 + $0x88] sm:$0xff] %v1914_v17   ;;  %v1660_v28 = vunpack.c.l.bf16 %v2167_v16  ;;  %v1661_v29 = vunpack.c.h.bf16 %v2167_v16  ;;  %2226 = vst [vmem:[%s2957_s3 + $0x90] sm:$0xff] %v1919_v22   ;;  %v1664_v33 = vunpack.c.l.bf16 %v2168_v21  ;;  %v1665_v41 = vunpack.c.h.bf16 %v2168_v21 }
  0x58   :  { %v1929_v48 = vpack.c.bf16 %v581_v39, %v580_v31  ;;  %v1934_v53 = vpack.c.bf16 %v583_v43, %v582_v40 }
  0x59   :  { %v321_v37 = vmul.f32 %v1660_v28, %v2300_v1  ;;  %v322_v38 = vmul.f32 %v1661_v29, %v2300_v1  ;;  %v323_v42 = vmul.f32 %v1664_v33, %v2300_v1  ;;  %v324_v49 = vmul.f32 %v1665_v41, %v2300_v1 }
  0x5b   :  { %v456_v44 = vadd.f32 %v2314_v7, %v321_v37  ;;  %v457_v45 = vadd.f32 %v2314_v7, %v322_v38  ;;  %v458_v50 = vadd.f32 %v2314_v7, %v323_v42  ;;  %v459_v57 = vadd.f32 %v2314_v7, %v324_v49 }
  0x5d   :  { %v584_v54 = vmax.f32 %v456_v44, 0.0  ;;  %v585_v55 = vmax.f32 %v457_v45, 0.0  ;;  %v586_v58 = vmax.f32 %v458_v50, 0.0  ;;  %v587_v3 = vmax.f32 %v459_v57, 0.0 }
  0x5e   :  { %v2169_v34 = vld [vmem:[%s2954_s0 + $0xc0] sm:$0xff]  }
  0x5f   :  { %2227 = vst [vmem:[%s2957_s3 + $0x98] sm:$0xff] %v1924_v35   ;;  %v1668_v46 = vunpack.c.l.bf16 %v2169_v34  ;;  %v1669_v51 = vunpack.c.h.bf16 %v2169_v34  ;;  %v1939_v62 = vpack.c.bf16 %v585_v55, %v584_v54  ;;  %v1944_v13 = vpack.c.bf16 %v587_v3, %v586_v58 }
  0x61   :  { %v325_v56 = vmul.f32 %v1668_v46, %v2300_v1  ;;  %v326_v59 = vmul.f32 %v1669_v51, %v2300_v1 }
  0x63   :  { %v460_v63 = vadd.f32 %v2314_v7, %v325_v56  ;;  %v461_v4 = vadd.f32 %v2314_v7, %v326_v59 }
  0x65   :  { %v588_v8 = vmax.f32 %v460_v63, 0.0  ;;  %v589_v14 = vmax.f32 %v461_v4, 0.0 }
  0x66   :  { %v2170_v47 = vld [vmem:[%s2954_s0 + $0xc8] sm:$0xff]   ;;  %v2171_v52 = vld [vmem:[%s2954_s0 + $0xd0] sm:$0xff]  }
  0x67   :  { %2228 = vst [vmem:[%s2957_s3 + $0xa0] sm:$0xff] %v1929_v48   ;;  %v1672_v60 = vunpack.c.l.bf16 %v2170_v47  ;;  %v1673_v0 = vunpack.c.h.bf16 %v2170_v47  ;;  %v1676_v2 = vunpack.c.l.bf16 %v2171_v52  ;;  %v1677_v6 = vunpack.c.h.bf16 %v2171_v52 }
  0x68   :  { %v1949_v22 = vpack.c.bf16 %v589_v14, %v588_v8 }
  0x69   :  { %v327_v5 = vmul.f32 %v1672_v60, %v2300_v1  ;;  %v328_v9 = vmul.f32 %v1673_v0, %v2300_v1  ;;  %v329_v10 = vmul.f32 %v1676_v2, %v2300_v1  ;;  %v330_v16 = vmul.f32 %v1677_v6, %v2300_v1 }
  0x6b   :  { %v462_v15 = vadd.f32 %v2314_v7, %v327_v5  ;;  %v463_v17 = vadd.f32 %v2314_v7, %v328_v9  ;;  %v464_v18 = vadd.f32 %v2314_v7, %v329_v10  ;;  %v465_v24 = vadd.f32 %v2314_v7, %v330_v16 }
  0x6d   :  { %v590_v23 = vmax.f32 %v462_v15, 0.0  ;;  %v591_v26 = vmax.f32 %v463_v17, 0.0  ;;  %v592_v27 = vmax.f32 %v464_v18, 0.0  ;;  %v593_v30 = vmax.f32 %v465_v24, 0.0 }
  0x6e   :  { %v2172_v61 = vld [vmem:[%s2954_s0 + $0xd8] sm:$0xff]  }
  0x6f   :  { %2229 = vst [vmem:[%s2957_s3 + $0xa8] sm:$0xff] %v1934_v53   ;;  %2230 = vst [vmem:[%s2957_s3 + $0xb0] sm:$0xff] %v1939_v62   ;;  %v1680_v11 = vunpack.c.l.bf16 %v2172_v61  ;;  %v1681_v19 = vunpack.c.h.bf16 %v2172_v61  ;;  %v1954_v35 = vpack.c.bf16 %v591_v26, %v590_v23  ;;  %v1959_v40 = vpack.c.bf16 %v593_v30, %v592_v27 }
  0x71   :  { %v331_v20 = vmul.f32 %v1680_v11, %v2300_v1  ;;  %v332_v28 = vmul.f32 %v1681_v19, %v2300_v1 }
  0x73   :  { %v466_v29 = vadd.f32 %v2314_v7, %v331_v20  ;;  %v467_v36 = vadd.f32 %v2314_v7, %v332_v28 }
  0x75   :  { %v594_v37 = vmax.f32 %v466_v29, 0.0  ;;  %v595_v44 = vmax.f32 %v467_v36, 0.0 }
  0x76   :  { %v2173_v12 = vld [vmem:[%s2954_s0 + $0xe0] sm:$0xff]   ;;  %v2174_v21 = vld [vmem:[%s2954_s0 + $0xe8] sm:$0xff]  }
  0x77   :  { %2231 = vst [vmem:[%s2957_s3 + $0xb8] sm:$0xff] %v1944_v13   ;;  %v1684_v25 = vunpack.c.l.bf16 %v2173_v12  ;;  %2232 = vst [vmem:[%s2957_s3 + $0xc0] sm:$0xff] %v1949_v22   ;;  %v1685_v31 = vunpack.c.h.bf16 %v2173_v12  ;;  %v1688_v33 = vunpack.c.l.bf16 %v2174_v21  ;;  %v1689_v38 = vunpack.c.h.bf16 %v2174_v21 }
  0x78   :  { %v1964_v53 = vpack.c.bf16 %v595_v44, %v594_v37 }
  0x79   :  { %v333_v32 = vmul.f32 %v1684_v25, %v2300_v1  ;;  %v334_v41 = vmul.f32 %v1685_v31, %v2300_v1  ;;  %v335_v43 = vmul.f32 %v1688_v33, %v2300_v1  ;;  %v336_v45 = vmul.f32 %v1689_v38, %v2300_v1 }
  0x7b   :  { %v468_v42 = vadd.f32 %v2314_v7, %v333_v32  ;;  %v469_v48 = vadd.f32 %v2314_v7, %v334_v41  ;;  %v470_v50 = vadd.f32 %v2314_v7, %v335_v43  ;;  %v471_v54 = vadd.f32 %v2314_v7, %v336_v45 }
  0x7d   :  { %v596_v49 = vmax.f32 %v468_v42, 0.0  ;;  %v597_v57 = vmax.f32 %v469_v48, 0.0  ;;  %v598_v58 = vmax.f32 %v470_v50, 0.0  ;;  %v599_v61 = vmax.f32 %v471_v54, 0.0 }
  0x7e   :  { %v2175_v34 = vld [vmem:[%s2954_s0 + $0xf0] sm:$0xff]   ;;  %v2176_v39 = vld [vmem:[%s2954_s0 + $0xf8] sm:$0xff]  }
  0x7f   :  { %2233 = vst [vmem:[%s2957_s3 + $0xc8] sm:$0xff] %v1954_v35   ;;  %v1692_v46 = vunpack.c.l.bf16 %v2175_v34  ;;  %v1693_v47 = vunpack.c.h.bf16 %v2175_v34  ;;  %2234 = vst [vmem:[%s2957_s3 + $0xd0] sm:$0xff] %v1959_v40   ;;  %v1696_v51 = vunpack.c.l.bf16 %v2176_v39  ;;  %v1697_v59 = vunpack.c.h.bf16 %v2176_v39 }
  0x80   :  { %v1969_v3 = vpack.c.bf16 %v597_v57, %v596_v49  ;;  %v1974_v9 = vpack.c.bf16 %v599_v61, %v598_v58 }
  0x81   :  { %v337_v55 = vmul.f32 %v1692_v46, %v2300_v1  ;;  %v338_v56 = vmul.f32 %v1693_v47, %v2300_v1  ;;  %v339_v60 = vmul.f32 %v1696_v51, %v2300_v1  ;;  %v340_v4 = vmul.f32 %v1697_v59, %v2300_v1 }
  0x83   :  { %v472_v62 = vadd.f32 %v2314_v7, %v337_v55  ;;  %v473_v63 = vadd.f32 %v2314_v7, %v338_v56  ;;  %v474_v5 = vadd.f32 %v2314_v7, %v339_v60  ;;  %v475_v13 = vadd.f32 %v2314_v7, %v340_v4 }
  0x85   :  { %v600_v10 = vmax.f32 %v472_v62, 0.0  ;;  %v601_v11 = vmax.f32 %v473_v63, 0.0  ;;  %v602_v14 = vmax.f32 %v474_v5, 0.0  ;;  %v603_v22 = vmax.f32 %v475_v13, 0.0 }
  0x86   :  { %v2177_v52 = vld [vmem:[%s2954_s0 + $0x100] sm:$0xff]  }
  0x87   :  { %2235 = vst [vmem:[%s2957_s3 + $0xd8] sm:$0xff] %v1964_v53   ;;  %v1700_v0 = vunpack.c.l.bf16 %v2177_v52  ;;  %v1701_v6 = vunpack.c.h.bf16 %v2177_v52  ;;  %v1979_v18 = vpack.c.bf16 %v601_v11, %v600_v10  ;;  %v1984_v31 = vpack.c.bf16 %v603_v22, %v602_v14 }
  0x89   :  { %v341_v12 = vmul.f32 %v1700_v0, %v2300_v1  ;;  %v342_v15 = vmul.f32 %v1701_v6, %v2300_v1 }
  0x8b   :  { %v476_v19 = vadd.f32 %v2314_v7, %v341_v12  ;;  %v477_v23 = vadd.f32 %v2314_v7, %v342_v15 }
  0x8d   :  { %v604_v26 = vmax.f32 %v476_v19, 0.0  ;;  %v605_v32 = vmax.f32 %v477_v23, 0.0 }
  0x8e   :  { %v2178_v2 = vld [vmem:[%s2954_s0 + $0x108] sm:$0xff]   ;;  %v2179_v8 = vld [vmem:[%s2954_s0 + $0x110] sm:$0xff]  }
  0x8f   :  { %2236 = vst [vmem:[%s2957_s3 + $0xe0] sm:$0xff] %v1969_v3   ;;  %v1704_v16 = vunpack.c.l.bf16 %v2178_v2  ;;  %v1705_v20 = vunpack.c.h.bf16 %v2178_v2  ;;  %v1708_v21 = vunpack.c.l.bf16 %v2179_v8  ;;  %v1709_v25 = vunpack.c.h.bf16 %v2179_v8 }
  0x90   :  { %v1989_v40 = vpack.c.bf16 %v605_v32, %v604_v26 }
  0x91   :  { %v343_v24 = vmul.f32 %v1704_v16, %v2300_v1  ;;  %v344_v27 = vmul.f32 %v1705_v20, %v2300_v1  ;;  %v345_v28 = vmul.f32 %v1708_v21, %v2300_v1  ;;  %v346_v34 = vmul.f32 %v1709_v25, %v2300_v1 }
  0x93   :  { %v478_v33 = vadd.f32 %v2314_v7, %v343_v24  ;;  %v479_v35 = vadd.f32 %v2314_v7, %v344_v27  ;;  %v480_v36 = vadd.f32 %v2314_v7, %v345_v28  ;;  %v481_v42 = vadd.f32 %v2314_v7, %v346_v34 }
  0x95   :  { %v606_v41 = vmax.f32 %v478_v33, 0.0  ;;  %v607_v44 = vmax.f32 %v479_v35, 0.0  ;;  %v608_v45 = vmax.f32 %v480_v36, 0.0  ;;  %v609_v48 = vmax.f32 %v481_v42, 0.0 }
  0x96   :  { %v2180_v17 = vld [vmem:[%s2954_s0 + $0x118] sm:$0xff]  }
  0x97   :  { %2237 = vst [vmem:[%s2957_s3 + $0xe8] sm:$0xff] %v1974_v9   ;;  %2238 = vst [vmem:[%s2957_s3 + $0xf0] sm:$0xff] %v1979_v18   ;;  %v1712_v29 = vunpack.c.l.bf16 %v2180_v17  ;;  %v1713_v37 = vunpack.c.h.bf16 %v2180_v17  ;;  %v1994_v53 = vpack.c.bf16 %v607_v44, %v606_v41  ;;  %v1999_v58 = vpack.c.bf16 %v609_v48, %v608_v45 }
  0x99   :  { %v347_v38 = vmul.f32 %v1712_v29, %v2300_v1  ;;  %v348_v46 = vmul.f32 %v1713_v37, %v2300_v1 }
  0x9b   :  { %v482_v47 = vadd.f32 %v2314_v7, %v347_v38  ;;  %v483_v54 = vadd.f32 %v2314_v7, %v348_v46 }
  0x9d   :  { %v610_v55 = vmax.f32 %v482_v47, 0.0  ;;  %v611_v62 = vmax.f32 %v483_v54, 0.0 }
  0x9e   :  { %v2181_v30 = vld [vmem:[%s2954_s0 + $0x120] sm:$0xff]   ;;  %v2182_v39 = vld [vmem:[%s2954_s0 + $0x128] sm:$0xff]  }
  0x9f   :  { %2239 = vst [vmem:[%s2957_s3 + $0xf8] sm:$0xff] %v1984_v31   ;;  %v1716_v43 = vunpack.c.l.bf16 %v2181_v30  ;;  %2240 = vst [vmem:[%s2957_s3 + $0x100] sm:$0xff] %v1989_v40   ;;  %v1717_v49 = vunpack.c.h.bf16 %v2181_v30  ;;  %v1720_v51 = vunpack.c.l.bf16 %v2182_v39  ;;  %v1721_v56 = vunpack.c.h.bf16 %v2182_v39 }
  0xa0   :  { %v2004_v9 = vpack.c.bf16 %v611_v62, %v610_v55 }
  0xa1   :  { %v349_v50 = vmul.f32 %v1716_v43, %v2300_v1  ;;  %v350_v59 = vmul.f32 %v1717_v49, %v2300_v1  ;;  %v351_v61 = vmul.f32 %v1720_v51, %v2300_v1  ;;  %v352_v63 = vmul.f32 %v1721_v56, %v2300_v1 }
  0xa3   :  { %v484_v60 = vadd.f32 %v2314_v7, %v349_v50  ;;  %v485_v3 = vadd.f32 %v2314_v7, %v350_v59  ;;  %v486_v5 = vadd.f32 %v2314_v7, %v351_v61  ;;  %v487_v10 = vadd.f32 %v2314_v7, %v352_v63 }
  0xa5   :  { %v612_v4 = vmax.f32 %v484_v60, 0.0  ;;  %v613_v13 = vmax.f32 %v485_v3, 0.0  ;;  %v614_v14 = vmax.f32 %v486_v5, 0.0  ;;  %v615_v17 = vmax.f32 %v487_v10, 0.0 }
  0xa6   :  { %v2183_v52 = vld [vmem:[%s2954_s0 + $0x130] sm:$0xff]   ;;  %v2184_v57 = vld [vmem:[%s2954_s0 + $0x138] sm:$0xff]  }
  0xa7   :  { %2241 = vst [vmem:[%s2957_s3 + $0x108] sm:$0xff] %v1994_v53   ;;  %v1724_v0 = vunpack.c.l.bf16 %v2183_v52  ;;  %v1725_v2 = vunpack.c.h.bf16 %v2183_v52  ;;  %2242 = vst [vmem:[%s2957_s3 + $0x110] sm:$0xff] %v1999_v58   ;;  %v1728_v6 = vunpack.c.l.bf16 %v2184_v57  ;;  %v1729_v15 = vunpack.c.h.bf16 %v2184_v57 }
  0xa8   :  { %v2009_v22 = vpack.c.bf16 %v613_v13, %v612_v4  ;;  %v2014_v27 = vpack.c.bf16 %v615_v17, %v614_v14 }
  0xa9   :  { %v353_v11 = vmul.f32 %v1724_v0, %v2300_v1  ;;  %v354_v12 = vmul.f32 %v1725_v2, %v2300_v1  ;;  %v355_v16 = vmul.f32 %v1728_v6, %v2300_v1  ;;  %v356_v23 = vmul.f32 %v1729_v15, %v2300_v1 }
  0xab   :  { %v488_v18 = vadd.f32 %v2314_v7, %v353_v11  ;;  %v489_v19 = vadd.f32 %v2314_v7, %v354_v12  ;;  %v490_v24 = vadd.f32 %v2314_v7, %v355_v16  ;;  %v491_v31 = vadd.f32 %v2314_v7, %v356_v23 }
  0xad   :  { %v616_v28 = vmax.f32 %v488_v18, 0.0  ;;  %v617_v29 = vmax.f32 %v489_v19, 0.0  ;;  %v618_v32 = vmax.f32 %v490_v24, 0.0  ;;  %v619_v40 = vmax.f32 %v491_v31, 0.0 }
  0xae   :  { %v2185_v8 = vld [vmem:[%s2954_s0 + $0x140] sm:$0xff]  }
  0xaf   :  { %2243 = vst [vmem:[%s2957_s3 + $0x118] sm:$0xff] %v2004_v9   ;;  %v1732_v20 = vunpack.c.l.bf16 %v2185_v8  ;;  %v1733_v25 = vunpack.c.h.bf16 %v2185_v8  ;;  %v2019_v36 = vpack.c.bf16 %v617_v29, %v616_v28  ;;  %v2024_v49 = vpack.c.bf16 %v619_v40, %v618_v32 }
  0xb1   :  { %v357_v30 = vmul.f32 %v1732_v20, %v2300_v1  ;;  %v358_v33 = vmul.f32 %v1733_v25, %v2300_v1 }
  0xb3   :  { %v492_v37 = vadd.f32 %v2314_v7, %v357_v30  ;;  %v493_v41 = vadd.f32 %v2314_v7, %v358_v33 }
  0xb5   :  { %v620_v44 = vmax.f32 %v492_v37, 0.0  ;;  %v621_v50 = vmax.f32 %v493_v41, 0.0  ;;  %v2778_v41 = vld [vmem:[%s2955_s1] ss:$0 sm:$0xff] }
  0xb6   :  { %v2186_v21 = vld [vmem:[%s2954_s0 + $0x148] sm:$0xff]   ;;  %v2187_v26 = vld [vmem:[%s2954_s0 + $0x150] sm:$0xff]  }
  0xb7   :  { %2244 = vst [vmem:[%s2957_s3 + $0x120] sm:$0xff] %v2009_v22   ;;  %v1736_v34 = vunpack.c.l.bf16 %v2186_v21  ;;  %v1737_v38 = vunpack.c.h.bf16 %v2186_v21  ;;  %v1740_v39 = vunpack.c.l.bf16 %v2187_v26  ;;  %v1741_v43 = vunpack.c.h.bf16 %v2187_v26 }
  0xb8   :  { %v2029_v58 = vpack.c.bf16 %v621_v50, %v620_v44 }
  0xb9   :  { %v359_v42 = vmul.f32 %v1736_v34, %v2300_v1  ;;  %v360_v45 = vmul.f32 %v1737_v38, %v2300_v1  ;;  %v361_v46 = vmul.f32 %v1740_v39, %v2300_v1  ;;  %v362_v52 = vmul.f32 %v1741_v43, %v2300_v1 }
  0xbb   :  { %v494_v51 = vadd.f32 %v2314_v7, %v359_v42  ;;  %v495_v53 = vadd.f32 %v2314_v7, %v360_v45  ;;  %v496_v54 = vadd.f32 %v2314_v7, %v361_v46  ;;  %v497_v60 = vadd.f32 %v2314_v7, %v362_v52  ;;  %v2784_v42 = vld [vmem:[%s2956_s2] ss:$0 sm:$0xff] }
  0xbd   :  { %v622_v59 = vmax.f32 %v494_v51, 0.0  ;;  %v623_v62 = vmax.f32 %v495_v53, 0.0  ;;  %v624_v63 = vmax.f32 %v496_v54, 0.0  ;;  %v625_v3 = vmax.f32 %v497_v60, 0.0 }
  0xbe   :  { %v2188_v35 = vld [vmem:[%s2954_s0 + $0x158] sm:$0xff]  }
  0xbf   :  { %2245 = vst [vmem:[%s2957_s3 + $0x128] sm:$0xff] %v2014_v27   ;;  %2246 = vst [vmem:[%s2957_s3 + $0x130] sm:$0xff] %v2019_v36   ;;  %v1744_v47 = vunpack.c.l.bf16 %v2188_v35  ;;  %v1745_v55 = vunpack.c.h.bf16 %v2188_v35  ;;  %v2034_v9 = vpack.c.bf16 %v623_v62, %v622_v59  ;;  %v2039_v14 = vpack.c.bf16 %v625_v3, %v624_v63 }
  0xc1   :  { %v363_v56 = vmul.f32 %v1744_v47, %v2300_v1  ;;  %v364_v0 = vmul.f32 %v1745_v55, %v2300_v1 }
  0xc3   :  { %v498_v2 = vadd.f32 %v2314_v7, %v363_v56  ;;  %v499_v10 = vadd.f32 %v2314_v7, %v364_v0 }
  0xc5   :  { %v626_v11 = vmax.f32 %v498_v2, 0.0  ;;  %v627_v18 = vmax.f32 %v499_v10, 0.0 }
  0xc6   :  { %v2189_v48 = vld [vmem:[%s2954_s0 + $0x160] sm:$0xff]   ;;  %v2190_v57 = vld [vmem:[%s2954_s0 + $0x168] sm:$0xff]  }
  0xc7   :  { %2247 = vst [vmem:[%s2957_s3 + $0x138] sm:$0xff] %v2024_v49   ;;  %v1748_v61 = vunpack.c.l.bf16 %v2189_v48  ;;  %2248 = vst [vmem:[%s2957_s3 + $0x140] sm:$0xff] %v2029_v58   ;;  %v1749_v4 = vunpack.c.h.bf16 %v2189_v48  ;;  %v1752_v6 = vunpack.c.l.bf16 %v2190_v57  ;;  %v1753_v12 = vunpack.c.h.bf16 %v2190_v57 }
  0xc8   :  { %v2044_v27 = vpack.c.bf16 %v627_v18, %v626_v11 }
  0xc9   :  { %v365_v5 = vmul.f32 %v1748_v61, %v2300_v1  ;;  %v366_v15 = vmul.f32 %v1749_v4, %v2300_v1  ;;  %v367_v17 = vmul.f32 %v1752_v6, %v2300_v1  ;;  %v368_v19 = vmul.f32 %v1753_v12, %v2300_v1 }
  0xcb   :  { %v500_v16 = vadd.f32 %v2314_v7, %v365_v5  ;;  %v501_v22 = vadd.f32 %v2314_v7, %v366_v15  ;;  %v502_v24 = vadd.f32 %v2314_v7, %v367_v17  ;;  %v503_v28 = vadd.f32 %v2314_v7, %v368_v19 }
  0xcd   :  { %v628_v23 = vmax.f32 %v500_v16, 0.0  ;;  %v629_v31 = vmax.f32 %v501_v22, 0.0  ;;  %v630_v32 = vmax.f32 %v502_v24, 0.0  ;;  %v631_v35 = vmax.f32 %v503_v28, 0.0 }
  0xce   :  { %v2191_v8 = vld [vmem:[%s2954_s0 + $0x170] sm:$0xff]   ;;  %v2192_v13 = vld [vmem:[%s2954_s0 + $0x178] sm:$0xff]  }
  0xcf   :  { %2249 = vst [vmem:[%s2957_s3 + $0x148] sm:$0xff] %v2034_v9   ;;  %v1756_v20 = vunpack.c.l.bf16 %v2191_v8  ;;  %v1757_v21 = vunpack.c.h.bf16 %v2191_v8  ;;  %2250 = vst [vmem:[%s2957_s3 + $0x150] sm:$0xff] %v2039_v14   ;;  %v1760_v25 = vunpack.c.l.bf16 %v2192_v13  ;;  %v1761_v33 = vunpack.c.h.bf16 %v2192_v13 }
  0xd0   :  { %v2049_v40 = vpack.c.bf16 %v629_v31, %v628_v23  ;;  %v2054_v45 = vpack.c.bf16 %v631_v35, %v630_v32 }
  0xd1   :  { %v369_v29 = vmul.f32 %v1756_v20, %v2300_v1  ;;  %v370_v30 = vmul.f32 %v1757_v21, %v2300_v1  ;;  %v371_v34 = vmul.f32 %v1760_v25, %v2300_v1  ;;  %v372_v1 = vmul.f32 %v2778_v41, %v1761_v33 }
  0xd3   :  { %v504_v36 = vadd.f32 %v2314_v7, %v369_v29  ;;  %v505_v37 = vadd.f32 %v2314_v7, %v370_v30  ;;  %v506_v7 = vadd.f32 %v2784_v42, %v371_v34  ;;  %v507_v49 = vadd.f32 %v2784_v42, %v372_v1 }
  0xd5   :  { %v632_v46 = vmax.f32 %v504_v36, 0.0  ;;  %v633_v47 = vmax.f32 %v505_v37, 0.0  ;;  %v634_v50 = vmax.f32 %v506_v7, 0.0  ;;  %v635_v58 = vmax.f32 %v507_v49, 0.0 }
  0xd6   :  { %v2193_v26 = vld [vmem:[%s2954_s0 + $0x180] sm:$0xff]  }
  0xd7   :  { %2251 = vst [vmem:[%s2957_s3 + $0x158] sm:$0xff] %v2044_v27   ;;  %v1764_v38 = vunpack.c.l.bf16 %v2193_v26  ;;  %v1765_v43 = vunpack.c.h.bf16 %v2193_v26  ;;  %v2059_v54 = vpack.c.bf16 %v633_v47, %v632_v46  ;;  %v2064_v4 = vpack.c.bf16 %v635_v58, %v634_v50 }
  0xd9   :  { %v373_v48 = vmul.f32 %v2778_v41, %v1764_v38  ;;  %v374_v51 = vmul.f32 %v2778_v41, %v1765_v43 }
  0xdb   :  { %v508_v55 = vadd.f32 %v2784_v42, %v373_v48  ;;  %v509_v59 = vadd.f32 %v2784_v42, %v374_v51 }
  0xdd   :  { %v636_v62 = vmax.f32 %v508_v55, 0.0  ;;  %v637_v5 = vmax.f32 %v509_v59, 0.0 }
  0xde   :  { %v2194_v39 = vld [vmem:[%s2954_s0 + $0x188] sm:$0xff]   ;;  %v2195_v44 = vld [vmem:[%s2954_s0 + $0x190] sm:$0xff]  }
  0xdf   :  { %2252 = vst [vmem:[%s2957_s3 + $0x160] sm:$0xff] %v2049_v40   ;;  %v1768_v52 = vunpack.c.l.bf16 %v2194_v39  ;;  %v1769_v56 = vunpack.c.h.bf16 %v2194_v39  ;;  %v1772_v57 = vunpack.c.l.bf16 %v2195_v44  ;;  %v1773_v61 = vunpack.c.h.bf16 %v2195_v44 }
  0xe0   :  { %v2069_v14 = vpack.c.bf16 %v637_v5, %v636_v62 }
  0xe1   :  { %v375_v60 = vmul.f32 %v2778_v41, %v1768_v52  ;;  %v376_v63 = vmul.f32 %v2778_v41, %v1769_v56  ;;  %v377_v0 = vmul.f32 %v2778_v41, %v1772_v57  ;;  %v378_v8 = vmul.f32 %v2778_v41, %v1773_v61 }
  0xe3   :  { %v510_v6 = vadd.f32 %v2784_v42, %v375_v60  ;;  %v511_v9 = vadd.f32 %v2784_v42, %v376_v63  ;;  %v512_v10 = vadd.f32 %v2784_v42, %v377_v0  ;;  %v513_v16 = vadd.f32 %v2784_v42, %v378_v8 }
  0xe5   :  { %v638_v15 = vmax.f32 %v510_v6, 0.0  ;;  %v639_v18 = vmax.f32 %v511_v9, 0.0  ;;  %v640_v19 = vmax.f32 %v512_v10, 0.0  ;;  %v641_v22 = vmax.f32 %v513_v16, 0.0 }
  0xe6   :  { %v2196_v53 = vld [vmem:[%s2954_s0 + $0x198] sm:$0xff]  }
  0xe7   :  { %2253 = vst [vmem:[%s2957_s3 + $0x168] sm:$0xff] %v2054_v45   ;;  %2254 = vst [vmem:[%s2957_s3 + $0x170] sm:$0xff] %v2059_v54   ;;  %v1776_v2 = vunpack.c.l.bf16 %v2196_v53  ;;  %v1777_v11 = vunpack.c.h.bf16 %v2196_v53  ;;  %v2074_v27 = vpack.c.bf16 %v639_v18, %v638_v15  ;;  %v2079_v32 = vpack.c.bf16 %v641_v22, %v640_v19 }
  0xe9   :  { %v379_v12 = vmul.f32 %v2778_v41, %v1776_v2  ;;  %v380_v20 = vmul.f32 %v2778_v41, %v1777_v11 }
  0xeb   :  { %v514_v21 = vadd.f32 %v2784_v42, %v379_v12  ;;  %v515_v28 = vadd.f32 %v2784_v42, %v380_v20 }
  0xed   :  { %v642_v29 = vmax.f32 %v514_v21, 0.0  ;;  %v643_v36 = vmax.f32 %v515_v28, 0.0 }
  0xee   :  { %v2197_v3 = vld [vmem:[%s2954_s0 + $0x1a0] sm:$0xff]   ;;  %v2198_v13 = vld [vmem:[%s2954_s0 + $0x1a8] sm:$0xff]  }
  0xef   :  { %2255 = vst [vmem:[%s2957_s3 + $0x178] sm:$0xff] %v2064_v4   ;;  %v1780_v17 = vunpack.c.l.bf16 %v2197_v3  ;;  %2256 = vst [vmem:[%s2957_s3 + $0x180] sm:$0xff] %v2069_v14   ;;  %v1781_v23 = vunpack.c.h.bf16 %v2197_v3  ;;  %v1784_v25 = vunpack.c.l.bf16 %v2198_v13  ;;  %v1785_v30 = vunpack.c.h.bf16 %v2198_v13 }
  0xf0   :  { %v2084_v45 = vpack.c.bf16 %v643_v36, %v642_v29 }
  0xf1   :  { %v381_v24 = vmul.f32 %v2778_v41, %v1780_v17  ;;  %v382_v33 = vmul.f32 %v2778_v41, %v1781_v23  ;;  %v383_v35 = vmul.f32 %v2778_v41, %v1784_v25  ;;  %v384_v37 = vmul.f32 %v2778_v41, %v1785_v30 }
  0xf3   :  { %v516_v34 = vadd.f32 %v2784_v42, %v381_v24  ;;  %v517_v40 = vadd.f32 %v2784_v42, %v382_v33  ;;  %v518_v7 = vadd.f32 %v2784_v42, %v383_v35  ;;  %v519_v46 = vadd.f32 %v2784_v42, %v384_v37 }
  0xf5   :  { %v644_v1 = vmax.f32 %v516_v34, 0.0  ;;  %v645_v49 = vmax.f32 %v517_v40, 0.0  ;;  %v646_v50 = vmax.f32 %v518_v7, 0.0  ;;  %v647_v53 = vmax.f32 %v519_v46, 0.0 }
  0xf6   :  { %v2199_v26 = vld [vmem:[%s2954_s0 + $0x1b0] sm:$0xff]   ;;  %v2200_v31 = vld [vmem:[%s2954_s0 + $0x1b8] sm:$0xff]  }
  0xf7   :  { %2257 = vst [vmem:[%s2957_s3 + $0x188] sm:$0xff] %v2074_v27   ;;  %v1788_v38 = vunpack.c.l.bf16 %v2199_v26  ;;  %v1789_v39 = vunpack.c.h.bf16 %v2199_v26  ;;  %2258 = vst [vmem:[%s2957_s3 + $0x190] sm:$0xff] %v2079_v32   ;;  %v1792_v43 = vunpack.c.l.bf16 %v2200_v31  ;;  %v1793_v51 = vunpack.c.h.bf16 %v2200_v31 }
  0xf8   :  { %v2089_v58 = vpack.c.bf16 %v645_v49, %v644_v1  ;;  %v2094_v63 = vpack.c.bf16 %v647_v53, %v646_v50 }
  0xf9   :  { %v385_v47 = vmul.f32 %v2778_v41, %v1788_v38  ;;  %v386_v48 = vmul.f32 %v2778_v41, %v1789_v39  ;;  %v387_v52 = vmul.f32 %v2778_v41, %v1792_v43  ;;  %v388_v59 = vmul.f32 %v2778_v41, %v1793_v51 }
  0xfb   :  { %v520_v54 = vadd.f32 %v2784_v42, %v385_v47  ;;  %v521_v55 = vadd.f32 %v2784_v42, %v386_v48  ;;  %v522_v60 = vadd.f32 %v2784_v42, %v387_v52  ;;  %v523_v4 = vadd.f32 %v2784_v42, %v388_v59 }
  0xfd   :  { %v648_v0 = vmax.f32 %v520_v54, 0.0  ;;  %v649_v2 = vmax.f32 %v521_v55, 0.0  ;;  %v650_v5 = vmax.f32 %v522_v60, 0.0  ;;  %v651_v14 = vmax.f32 %v523_v4, 0.0 }
  0xfe   :  { %v2201_v44 = vld [vmem:[%s2954_s0 + $0x1c0] sm:$0xff]  }
  0xff   :  { %2259 = vst [vmem:[%s2957_s3 + $0x198] sm:$0xff] %v2084_v45   ;;  %v1796_v56 = vunpack.c.l.bf16 %v2201_v44  ;;  %v1797_v61 = vunpack.c.h.bf16 %v2201_v44  ;;  %v2099_v10 = vpack.c.bf16 %v649_v2, %v648_v0  ;;  %v2104_v23 = vpack.c.bf16 %v651_v14, %v650_v5 }
 0x101   :  { %v389_v3 = vmul.f32 %v2778_v41, %v1796_v56  ;;  %v390_v6 = vmul.f32 %v2778_v41, %v1797_v61 }
 0x103   :  { %v524_v11 = vadd.f32 %v2784_v42, %v389_v3  ;;  %v525_v15 = vadd.f32 %v2784_v42, %v390_v6 }
 0x105   :  { %v652_v18 = vmax.f32 %v524_v11, 0.0  ;;  %v653_v24 = vmax.f32 %v525_v15, 0.0 }
 0x106   :  { %v2202_v57 = vld [vmem:[%s2954_s0 + $0x1c8] sm:$0xff]   ;;  %v2203_v62 = vld [vmem:[%s2954_s0 + $0x1d0] sm:$0xff]  }
 0x107   :  { %2260 = vst [vmem:[%s2957_s3 + $0x1a0] sm:$0xff] %v2089_v58   ;;  %v1800_v8 = vunpack.c.l.bf16 %v2202_v57  ;;  %v1801_v12 = vunpack.c.h.bf16 %v2202_v57  ;;  %v1804_v13 = vunpack.c.l.bf16 %v2203_v62  ;;  %v1805_v17 = vunpack.c.h.bf16 %v2203_v62 }
 0x108   :  { %v2109_v32 = vpack.c.bf16 %v653_v24, %v652_v18 }
 0x109   :  { %v391_v16 = vmul.f32 %v2778_v41, %v1800_v8  ;;  %v392_v19 = vmul.f32 %v2778_v41, %v1801_v12  ;;  %v393_v20 = vmul.f32 %v2778_v41, %v1804_v13  ;;  %v394_v26 = vmul.f32 %v2778_v41, %v1805_v17 }
 0x10b   :  { %v526_v25 = vadd.f32 %v2784_v42, %v391_v16  ;;  %v527_v27 = vadd.f32 %v2784_v42, %v392_v19  ;;  %v528_v28 = vadd.f32 %v2784_v42, %v393_v20  ;;  %v529_v34 = vadd.f32 %v2784_v42, %v394_v26 }
 0x10d   :  { %v654_v33 = vmax.f32 %v526_v25, 0.0  ;;  %v655_v36 = vmax.f32 %v527_v27, 0.0  ;;  %v656_v37 = vmax.f32 %v528_v28, 0.0  ;;  %v657_v40 = vmax.f32 %v529_v34, 0.0 }
 0x10e   :  { %v2204_v9 = vld [vmem:[%s2954_s0 + $0x1d8] sm:$0xff]  }
 0x10f   :  { %2261 = vst [vmem:[%s2957_s3 + $0x1a8] sm:$0xff] %v2094_v63   ;;  %2262 = vst [vmem:[%s2957_s3 + $0x1b0] sm:$0xff] %v2099_v10   ;;  %v1808_v21 = vunpack.c.l.bf16 %v2204_v9  ;;  %v1809_v29 = vunpack.c.h.bf16 %v2204_v9  ;;  %v2114_v45 = vpack.c.bf16 %v655_v36, %v654_v33  ;;  %v2119_v50 = vpack.c.bf16 %v657_v40, %v656_v37 }
 0x111   :  { %v395_v30 = vmul.f32 %v2778_v41, %v1808_v21  ;;  %v396_v38 = vmul.f32 %v2778_v41, %v1809_v29 }
 0x113   :  { %v530_v39 = vadd.f32 %v2784_v42, %v395_v30  ;;  %v531_v46 = vadd.f32 %v2784_v42, %v396_v38 }
 0x115   :  { %v658_v47 = vmax.f32 %v530_v39, 0.0  ;;  %v659_v54 = vmax.f32 %v531_v46, 0.0 }
 0x116   :  { %v2205_v22 = vld [vmem:[%s2954_s0 + $0x1e0] sm:$0xff]   ;;  %v2206_v31 = vld [vmem:[%s2954_s0 + $0x1e8] sm:$0xff]  }
 0x117   :  { %2263 = vst [vmem:[%s2957_s3 + $0x1b8] sm:$0xff] %v2104_v23   ;;  %v1812_v35 = vunpack.c.l.bf16 %v2205_v22  ;;  %2264 = vst [vmem:[%s2957_s3 + $0x1c0] sm:$0xff] %v2109_v32   ;;  %v1813_v1 = vunpack.c.h.bf16 %v2205_v22  ;;  %v1816_v43 = vunpack.c.l.bf16 %v2206_v31  ;;  %v1817_v48 = vunpack.c.h.bf16 %v2206_v31 }
 0x118   :  { %v2124_v62 = vpack.c.bf16 %v659_v54, %v658_v47 }
 0x119   :  { %v397_v7 = vmul.f32 %v2778_v41, %v1812_v35  ;;  %v398_v51 = vmul.f32 %v2778_v41, %v1813_v1  ;;  %v399_v53 = vmul.f32 %v2778_v41, %v1816_v43  ;;  %v400_v55 = vmul.f32 %v2778_v41, %v1817_v48 }
 0x11b   :  { %v532_v52 = vadd.f32 %v2784_v42, %v397_v7  ;;  %v533_v58 = vadd.f32 %v2784_v42, %v398_v51  ;;  %v534_v60 = vadd.f32 %v2784_v42, %v399_v53  ;;  %v535_v63 = vadd.f32 %v2784_v42, %v400_v55 }
 0x11d   :  { %v660_v59 = vmax.f32 %v532_v52, 0.0  ;;  %v661_v3 = vmax.f32 %v533_v58, 0.0  ;;  %v662_v4 = vmax.f32 %v534_v60, 0.0  ;;  %v663_v8 = vmax.f32 %v535_v63, 0.0 }
 0x11e   :  { %v2207_v44 = vld [vmem:[%s2954_s0 + $0x1f0] sm:$0xff]   ;;  %v2208_v49 = vld [vmem:[%s2954_s0 + $0x1f8] sm:$0xff]  }
 0x11f   :  { %2265 = vst [vmem:[%s2957_s3 + $0x1c8] sm:$0xff] %v2114_v45   ;;  %v1820_v56 = vunpack.c.l.bf16 %v2207_v44  ;;  %v1821_v57 = vunpack.c.h.bf16 %v2207_v44  ;;  %2266 = vst [vmem:[%s2957_s3 + $0x1d0] sm:$0xff] %v2119_v50   ;;  %v1824_v61 = vunpack.c.l.bf16 %v2208_v49  ;;  %v1825_v5 = vunpack.c.h.bf16 %v2208_v49 }
 0x120   :  { %2267 = vst [vmem:[%s2957_s3 + $0x1d8] sm:$0xff] %v2124_v62   ;;  %v2129_v11 = vpack.c.bf16 %v661_v3, %v660_v59  ;;  %v2134_v14 = vpack.c.bf16 %v663_v8, %v662_v4 }
 0x121   :  { %v401_v0 = vmul.f32 %v2778_v41, %v1820_v56  ;;  %v402_v2 = vmul.f32 %v2778_v41, %v1821_v57  ;;  %v403_v6 = vmul.f32 %v2778_v41, %v1824_v61  ;;  %v404_v12 = vmul.f32 %v2778_v41, %v1825_v5 }
 0x122   :  { %2268 = vst [vmem:[%s2957_s3 + $0x1e0] sm:$0xff] %v2129_v11   ;;  %2269 = vst [vmem:[%s2957_s3 + $0x1e8] sm:$0xff] %v2134_v14  }
 0x123   :  { %v536_v9 = vadd.f32 %v2784_v42, %v401_v0  ;;  %v537_v10 = vadd.f32 %v2784_v42, %v402_v2  ;;  %v538_v13 = vadd.f32 %v2784_v42, %v403_v6  ;;  %v539_v17 = vadd.f32 %v2784_v42, %v404_v12 }
 0x125   :  { %v664_v15 = vmax.f32 %v536_v9, 0.0  ;;  %v665_v16 = vmax.f32 %v537_v10, 0.0  ;;  %v666_v18 = vmax.f32 %v538_v13, 0.0  ;;  %v667_v20 = vmax.f32 %v539_v17, 0.0 }
 0x127   :  { %v2139_v19 = vpack.c.bf16 %v665_v16, %v664_v15  ;;  %v2144_v41 = vpack.c.bf16 %v667_v20, %v666_v18 }
 0x129   :  { %2270 = vst [vmem:[%s2957_s3 + $0x1f0] sm:$0xff] %v2139_v19   ;;  %2271 = vst [vmem:[%s2957_s3 + $0x1f8] sm:$0xff] %v2144_v41  }

// kernel: conv2d_bn_relu.2
= control target key start
LH: loop header
LB: loop body
LE: loop exit
PB: predicated region body
PF: predicated region fallthrough
CT: control target
= control target key end

     0   :  { %s6543_s21 = smov 0   ;;  %s8451_s0 = inlined_call_operand.vmem [shape: bf16[1536,4], index: 0, kind: input, shape index: {}, may-alias: {0,1}]   ;;  %s8452_s1 = inlined_call_operand.vmem [shape: bf16[1536,4], index: 1, kind: input, shape index: {}, may-alias: {0,1}]   ;;  %s8453_s2 = inlined_call_operand.vmem [shape: bf16[36,128], index: 2, kind: input, shape index: {}]   ;;  %s8454_s3 = inlined_call_operand.vmem [shape: bf16[1024,1], index: 3, kind: input, shape index: {}]   ;;  %s8455_s4 = inlined_call_operand.vmem [shape: bf16[1024,128], index: 4, kind: output, shape index: {0}]   ;;  %s8456_s5 = inlined_call_operand.vmem [shape: f32[2,1,128], index: 5, kind: output, shape index: {1}]   ;;  %s8457_s6 = inlined_call_operand.vmem [shape: f32[2,1,128], index: 6, kind: output, shape index: {2}]  }
   0x1 LB: > { %s6549_s22 = sadd.s32 4294967295, %s6497_s21   ;;  %p4376_p0 = scmp.ge.s32.totalorder %s6497_s21, 1  ;;  %s6497_s21 = sphi %s6543_s21, %s17_s21  }
   0x2   : > { %p244_p1 = scmp.lt.s32.totalorder %s6497_s21, 3 }
   0x4   : > { %p245_p2 = pnand %p4376_p0, %p244_p1 }
   0x5   : > { %s6554_s23 = sshll.u32 (!%p245_p2), %s6549_s22, 6  ;;  %vm462_vm0 = vcmask (!%p245_p2), 31744   ;;  %s6499_s29 = smov (!%p245_p2), 4   ;;  %vm785_vm1 = vcmask (!%p245_p2), 64544   ;;  %vm783_vm2 = vcmask (!%p245_p2), 64545   ;;  %vm853_vm3 = vcmask (!%p245_p2), 57376  }
   0x6   : > { %248 = sbr.rel (%p245_p2) target bundleno = 956 (0x3bc), region = 36  ;;  %p292_p3 = scmp.lt.s32.totalorder (!%p245_p2), %s6554_s23, 191  ;;  %vm1047_vm4 = vcmask (!%p245_p2), 97346   ;;  %vm1049_vm5 = vcmask (!%p245_p2), 97344   ;;  %vm1116_vm6 = vcmask (!%p245_p2), 91200   ;;  %vm1306_vm7 = vcmask (!%p245_p2), 130144  }
   0x7   : > { %s4487_s30 = sadd.s32 (!%p245_p2), 64, %s6554_s23  ;;  %s6500_s11 = smov (!%p245_p2), 8   ;;  %vm1304_vm8 = vcmask (!%p245_p2), 130146   ;;  %vm1381_vm9 = vcmask (!%p245_p2), 124000   ;;  %vm1569_vm10 = vcmask (!%p245_p2), 162947   ;;  %vm1571_vm11 = vcmask (!%p245_p2), 162944  }
   0x8   : > { %p299_p4 = scmp.lt.s32.totalorder (!%p245_p2), %s4487_s30, 191  ;;  %s6501_s12 = smov (!%p245_p2), 12   ;;  %vm1644_vm12 = vcmask (!%p245_p2), 157824   ;;  %vm1832_vm13 = vcmask (!%p245_p2), 195748   ;;  %vm1834_vm14 = vcmask (!%p245_p2), 195744   ;;  %vm1907_vm15 = vcmask (!%p245_p2), 191648  }
   0x9   : > { %s6502_s13 = smov (!%p245_p2), 16   ;;  %s6503_s14 = smov (!%p245_p2), 20  }
   0xa   : > { %s6504_s15 = smov (!%p245_p2), 24   ;;  %s6505_s16 = smov (!%p245_p2), 28  }
   0xb   : > { %s6507_s26 = smov (!%p245_p2), 32   ;;  %p306_p5 = scmp.lt.s32.totalorder (!%p245_p2), %s6554_s23, 127 }
   0xc   : > { %p317_p6 = scmp.lt.s32.totalorder (!%p245_p2), %s6549_s22, 1 }
   0xd   : > { %s293_s24 = scalar_select %p292_p3, %s6554_s23, 191 }
   0xe   : > { %s8471_s30 = smov (!%p299_p4, %s4487_s30), 191  ;;  %s8473_s23 = smov (!%p306_p5, %s6554_s23), 127 }
   0xf   : > { %s4378_s25 = sshll.u32 %s293_s24, 2  ;;  %s4380_s7 = sshll.u32 %s8471_s30, 2 }
  0x10   : > { %s6561_s28 = scalar_lea.vmem %s8451_s0, %s4378_s25  ;;  %s7031_s10 = scalar_lea.vmem %s8452_s1, %s4380_s7 }
  0x11   : > { %v4977_v0 = vld [vmem:[%s6561_s28 + $0x10] sm:$0xff]   ;;  %v4553_v1 = vld [vmem:[%s6561_s28] sm:$0xff]   ;;  %v4978_v2 = vld [vmem:[%s6561_s28 + $0x18] sm:$0xff]   ;;  %s4382_s27 = sshll.u32 %s8473_s23, 2  ;;  %s8475_s22 = smov (!%p317_p6, %s6549_s22), 1 }
  0x12   : > { %v4562_v3 = vunpack.c.l.bf16 %v4977_v0  ;;  %v4563_v4 = vunpack.c.h.bf16 %v4977_v0  ;;  %v4554_v5 = vunpack.c.l.bf16 %v4553_v1  ;;  %v4555_v6 = vunpack.c.h.bf16 %v4553_v1  ;;  %v4976_v7 = vld [vmem:[%s6561_s28 + $0x8] sm:$0xff]   ;;  %v4979_v9 = vld [vmem:[%s6561_s28 + $0x20] sm:$0xff]   ;;  %v6570_v14 = vld [vmem:[%s6561_s28 + $0x38] sm:$0xff]   ;;  %s7925_s30 = scalar_lea.vmem %s8454_s3, %s4382_s27  ;;  %s8169_s9 = scalar_lea.vmem %s8455_s4, %s4382_s27 }
  0x13   : > { %v4980_v8 = vld [vmem:[%s6561_s28 + $0x28] sm:$0xff]   ;;  %v4566_v10 = vunpack.c.l.bf16 %v4978_v2  ;;  %v4567_v11 = vunpack.c.h.bf16 %v4978_v2  ;;  %v4558_v12 = vunpack.c.l.bf16 %v4976_v7  ;;  %v4559_v13 = vunpack.c.h.bf16 %v4976_v7  ;;  %v6573_v15 = vld [vmem:[%s6561_s28 + $0x30] sm:$0xff]   ;;  %v6593_v24 = vld [vmem:[%s6561_s28 + $0x40] sm:$0xff]  }
  0x14   : > { %v6575_v16 = vpack.i.bf16 %v4563_v4, %v4562_v3  ;;  %464 = vst.msk [vmem:[#allocation2 + $0x8] sm:$0xff] %vm462_vm0, %v4555_v6  ;;  %v6578_v17 = vpack.i.bf16 %v4555_v6, %v4554_v5  ;;  %463 = vst.msk [vmem:[#allocation2] sm:$0xff] %vm462_vm0, %v4554_v5  ;;  %v4574_v18 = vunpack.c.l.bf16 %v4980_v8  ;;  %v4575_v19 = vunpack.c.h.bf16 %v4980_v8  ;;  %v6584_v20 = vld [vmem:[%s6561_s28 + $0x48] sm:$0xff]   ;;  %v6596_v25 = vld [vmem:[%s6561_s28 + $0x58] sm:$0xff]  }
  0x15   : > { %467 = vst.msk [vmem:[#allocation2 + $0x20] sm:$0xff] %vm462_vm0, %v4562_v3  ;;  %468 = vst.msk [vmem:[#allocation2 + $0x28] sm:$0xff] %vm462_vm0, %v4563_v4  ;;  %v6586_v21 = vpack.i.bf16 %v4567_v11, %v4566_v10  ;;  %v4570_v22 = vunpack.c.l.bf16 %v4979_v9  ;;  %v4571_v23 = vunpack.c.h.bf16 %v4979_v9  ;;  %v6602_v26 = vpack.i.bf16 %v4559_v13, %v4558_v12  ;;  %v6610_v30 = vld [vmem:[%s6561_s28 + $0x50] sm:$0xff]   ;;  %v6618_v34 = vld [vmem:[%s6561_s28 + $0x68] sm:$0xff]  }
  0x16   : > { %469 = vst.msk [vmem:[#allocation2 + $0x30] sm:$0xff] %vm462_vm0, %v4566_v10  ;;  %470 = vst.msk [vmem:[#allocation2 + $0x38] sm:$0xff] %vm462_vm0, %v4567_v11  ;;  %5211 = vrot.lane.b32.xlu1 %v6575_v16, %s6499_s29  ;;  %5201 = vrot.lane.b32.xlu0 %v6578_v17, %s6499_s29  ;;  %v4582_v27 = vunpack.c.l.bf16 %v6570_v14  ;;  %v4583_v28 = vunpack.c.h.bf16 %v6570_v14  ;;  %v4578_v29 = vunpack.c.l.bf16 %v6573_v15  ;;  %v4579_v31 = vunpack.c.h.bf16 %v6573_v15  ;;  %v6627_v38 = vld [vmem:[%s6561_s28 + $0x60] sm:$0xff]   ;;  %v6630_v39 = vld [vmem:[%s6561_s28 + $0x78] sm:$0xff]  }
  0x17   : > { %465 = vst.msk [vmem:[#allocation2 + $0x10] sm:$0xff] %vm462_vm0, %v4558_v12  ;;  %466 = vst.msk [vmem:[#allocation2 + $0x18] sm:$0xff] %vm462_vm0, %v4559_v13  ;;  %v4590_v32 = vunpack.c.l.bf16 %v6584_v20  ;;  %v4591_v33 = vunpack.c.h.bf16 %v6584_v20  ;;  %v4586_v35 = vunpack.c.l.bf16 %v6593_v24  ;;  %v4587_v36 = vunpack.c.h.bf16 %v6593_v24  ;;  %v6644_v43 = vld [vmem:[%s6561_s28 + $0x70] sm:$0xff]   ;;  %v6665_v48 = vld [vmem:[%s6561_s28 + $0x88] sm:$0xff]  }
  0x18   : > { %473 = vst.msk [vmem:[#allocation2 + $0x50] sm:$0xff] %vm462_vm0, %v4574_v18  ;;  %474 = vst.msk [vmem:[#allocation2 + $0x58] sm:$0xff] %vm462_vm0, %v4575_v19  ;;  %v4598_v37 = vunpack.c.l.bf16 %v6596_v25  ;;  %v6632_v40 = vpack.i.bf16 %v4575_v19, %v4574_v18  ;;  %v4599_v41 = vunpack.c.h.bf16 %v6596_v25  ;;  %v4594_v42 = vunpack.c.l.bf16 %v6610_v30  ;;  %v6677_v52 = vld [vmem:[%s6561_s28 + $0x80] sm:$0xff]   ;;  %v6680_v53 = vld [vmem:[%s6561_s28 + $0x98] sm:$0xff]  }
  0x19   : > { %471 = vst.msk [vmem:[#allocation2 + $0x40] sm:$0xff] %vm462_vm0, %v4570_v22  ;;  %472 = vst.msk [vmem:[#allocation2 + $0x48] sm:$0xff] %vm462_vm0, %v4571_v23  ;;  %v6650_v44 = vpack.i.bf16 %v4571_v23, %v4570_v22  ;;  %v4595_v45 = vunpack.c.h.bf16 %v6610_v30  ;;  %v4606_v46 = vunpack.c.l.bf16 %v6618_v34  ;;  %v4607_v47 = vunpack.c.h.bf16 %v6618_v34  ;;  %v6694_v56 = vld [vmem:[%s6561_s28 + $0x90] sm:$0xff]   ;;  %v6711_v61 = vld [vmem:[%s6561_s28 + $0xa8] sm:$0xff]  }
  0x1a   : > { %477 = vst.msk [vmem:[#allocation2 + $0x70] sm:$0xff] %vm462_vm0, %v4582_v27  ;;  %478 = vst.msk [vmem:[#allocation2 + $0x78] sm:$0xff] %vm462_vm0, %v4583_v28  ;;  %5216 = vrot.lane.b32.xlu1 %v6586_v21, %s6499_s29  ;;  %5206 = vrot.lane.b32.xlu0 %v6602_v26, %s6499_s29  ;;  %v4602_v49 = vunpack.c.l.bf16 %v6627_v38  ;;  %v4603_v50 = vunpack.c.h.bf16 %v6627_v38  ;;  %v4614_v51 = vunpack.c.l.bf16 %v6630_v39  ;;  %v4615_v54 = vunpack.c.h.bf16 %v6630_v39  ;;  %v6729_v2 = vld [vmem:[%s6561_s28 + $0xa0] sm:$0xff]   ;;  %v6732_v3 = vld [vmem:[%s6561_s28 + $0xb8] sm:$0xff]  }
  0x1b   : > { %475 = vst.msk [vmem:[#allocation2 + $0x60] sm:$0xff] %vm462_vm0, %v4578_v29  ;;  %476 = vst.msk [vmem:[#allocation2 + $0x68] sm:$0xff] %vm462_vm0, %v4579_v31  ;;  %v4610_v55 = vunpack.c.l.bf16 %v6644_v43  ;;  %v6696_v57 = vpack.i.bf16 %v4583_v28, %v4582_v27  ;;  %v4611_v58 = vunpack.c.h.bf16 %v6644_v43  ;;  %v4622_v59 = vunpack.c.l.bf16 %v6665_v48  ;;  %v6746_v6 = vld [vmem:[%s6561_s28 + $0xb0] sm:$0xff]   ;;  %v6761_v10 = vld [vmem:[%s6561_s28 + $0xc8] sm:$0xff]  }
  0x1c   : > { %481 = vst.msk [vmem:[#allocation2 + $0x90] sm:$0xff] %vm462_vm0, %v4590_v32  ;;  %482 = vst.msk [vmem:[#allocation2 + $0x98] sm:$0xff] %vm462_vm0, %v4591_v33  ;;  %v4623_v60 = vunpack.c.h.bf16 %v6665_v48  ;;  %v6717_v62 = vpack.i.bf16 %v4579_v31, %v4578_v29  ;;  %v4618_v63 = vunpack.c.l.bf16 %v6677_v52  ;;  %v4619_v0 = vunpack.c.h.bf16 %v6677_v52  ;;  %v6773_v14 = vld [vmem:[%s6561_s28 + $0xc0] sm:$0xff]   ;;  %v6776_v15 = vld [vmem:[%s6561_s28 + $0xd8] sm:$0xff]  }
  0x1d   : > { %479 = vst.msk [vmem:[#allocation2 + $0x80] sm:$0xff] %vm462_vm0, %v4586_v35  ;;  %480 = vst.msk [vmem:[#allocation2 + $0x88] sm:$0xff] %vm462_vm0, %v4587_v36  ;;  %v4630_v1 = vunpack.c.l.bf16 %v6680_v53  ;;  %v4631_v4 = vunpack.c.h.bf16 %v6680_v53  ;;  %v4626_v5 = vunpack.c.l.bf16 %v6694_v56  ;;  %v4627_v7 = vunpack.c.h.bf16 %v6694_v56  ;;  %v6806_v23 = vld [vmem:[%s6561_s28 + $0xd0] sm:$0xff]   ;;  %v6821_v29 = vld [vmem:[%s6561_s28 + $0xe8] sm:$0xff]  }
  0x1e   : > { %485 = vst.msk [vmem:[#allocation2 + $0xb0] sm:$0xff] %vm462_vm0, %v4598_v37  ;;  %486 = vst.msk [vmem:[#allocation2 + $0xb8] sm:$0xff] %vm462_vm0, %v4599_v41  ;;  %5226 = vrot.lane.b32.xlu1 %v6632_v40, %s6499_s29  ;;  %5221 = vrot.lane.b32.xlu0 %v6650_v44, %s6499_s29  ;;  %v4638_v8 = vunpack.c.l.bf16 %v6711_v61  ;;  %v4639_v9 = vunpack.c.h.bf16 %v6711_v61  ;;  %v4634_v11 = vunpack.c.l.bf16 %v6729_v2  ;;  %v8461_v12 = vunpack.c.h.bf16 %v6729_v2 }
  0x1f   : > { %483 = vst.msk [vmem:[#allocation2 + $0xa0] sm:$0xff] %vm462_vm0, %v4594_v42  ;;  %484 = vst.msk [vmem:[#allocation2 + $0xa8] sm:$0xff] %vm462_vm0, %v4595_v45  ;;  %v8458_v13 = vunpack.c.l.bf16 %v6732_v3  ;;  %v6786_v18 = vpack.i.bf16 %v4591_v33, %v4590_v32  ;;  %v6792_v19 = vpack.i.bf16 %v4587_v36, %v4586_v35  ;;  %v8460_v20 = vunpack.c.h.bf16 %v6732_v3  ;;  %v6833_v35 = vld [vmem:[%s6561_s28 + $0xe0] sm:$0xff]   ;;  %v6836_v36 = vld [vmem:[%s6561_s28 + $0xf8] sm:$0xff]  }
  0x20   : > { %489 = vst.msk [vmem:[#allocation2 + $0xd0] sm:$0xff] %vm462_vm0, %v4606_v46  ;;  %490 = vst.msk [vmem:[#allocation2 + $0xd8] sm:$0xff] %vm462_vm0, %v4607_v47  ;;  %v8459_v22 = vunpack.c.l.bf16 %v6746_v6  ;;  %v4643_v24 = vunpack.c.h.bf16 %v6746_v6  ;;  %v4654_v27 = vunpack.c.l.bf16 %v6761_v10  ;;  %v4655_v28 = vunpack.c.h.bf16 %v6761_v10 }
  0x21   : > { %487 = vst.msk [vmem:[#allocation2 + $0xc0] sm:$0xff] %vm462_vm0, %v4602_v49  ;;  %488 = vst.msk [vmem:[#allocation2 + $0xc8] sm:$0xff] %vm462_vm0, %v4603_v50  ;;  %v4650_v31 = vunpack.c.l.bf16 %v6773_v14  ;;  %v8462_v32 = vunpack.c.h.bf16 %v6773_v14  ;;  %v8463_v33 = vunpack.c.l.bf16 %v6776_v15  ;;  %v6866_v25 = vpack.i.bf16 %v4595_v45, %v4594_v42 }
  0x22   : > { %493 = vst.msk [vmem:[#allocation2 + $0xf0] sm:$0xff] %vm462_vm0, %v4614_v51  ;;  %494 = vst.msk [vmem:[#allocation2 + $0xf8] sm:$0xff] %vm462_vm0, %v4615_v54  ;;  %5236 = vrot.lane.b32.xlu1 %v6696_v57, %s6499_s29  ;;  %5231 = vrot.lane.b32.xlu0 %v6717_v62, %s6499_s29  ;;  %v4671_v30 = vunpack.c.h.bf16 %v6821_v29  ;;  %v4666_v42 = vunpack.c.l.bf16 %v6833_v35  ;;  %v4667_v45 = vunpack.c.h.bf16 %v6833_v35  ;;  %v6921_v34 = vpack.i.bf16 %v4615_v54, %v4614_v51 }
  0x23   : > { %491 = vst.msk [vmem:[#allocation2 + $0xe0] sm:$0xff] %vm462_vm0, %v4610_v55  ;;  %492 = vst.msk [vmem:[#allocation2 + $0xe8] sm:$0xff] %vm462_vm0, %v4611_v58  ;;  %v6927_v38 = vpack.i.bf16 %v4611_v58, %v4610_v55  ;;  %v6937_v39 = vpack.i.bf16 %v4623_v60, %v4622_v59  ;;  %v6943_v43 = vpack.i.bf16 %v4619_v0, %v4618_v63  ;;  %v8465_v51 = vunpack.c.l.bf16 %v6732_v3 }
  0x24   : > { %497 = vst.msk [vmem:[#allocation2 + $0x110] sm:$0xff] %vm462_vm0, %v4622_v59  ;;  %498 = vst.msk [vmem:[#allocation2 + $0x118] sm:$0xff] %vm462_vm0, %v4623_v60  ;;  %v6969_v48 = vpack.i.bf16 %v4639_v9, %v4638_v8  ;;  %v8466_v52 = vunpack.c.h.bf16 %v6732_v3  ;;  %v8467_v54 = vunpack.c.l.bf16 %v6746_v6  ;;  %v7002_v56 = vpack.i.bf16 %v4655_v28, %v4654_v27 }
  0x25   : > { %495 = vst.msk [vmem:[#allocation2 + $0x100] sm:$0xff] %vm462_vm0, %v4618_v63  ;;  %496 = vst.msk [vmem:[#allocation2 + $0x108] sm:$0xff] %vm462_vm0, %v4619_v0  ;;  %v8468_v58 = vunpack.c.h.bf16 %v6773_v14  ;;  %v8469_v60 = vunpack.c.l.bf16 %v6776_v15 }
  0x26   : > { %501 = vst.msk [vmem:[#allocation2 + $0x130] sm:$0xff] %vm462_vm0, %v4630_v1  ;;  %502 = vst.msk [vmem:[#allocation2 + $0x138] sm:$0xff] %vm462_vm0, %v4631_v4  ;;  %5246 = vrot.lane.b32.xlu1 %v6786_v18, %s6499_s29  ;;  %5241 = vrot.lane.b32.xlu0 %v6792_v19, %s6499_s29  ;;  %v6985_v53 = vpack.i.bf16 %v8466_v52, %v8465_v51  ;;  %v6991_v55 = vpack.i.bf16 %v4643_v24, %v8467_v54 }
  0x27   : > { %499 = vst.msk [vmem:[#allocation2 + $0x120] sm:$0xff] %vm462_vm0, %v4626_v5  ;;  %500 = vst.msk [vmem:[#allocation2 + $0x128] sm:$0xff] %vm462_vm0, %v4627_v7  ;;  %v7008_v59 = vpack.i.bf16 %v8468_v58, %v4650_v31 }
  0x28   : > { %505 = vst.msk [vmem:[#allocation2 + $0x150] sm:$0xff] %vm462_vm0, %v4638_v8  ;;  %506 = vst.msk [vmem:[#allocation2 + $0x158] sm:$0xff] %vm462_vm0, %v4639_v9 }
  0x29   : > { %503 = vst.msk [vmem:[#allocation2 + $0x140] sm:$0xff] %vm462_vm0, %v4634_v11  ;;  %504 = vst.msk [vmem:[#allocation2 + $0x148] sm:$0xff] %vm462_vm0, %v8461_v12  ;;  %v6856_v12 = vld [vmem:[%s6561_s28 + $0xf0] sm:$0xff]  }
  0x2a   : > { %509 = vst.msk [vmem:[#allocation2 + $0x170] sm:$0xff] %vm462_vm0, %v8458_v13  ;;  %510 = vst.msk [vmem:[#allocation2 + $0x178] sm:$0xff] %vm462_vm0, %v8460_v20  ;;  %v6842_v13 = vpack.i.bf16 %v4599_v41, %v4598_v37  ;;  %v4658_v20 = vunpack.c.l.bf16 %v6806_v23  ;;  %v4659_v37 = vunpack.c.h.bf16 %v6806_v23  ;;  %v4670_v41 = vunpack.c.l.bf16 %v6821_v29  ;;  %5251 = vrot.lane.b32.xlu0 %v6866_v25, %s6499_s29 }
  0x2b   : > { %507 = vst.msk [vmem:[#allocation2 + $0x160] sm:$0xff] %vm462_vm0, %v8459_v22  ;;  %508 = vst.msk [vmem:[#allocation2 + $0x168] sm:$0xff] %vm462_vm0, %v4643_v24  ;;  %v4663_v22 = vunpack.c.h.bf16 %v6776_v15  ;;  %v4679_v23 = vunpack.c.h.bf16 %v6836_v36  ;;  %v4674_v29 = vunpack.c.l.bf16 %v6856_v12  ;;  %v4675_v35 = vunpack.c.h.bf16 %v6856_v12 }
  0x2c   : > { %513 = vst.msk [vmem:[#allocation2 + $0x190] sm:$0xff] %vm462_vm0, %v4654_v27  ;;  %514 = vst.msk [vmem:[#allocation2 + $0x198] sm:$0xff] %vm462_vm0, %v4655_v28  ;;  %5256 = vrot.lane.b32.xlu1 %v6842_v13, %s6499_s29  ;;  %v7018_v63 = vpack.i.bf16 %v4659_v37, %v4658_v20  ;;  %v7024_v0 = vpack.i.bf16 %v4671_v30, %v4670_v41 }
  0x2d   : > { %511 = vst.msk [vmem:[#allocation2 + $0x180] sm:$0xff] %vm462_vm0, %v4650_v31  ;;  %512 = vst.msk [vmem:[#allocation2 + $0x188] sm:$0xff] %vm462_vm0, %v8462_v32  ;;  %v4678_v32 = vunpack.c.l.bf16 %v6836_v36  ;;  %v6902_v36 = vpack.i.bf16 %v4607_v47, %v4606_v46  ;;  %v6953_v46 = vpack.i.bf16 %v4631_v4, %v4630_v1  ;;  %v6959_v47 = vpack.i.bf16 %v4627_v7, %v4626_v5  ;;  %v7042_v4 = vld [vmem:[%s7031_s10] sm:$0xff]  }
  0x2e   : > { %517 = vst.msk [vmem:[#allocation2 + $0x1b0] sm:$0xff] %vm462_vm0, %v8463_v33  ;;  %518 = vst.msk [vmem:[#allocation2 + $0x1b8] sm:$0xff] %vm462_vm0, %v4663_v22  ;;  %v6908_v33 = vpack.i.bf16 %v4603_v50, %v4602_v49  ;;  %v8464_v49 = vunpack.c.h.bf16 %v6729_v2  ;;  %v7016_v61 = vpack.i.bf16 %v4663_v22, %v8469_v60  ;;  %v7026_v1 = vpack.i.bf16 %v4667_v45, %v4666_v42 }
  0x2f   : > { %515 = vst.msk [vmem:[#allocation2 + $0x1a0] sm:$0xff] %vm462_vm0, %v4658_v20  ;;  %516 = vst.msk [vmem:[#allocation2 + $0x1a8] sm:$0xff] %vm462_vm0, %v4659_v37  ;;  %v7037_v2 = vpack.i.bf16 %v4679_v23, %v4678_v32  ;;  %v7039_v3 = vpack.i.bf16 %v4675_v35, %v4674_v29  ;;  %v7049_v5 = vunpack.c.l.bf16 %v7042_v4 }
  0x30   : > { %521 = vst.msk [vmem:[#allocation2 + $0x1d0] sm:$0xff] %vm462_vm0, %v4670_v41  ;;  %522 = vst.msk [vmem:[#allocation2 + $0x1d8] sm:$0xff] %vm462_vm0, %v4671_v30  ;;  %5266 = vrot.lane.b32.xlu1 %v6902_v36, %s6499_s29  ;;  %5261 = vrot.lane.b32.xlu0 %v6908_v33, %s6499_s29  ;;  %v6975_v50 = vpack.i.bf16 %v8464_v49, %v4634_v11 }
  0x31   : > { %519 = vst.msk [vmem:[#allocation2 + $0x1c0] sm:$0xff] %vm462_vm0, %v4666_v42  ;;  %520 = vst.msk [vmem:[#allocation2 + $0x1c8] sm:$0xff] %vm462_vm0, %v4667_v45 }
  0x32   : > { %525 = vst.msk [vmem:[#allocation2 + $0x1f0] sm:$0xff] %vm462_vm0, %v4678_v32  ;;  %526 = vst.msk [vmem:[#allocation2 + $0x1f8] sm:$0xff] %vm462_vm0, %v4679_v23 }
  0x33   : > { %523 = vst.msk [vmem:[#allocation2 + $0x1e0] sm:$0xff] %vm462_vm0, %v4674_v29  ;;  %524 = vst.msk [vmem:[#allocation2 + $0x1e8] sm:$0xff] %vm462_vm0, %v4675_v35  ;;  %vm2913_vm0 = vcmask 1041408  }
  0x34   : > { %5276 = vrot.lane.b32.xlu1 %v6921_v34, %s6499_s29  ;;  %5271 = vrot.lane.b32.xlu0 %v6927_v38, %s6499_s29 }
  0x38   : > { %5286 = vrot.lane.b32.xlu1 %v6937_v39, %s6499_s29  ;;  %5281 = vrot.lane.b32.xlu0 %v6943_v43, %s6499_s29 }
  0x3c   : > { %5296 = vrot.lane.b32.xlu1 %v6953_v46, %s6499_s29  ;;  %5291 = vrot.lane.b32.xlu0 %v6959_v47, %s6499_s29 }
  0x40   : > { %5306 = vrot.lane.b32.xlu1 %v6969_v48, %s6499_s29  ;;  %5301 = vrot.lane.b32.xlu0 %v6975_v50, %s6499_s29 }
  0x44   : > { %5316 = vrot.lane.b32.xlu1 %v6985_v53, %s6499_s29  ;;  %5311 = vrot.lane.b32.xlu0 %v6991_v55, %s6499_s29 }
  0x48   : > { %5326 = vrot.lane.b32.xlu1 %v7002_v56, %s6499_s29  ;;  %5321 = vrot.lane.b32.xlu0 %v7008_v59, %s6499_s29 }
  0x4c   : > { %5336 = vrot.lane.b32.xlu1 %v7016_v61, %s6499_s29  ;;  %5331 = vrot.lane.b32.xlu0 %v7018_v63, %s6499_s29 }
  0x50   : > { %5346 = vrot.lane.b32.xlu1 %v7024_v0, %s6499_s29  ;;  %5341 = vrot.lane.b32.xlu0 %v7026_v1, %s6499_s29 }
  0x54   : > { %5356 = vrot.lane.b32.xlu1 %v7037_v2, %s6499_s29  ;;  %5351 = vrot.lane.b32.xlu0 %v7039_v3, %s6499_s29 }
  0x58   : > { %5361 = vrot.lane.b32.xlu1 %v6578_v17, %s6500_s11  ;;  %850 = vrot.lane.b32.xlu0 %v7049_v5, %s6499_s29 }
  0x5c   : > { %5371 = vrot.lane.b32.xlu1 %v6575_v16, %s6500_s11  ;;  %5366 = vrot.lane.b32.xlu0 %v6602_v26, %s6500_s11 }
  0x60   : > { %5381 = vrot.lane.b32.xlu1 %v6650_v44, %s6500_s11  ;;  %5376 = vrot.lane.b32.xlu0 %v6586_v21, %s6500_s11 }
  0x64   : > { %5391 = vrot.lane.b32.xlu1 %v6717_v62, %s6500_s11  ;;  %5386 = vrot.lane.b32.xlu0 %v6632_v40, %s6500_s11 }
  0x68   : > { %5401 = vrot.lane.b32.xlu1 %v6792_v19, %s6500_s11  ;;  %5396 = vrot.lane.b32.xlu0 %v6696_v57, %s6500_s11 }
  0x6c   : > { %5411 = vrot.lane.b32.xlu1 %v6866_v25, %s6500_s11  ;;  %5406 = vrot.lane.b32.xlu0 %v6786_v18, %s6500_s11 }
  0x70   : > { %5421 = vrot.lane.b32.xlu1 %v6908_v33, %s6500_s11  ;;  %5416 = vrot.lane.b32.xlu0 %v6842_v13, %s6500_s11 }
  0x74   : > { %5431 = vrot.lane.b32.xlu1 %v6927_v38, %s6500_s11  ;;  %5426 = vrot.lane.b32.xlu0 %v6902_v36, %s6500_s11 }
  0x78   : > { %5441 = vrot.lane.b32.xlu1 %v6943_v43, %s6500_s11  ;;  %5436 = vrot.lane.b32.xlu0 %v6921_v34, %s6500_s11 }
  0x7c   : > { %5451 = vrot.lane.b32.xlu1 %v6959_v47, %s6500_s11  ;;  %5446 = vrot.lane.b32.xlu0 %v6937_v39, %s6500_s11 }
  0x80   : > { %5461 = vrot.lane.b32.xlu1 %v6975_v50, %s6500_s11  ;;  %5456 = vrot.lane.b32.xlu0 %v6953_v46, %s6500_s11 }
  0x84   : > { %5471 = vrot.lane.b32.xlu1 %v6991_v55, %s6500_s11  ;;  %5466 = vrot.lane.b32.xlu0 %v6969_v48, %s6500_s11 }
  0x88   : > { %5481 = vrot.lane.b32.xlu1 %v7008_v59, %s6500_s11  ;;  %5476 = vrot.lane.b32.xlu0 %v6985_v53, %s6500_s11  ;;  %v5212_v17 = vpop.permute.xlu1 %5211  ;;  %v5202_v6 = vpop.permute.xlu0 %5201 }
  0x89   : > { %v5214_v7 = vunpack.i.h.bf16 %v5212_v17  ;;  %v5213_v8 = vunpack.i.l.bf16 %v5212_v17  ;;  %v5204_v9 = vunpack.i.h.bf16 %v5202_v6  ;;  %v5203_v10 = vunpack.i.l.bf16 %v5202_v6 }
  0x8b   : > { %789 = vst.msk [vmem:[#allocation2 + $0x1f] sm:$0xff] %vm785_vm1, %v5213_v8  ;;  %790 = vst.msk [vmem:[#allocation2 + $0x27] sm:$0xff] %vm785_vm1, %v5214_v7 }
  0x8c   : > { %5491 = vrot.lane.b32.xlu1 %v7018_v63, %s6500_s11  ;;  %5486 = vrot.lane.b32.xlu0 %v7002_v56, %s6500_s11  ;;  %784 = vst.msk [vmem:[#allocation2 - $0x1] sm:$0xfe] %vm783_vm2, %v5203_v10  ;;  %v5217_v11 = vpop.permute.xlu1 %5216  ;;  %v5207_v12 = vpop.permute.xlu0 %5206  ;;  %vm2091_vm2 = vcmask 228544  }
  0x8d   : > { %786 = vst.msk [vmem:[#allocation2 + $0x7] sm:$0xff] %vm785_vm1, %v5204_v9  ;;  %v5219_v14 = vunpack.i.h.bf16 %v5217_v11  ;;  %v5218_v15 = vunpack.i.l.bf16 %v5217_v11  ;;  %v5209_v20 = vunpack.i.h.bf16 %v5207_v12  ;;  %v5208_v22 = vunpack.i.l.bf16 %v5207_v12 }
  0x8f   : > { %792 = vst.msk [vmem:[#allocation2 + $0x37] sm:$0xff] %vm785_vm1, %v5219_v14  ;;  %791 = vst.msk [vmem:[#allocation2 + $0x2f] sm:$0xff] %vm785_vm1, %v5218_v15 }
  0x90   : > { %5501 = vrot.lane.b32.xlu1 %v7026_v1, %s6500_s11  ;;  %5496 = vrot.lane.b32.xlu0 %v7016_v61, %s6500_s11  ;;  %788 = vst.msk [vmem:[#allocation2 + $0x17] sm:$0xff] %vm785_vm1, %v5209_v20  ;;  %787 = vst.msk [vmem:[#allocation2 + $0xf] sm:$0xff] %vm785_vm1, %v5208_v22  ;;  %v5227_v24 = vpop.permute.xlu1 %5226  ;;  %v5222_v27 = vpop.permute.xlu0 %5221 }
  0x91   : > { %v5229_v28 = vunpack.i.h.bf16 %v5227_v24  ;;  %v5228_v31 = vunpack.i.l.bf16 %v5227_v24  ;;  %v5224_v32 = vunpack.i.h.bf16 %v5222_v27  ;;  %v5223_v37 = vunpack.i.l.bf16 %v5222_v27 }
  0x93   : > { %796 = vst.msk [vmem:[#allocation2 + $0x57] sm:$0xff] %vm785_vm1, %v5229_v28  ;;  %795 = vst.msk [vmem:[#allocation2 + $0x4f] sm:$0xff] %vm785_vm1, %v5228_v31 }
  0x94   : > { %5511 = vrot.lane.b32.xlu1 %v7039_v3, %s6500_s11  ;;  %5506 = vrot.lane.b32.xlu0 %v7024_v0, %s6500_s11  ;;  %794 = vst.msk [vmem:[#allocation2 + $0x47] sm:$0xff] %vm785_vm1, %v5224_v32  ;;  %793 = vst.msk [vmem:[#allocation2 + $0x3f] sm:$0xff] %vm785_vm1, %v5223_v37  ;;  %v5237_v41 = vpop.permute.xlu1 %5236  ;;  %v5232_v30 = vpop.permute.xlu0 %5231 }
  0x95   : > { %v5239_v42 = vunpack.i.h.bf16 %v5237_v41  ;;  %v5238_v45 = vunpack.i.l.bf16 %v5237_v41  ;;  %v5234_v23 = vunpack.i.h.bf16 %v5232_v30  ;;  %v5233_v29 = vunpack.i.l.bf16 %v5232_v30 }
  0x97   : > { %800 = vst.msk [vmem:[#allocation2 + $0x77] sm:$0xff] %vm785_vm1, %v5239_v42  ;;  %799 = vst.msk [vmem:[#allocation2 + $0x6f] sm:$0xff] %vm785_vm1, %v5238_v45 }
  0x98   : > { %1113 = vrot.lane.b32.xlu1 %v7049_v5, %s6500_s11  ;;  %5516 = vrot.lane.b32.xlu0 %v7037_v2, %s6500_s11  ;;  %798 = vst.msk [vmem:[#allocation2 + $0x67] sm:$0xff] %vm785_vm1, %v5234_v23  ;;  %797 = vst.msk [vmem:[#allocation2 + $0x5f] sm:$0xff] %vm785_vm1, %v5233_v29  ;;  %v5247_v35 = vpop.permute.xlu1 %5246  ;;  %v5242_v49 = vpop.permute.xlu0 %5241  ;;  %s319_s11 = scalar_lea.vmem %s8456_s5, %s8475_s22 }
  0x99   : > { %v5249_v51 = vunpack.i.h.bf16 %v5247_v35  ;;  %v5248_v52 = vunpack.i.l.bf16 %v5247_v35  ;;  %v5244_v54 = vunpack.i.h.bf16 %v5242_v49  ;;  %v5243_v58 = vunpack.i.l.bf16 %v5242_v49 }
  0x9b   : > { %804 = vst.msk [vmem:[#allocation2 + $0x97] sm:$0xff] %vm785_vm1, %v5249_v51  ;;  %803 = vst.msk [vmem:[#allocation2 + $0x8f] sm:$0xff] %vm785_vm1, %v5248_v52 }
  0x9c   : > { %5526 = vrot.lane.b32.xlu1 %v6575_v16, %s6501_s12  ;;  %5521 = vrot.lane.b32.xlu0 %v6602_v26, %s6501_s12  ;;  %802 = vst.msk [vmem:[#allocation2 + $0x87] sm:$0xff] %vm785_vm1, %v5244_v54  ;;  %801 = vst.msk [vmem:[#allocation2 + $0x7f] sm:$0xff] %vm785_vm1, %v5243_v58  ;;  %v5252_v17 = vpop.permute.xlu0 %5251 }
  0x9d   : > { %v5254_v8 = vunpack.i.h.bf16 %v5252_v17  ;;  %v5253_v9 = vunpack.i.l.bf16 %v5252_v17 }
  0x9e   : > { %v5257_v60 = vpop.permute.xlu1 %5256 }
  0x9f   : > { %v5259_v6 = vunpack.i.h.bf16 %v5257_v60  ;;  %v5258_v7 = vunpack.i.l.bf16 %v5257_v60  ;;  %806 = vst.msk [vmem:[#allocation2 + $0xa7] sm:$0xff] %vm785_vm1, %v5254_v8  ;;  %805 = vst.msk [vmem:[#allocation2 + $0x9f] sm:$0xff] %vm785_vm1, %v5253_v9 }
  0xa0   : > { %5536 = vrot.lane.b32.xlu1 %v6650_v44, %s6501_s12  ;;  %5531 = vrot.lane.b32.xlu0 %v6586_v21, %s6501_s12 }
  0xa1   : > { %808 = vst.msk [vmem:[#allocation2 + $0xb7] sm:$0xff] %vm785_vm1, %v5259_v6  ;;  %807 = vst.msk [vmem:[#allocation2 + $0xaf] sm:$0xff] %vm785_vm1, %v5258_v7 }
  0xa2   : > { %v5267_v10 = vpop.permute.xlu1 %5266  ;;  %v5262_v11 = vpop.permute.xlu0 %5261 }
  0xa3   : > { %v5269_v12 = vunpack.i.h.bf16 %v5267_v10  ;;  %v5268_v14 = vunpack.i.l.bf16 %v5267_v10  ;;  %v5264_v15 = vunpack.i.h.bf16 %v5262_v11  ;;  %v5263_v20 = vunpack.i.l.bf16 %v5262_v11 }
  0xa4   : > { %5546 = vrot.lane.b32.xlu1 %v6717_v62, %s6501_s12  ;;  %5541 = vrot.lane.b32.xlu0 %v6632_v40, %s6501_s12 }
  0xa5   : > { %812 = vst.msk [vmem:[#allocation2 + $0xd7] sm:$0xff] %vm785_vm1, %v5269_v12  ;;  %811 = vst.msk [vmem:[#allocation2 + $0xcf] sm:$0xff] %vm785_vm1, %v5268_v14 }
  0xa6   : > { %810 = vst.msk [vmem:[#allocation2 + $0xc7] sm:$0xff] %vm785_vm1, %v5264_v15  ;;  %809 = vst.msk [vmem:[#allocation2 + $0xbf] sm:$0xff] %vm785_vm1, %v5263_v20  ;;  %v5277_v22 = vpop.permute.xlu1 %5276  ;;  %v5272_v24 = vpop.permute.xlu0 %5271 }
  0xa7   : > { %v5279_v27 = vunpack.i.h.bf16 %v5277_v22  ;;  %v5278_v28 = vunpack.i.l.bf16 %v5277_v22  ;;  %v5274_v31 = vunpack.i.h.bf16 %v5272_v24  ;;  %v5273_v32 = vunpack.i.l.bf16 %v5272_v24 }
  0xa8   : > { %5556 = vrot.lane.b32.xlu1 %v6792_v19, %s6501_s12  ;;  %5551 = vrot.lane.b32.xlu0 %v6696_v57, %s6501_s12 }
  0xa9   : > { %816 = vst.msk [vmem:[#allocation2 + $0xf7] sm:$0xff] %vm785_vm1, %v5279_v27  ;;  %815 = vst.msk [vmem:[#allocation2 + $0xef] sm:$0xff] %vm785_vm1, %v5278_v28 }
  0xaa   : > { %814 = vst.msk [vmem:[#allocation2 + $0xe7] sm:$0xff] %vm785_vm1, %v5274_v31  ;;  %813 = vst.msk [vmem:[#allocation2 + $0xdf] sm:$0xff] %vm785_vm1, %v5273_v32  ;;  %v5287_v37 = vpop.permute.xlu1 %5286  ;;  %v5282_v41 = vpop.permute.xlu0 %5281 }
  0xab   : > { %v5289_v30 = vunpack.i.h.bf16 %v5287_v37  ;;  %v5288_v42 = vunpack.i.l.bf16 %v5287_v37  ;;  %v5284_v45 = vunpack.i.h.bf16 %v5282_v41  ;;  %v5283_v23 = vunpack.i.l.bf16 %v5282_v41 }
  0xac   : > { %5566 = vrot.lane.b32.xlu1 %v6866_v25, %s6501_s12  ;;  %5561 = vrot.lane.b32.xlu0 %v6786_v18, %s6501_s12 }
  0xad   : > { %820 = vst.msk [vmem:[#allocation2 + $0x117] sm:$0xff] %vm785_vm1, %v5289_v30  ;;  %819 = vst.msk [vmem:[#allocation2 + $0x10f] sm:$0xff] %vm785_vm1, %v5288_v42 }
  0xae   : > { %818 = vst.msk [vmem:[#allocation2 + $0x107] sm:$0xff] %vm785_vm1, %v5284_v45  ;;  %817 = vst.msk [vmem:[#allocation2 + $0xff] sm:$0xff] %vm785_vm1, %v5283_v23  ;;  %v5297_v29 = vpop.permute.xlu1 %5296  ;;  %v5292_v35 = vpop.permute.xlu0 %5291 }
  0xaf   : > { %v5299_v49 = vunpack.i.h.bf16 %v5297_v29  ;;  %v5298_v51 = vunpack.i.l.bf16 %v5297_v29  ;;  %v5294_v52 = vunpack.i.h.bf16 %v5292_v35  ;;  %v5293_v54 = vunpack.i.l.bf16 %v5292_v35 }
  0xb0   : > { %5576 = vrot.lane.b32.xlu1 %v6908_v33, %s6501_s12  ;;  %5571 = vrot.lane.b32.xlu0 %v6842_v13, %s6501_s12 }
  0xb1   : > { %824 = vst.msk [vmem:[#allocation2 + $0x137] sm:$0xff] %vm785_vm1, %v5299_v49  ;;  %823 = vst.msk [vmem:[#allocation2 + $0x12f] sm:$0xff] %vm785_vm1, %v5298_v51 }
  0xb2   : > { %822 = vst.msk [vmem:[#allocation2 + $0x127] sm:$0xff] %vm785_vm1, %v5294_v52  ;;  %821 = vst.msk [vmem:[#allocation2 + $0x11f] sm:$0xff] %vm785_vm1, %v5293_v54  ;;  %v5307_v58 = vpop.permute.xlu1 %5306  ;;  %v5302_v60 = vpop.permute.xlu0 %5301 }
  0xb3   : > { %v5309_v17 = vunpack.i.h.bf16 %v5307_v58  ;;  %v5308_v6 = vunpack.i.l.bf16 %v5307_v58  ;;  %v5304_v7 = vunpack.i.h.bf16 %v5302_v60  ;;  %v5303_v8 = vunpack.i.l.bf16 %v5302_v60 }
  0xb4   : > { %5586 = vrot.lane.b32.xlu1 %v6927_v38, %s6501_s12  ;;  %5581 = vrot.lane.b32.xlu0 %v6902_v36, %s6501_s12 }
  0xb5   : > { %828 = vst.msk [vmem:[#allocation2 + $0x157] sm:$0xff] %vm785_vm1, %v5309_v17  ;;  %827 = vst.msk [vmem:[#allocation2 + $0x14f] sm:$0xff] %vm785_vm1, %v5308_v6 }
  0xb6   : > { %826 = vst.msk [vmem:[#allocation2 + $0x147] sm:$0xff] %vm785_vm1, %v5304_v7  ;;  %825 = vst.msk [vmem:[#allocation2 + $0x13f] sm:$0xff] %vm785_vm1, %v5303_v8  ;;  %v5317_v9 = vpop.permute.xlu1 %5316  ;;  %v5312_v10 = vpop.permute.xlu0 %5311 }
  0xb7   : > { %v5319_v11 = vunpack.i.h.bf16 %v5317_v9  ;;  %v5318_v12 = vunpack.i.l.bf16 %v5317_v9  ;;  %v5314_v14 = vunpack.i.h.bf16 %v5312_v10  ;;  %v5313_v15 = vunpack.i.l.bf16 %v5312_v10 }
  0xb8   : > { %5596 = vrot.lane.b32.xlu1 %v6943_v43, %s6501_s12  ;;  %5591 = vrot.lane.b32.xlu0 %v6921_v34, %s6501_s12 }
  0xb9   : > { %832 = vst.msk [vmem:[#allocation2 + $0x177] sm:$0xff] %vm785_vm1, %v5319_v11  ;;  %831 = vst.msk [vmem:[#allocation2 + $0x16f] sm:$0xff] %vm785_vm1, %v5318_v12 }
  0xba   : > { %830 = vst.msk [vmem:[#allocation2 + $0x167] sm:$0xff] %vm785_vm1, %v5314_v14  ;;  %829 = vst.msk [vmem:[#allocation2 + $0x15f] sm:$0xff] %vm785_vm1, %v5313_v15  ;;  %v5327_v20 = vpop.permute.xlu1 %5326  ;;  %v5322_v22 = vpop.permute.xlu0 %5321 }
  0xbb   : > { %v5329_v24 = vunpack.i.h.bf16 %v5327_v20  ;;  %v5328_v27 = vunpack.i.l.bf16 %v5327_v20  ;;  %v5324_v28 = vunpack.i.h.bf16 %v5322_v22  ;;  %v5323_v31 = vunpack.i.l.bf16 %v5322_v22 }
  0xbc   : > { %5606 = vrot.lane.b32.xlu1 %v6959_v47, %s6501_s12  ;;  %5601 = vrot.lane.b32.xlu0 %v6937_v39, %s6501_s12 }
  0xbd   : > { %836 = vst.msk [vmem:[#allocation2 + $0x197] sm:$0xff] %vm785_vm1, %v5329_v24  ;;  %835 = vst.msk [vmem:[#allocation2 + $0x18f] sm:$0xff] %vm785_vm1, %v5328_v27  ;;  %v4683_v27 = vunpack.c.h.bf16 %v7042_v4 }
  0xbe   : > { %834 = vst.msk [vmem:[#allocation2 + $0x187] sm:$0xff] %vm785_vm1, %v5324_v28  ;;  %833 = vst.msk [vmem:[#allocation2 + $0x17f] sm:$0xff] %vm785_vm1, %v5323_v31  ;;  %v5337_v32 = vpop.permute.xlu1 %5336  ;;  %v5332_v37 = vpop.permute.xlu0 %5331 }
  0xbf   : > { %v5339_v41 = vunpack.i.h.bf16 %v5337_v32  ;;  %v5338_v30 = vunpack.i.l.bf16 %v5337_v32  ;;  %v5334_v42 = vunpack.i.h.bf16 %v5332_v37  ;;  %v5333_v45 = vunpack.i.l.bf16 %v5332_v37 }
  0xc0   : > { %5616 = vrot.lane.b32.xlu1 %v6975_v50, %s6501_s12  ;;  %5611 = vrot.lane.b32.xlu0 %v6953_v46, %s6501_s12 }
  0xc1   : > { %840 = vst.msk [vmem:[#allocation2 + $0x1b7] sm:$0xff] %vm785_vm1, %v5339_v41  ;;  %839 = vst.msk [vmem:[#allocation2 + $0x1af] sm:$0xff] %vm785_vm1, %v5338_v30 }
  0xc2   : > { %838 = vst.msk [vmem:[#allocation2 + $0x1a7] sm:$0xff] %vm785_vm1, %v5334_v42  ;;  %837 = vst.msk [vmem:[#allocation2 + $0x19f] sm:$0xff] %vm785_vm1, %v5333_v45  ;;  %v5347_v23 = vpop.permute.xlu1 %5346  ;;  %v5342_v29 = vpop.permute.xlu0 %5341  ;;  %v7251_v42 = vpack.i.bf16 %v4683_v27, %v7049_v5  ;;  %v5007_v45 = vld [vmem:[%s7031_s10 + $0x8] sm:$0xff]  }
  0xc3   : > { %v5349_v35 = vunpack.i.h.bf16 %v5347_v23  ;;  %v5348_v49 = vunpack.i.l.bf16 %v5347_v23  ;;  %v5344_v51 = vunpack.i.h.bf16 %v5342_v29  ;;  %v5343_v52 = vunpack.i.l.bf16 %v5342_v29 }
  0xc4   : > { %5626 = vrot.lane.b32.xlu1 %v6991_v55, %s6501_s12  ;;  %5621 = vrot.lane.b32.xlu0 %v6969_v48, %s6501_s12 }
  0xc5   : > { %844 = vst.msk [vmem:[#allocation2 + $0x1d7] sm:$0xff] %vm785_vm1, %v5349_v35  ;;  %843 = vst.msk [vmem:[#allocation2 + $0x1cf] sm:$0xff] %vm785_vm1, %v5348_v49 }
  0xc6   : > { %842 = vst.msk [vmem:[#allocation2 + $0x1c7] sm:$0xff] %vm785_vm1, %v5344_v51  ;;  %841 = vst.msk [vmem:[#allocation2 + $0x1bf] sm:$0xff] %vm785_vm1, %v5343_v52  ;;  %v5357_v54 = vpop.permute.xlu1 %5356  ;;  %v5352_v58 = vpop.permute.xlu0 %5351 }
  0xc7   : > { %v5359_v60 = vunpack.i.h.bf16 %v5357_v54  ;;  %v5358_v17 = vunpack.i.l.bf16 %v5357_v54  ;;  %v5354_v6 = vunpack.i.h.bf16 %v5352_v58  ;;  %v5353_v7 = vunpack.i.l.bf16 %v5352_v58 }
  0xc8   : > { %5636 = vrot.lane.b32.xlu1 %v7008_v59, %s6501_s12  ;;  %5631 = vrot.lane.b32.xlu0 %v6985_v53, %s6501_s12  ;;  %v7262_v54 = vunpack.c.l.bf16 %v5007_v45 }
  0xc9   : > { %847 = vst.msk [vmem:[#allocation2 + $0x1ef] sm:$0xff] %vm785_vm1, %v5358_v17  ;;  %848 = vst.msk [vmem:[#allocation2 + $0x1f7] sm:$0xff] %vm785_vm1, %v5359_v60 }
  0xca   : > { %846 = vst.msk [vmem:[#allocation2 + $0x1e7] sm:$0xff] %vm785_vm1, %v5354_v6  ;;  %845 = vst.msk [vmem:[#allocation2 + $0x1df] sm:$0xff] %vm785_vm1, %v5353_v7  ;;  %v5362_v8 = vpop.permute.xlu1 %5361  ;;  %v851_v9 = vpop.permute.xlu0 %850  ;;  %vm2089_vm1 = vcmask 228548  }
  0xcb   : > { %v5364_v10 = vunpack.i.h.bf16 %v5362_v8  ;;  %v5363_v11 = vunpack.i.l.bf16 %v5362_v8  ;;  %854 = vst.msk [vmem:[#allocation2 + $0x1ff] sm:$0x1] %vm853_vm3, %v851_v9  ;;  %vm2172_vm3 = vcmask 224448  }
  0xcc   : > { %5646 = vrot.lane.b32.xlu1 %v7018_v63, %s6501_s12  ;;  %5641 = vrot.lane.b32.xlu0 %v7002_v56, %s6501_s12 }
  0xcd   : > { %1048 = vst.msk [vmem:[#allocation2 - $0x2] sm:$0xfc] %vm1047_vm4, %v5363_v11  ;;  %vm2356_vm4 = vcmask 261344  }
  0xce   : > { %1050 = vst.msk [vmem:[#allocation2 + $0x6] sm:$0xff] %vm1049_vm5, %v5364_v10  ;;  %v5372_v12 = vpop.permute.xlu1 %5371  ;;  %v5367_v14 = vpop.permute.xlu0 %5366 }
  0xcf   : > { %v5374_v15 = vunpack.i.h.bf16 %v5372_v12  ;;  %v5373_v20 = vunpack.i.l.bf16 %v5372_v12  ;;  %v5369_v22 = vunpack.i.h.bf16 %v5367_v14  ;;  %v5368_v24 = vunpack.i.l.bf16 %v5367_v14 }
  0xd0   : > { %5656 = vrot.lane.b32.xlu1 %v7026_v1, %s6501_s12  ;;  %5651 = vrot.lane.b32.xlu0 %v7016_v61, %s6501_s12 }
  0xd1   : > { %1051 = vst.msk [vmem:[#allocation2 + $0xe] sm:$0xff] %vm1049_vm5, %v5368_v24  ;;  %1052 = vst.msk [vmem:[#allocation2 + $0x16] sm:$0xff] %vm1049_vm5, %v5369_v22 }
  0xd2   : > { %1053 = vst.msk [vmem:[#allocation2 + $0x1e] sm:$0xff] %vm1049_vm5, %v5373_v20  ;;  %1054 = vst.msk [vmem:[#allocation2 + $0x26] sm:$0xff] %vm1049_vm5, %v5374_v15  ;;  %v5382_v28 = vpop.permute.xlu1 %5381  ;;  %v5377_v31 = vpop.permute.xlu0 %5376 }
  0xd3   : > { %v5384_v32 = vunpack.i.h.bf16 %v5382_v28  ;;  %v5383_v37 = vunpack.i.l.bf16 %v5382_v28  ;;  %v5379_v41 = vunpack.i.h.bf16 %v5377_v31  ;;  %v5378_v30 = vunpack.i.l.bf16 %v5377_v31 }
  0xd4   : > { %5666 = vrot.lane.b32.xlu1 %v7039_v3, %s6501_s12  ;;  %5661 = vrot.lane.b32.xlu0 %v7024_v0, %s6501_s12 }
  0xd5   : > { %1055 = vst.msk [vmem:[#allocation2 + $0x2e] sm:$0xff] %vm1049_vm5, %v5378_v30  ;;  %1056 = vst.msk [vmem:[#allocation2 + $0x36] sm:$0xff] %vm1049_vm5, %v5379_v41 }
  0xd6   : > { %1057 = vst.msk [vmem:[#allocation2 + $0x3e] sm:$0xff] %vm1049_vm5, %v5383_v37  ;;  %1058 = vst.msk [vmem:[#allocation2 + $0x46] sm:$0xff] %vm1049_vm5, %v5384_v32  ;;  %v5392_v23 = vpop.permute.xlu1 %5391  ;;  %v5387_v29 = vpop.permute.xlu0 %5386 }
  0xd7   : > { %v5394_v35 = vunpack.i.h.bf16 %v5392_v23  ;;  %v5393_v49 = vunpack.i.l.bf16 %v5392_v23  ;;  %v5389_v51 = vunpack.i.h.bf16 %v5387_v29  ;;  %v5388_v52 = vunpack.i.l.bf16 %v5387_v29 }
  0xd8   : > { %5676 = vrot.lane.b32.xlu1 %v7251_v42, %s6501_s12  ;;  %5671 = vrot.lane.b32.xlu0 %v7037_v2, %s6501_s12 }
  0xd9   : > { %1059 = vst.msk [vmem:[#allocation2 + $0x4e] sm:$0xff] %vm1049_vm5, %v5388_v52  ;;  %1060 = vst.msk [vmem:[#allocation2 + $0x56] sm:$0xff] %vm1049_vm5, %v5389_v51 }
  0xda   : > { %1061 = vst.msk [vmem:[#allocation2 + $0x5e] sm:$0xff] %vm1049_vm5, %v5393_v49  ;;  %1062 = vst.msk [vmem:[#allocation2 + $0x66] sm:$0xff] %vm1049_vm5, %v5394_v35  ;;  %v5402_v58 = vpop.permute.xlu1 %5401  ;;  %v5397_v60 = vpop.permute.xlu0 %5396 }
  0xdb   : > { %v5404_v17 = vunpack.i.h.bf16 %v5402_v58  ;;  %v5403_v6 = vunpack.i.l.bf16 %v5402_v58  ;;  %v5399_v7 = vunpack.i.h.bf16 %v5397_v60  ;;  %v5398_v8 = vunpack.i.l.bf16 %v5397_v60 }
  0xdc   : > { %5681 = vrot.lane.b32.xlu1 %v6602_v26, %s6502_s13  ;;  %1374 = vrot.lane.b32.xlu0 %v7262_v54, %s6501_s12 }
  0xdd   : > { %1063 = vst.msk [vmem:[#allocation2 + $0x6e] sm:$0xff] %vm1049_vm5, %v5398_v8  ;;  %1064 = vst.msk [vmem:[#allocation2 + $0x76] sm:$0xff] %vm1049_vm5, %v5399_v7 }
  0xde   : > { %1065 = vst.msk [vmem:[#allocation2 + $0x7e] sm:$0xff] %vm1049_vm5, %v5403_v6  ;;  %1066 = vst.msk [vmem:[#allocation2 + $0x86] sm:$0xff] %vm1049_vm5, %v5404_v17  ;;  %v5412_v9 = vpop.permute.xlu1 %5411  ;;  %v5407_v10 = vpop.permute.xlu0 %5406 }
  0xdf   : > { %v5414_v11 = vunpack.i.h.bf16 %v5412_v9  ;;  %v5413_v12 = vunpack.i.l.bf16 %v5412_v9  ;;  %v5409_v14 = vunpack.i.h.bf16 %v5407_v10  ;;  %v5408_v15 = vunpack.i.l.bf16 %v5407_v10 }
  0xe0   : > { %5691 = vrot.lane.b32.xlu1 %v6586_v21, %s6502_s13  ;;  %5686 = vrot.lane.b32.xlu0 %v6575_v16, %s6502_s13 }
  0xe1   : > { %1067 = vst.msk [vmem:[#allocation2 + $0x8e] sm:$0xff] %vm1049_vm5, %v5408_v15  ;;  %1068 = vst.msk [vmem:[#allocation2 + $0x96] sm:$0xff] %vm1049_vm5, %v5409_v14 }
  0xe2   : > { %1069 = vst.msk [vmem:[#allocation2 + $0x9e] sm:$0xff] %vm1049_vm5, %v5413_v12  ;;  %1070 = vst.msk [vmem:[#allocation2 + $0xa6] sm:$0xff] %vm1049_vm5, %v5414_v11  ;;  %v5422_v20 = vpop.permute.xlu1 %5421  ;;  %v5417_v22 = vpop.permute.xlu0 %5416 }
  0xe3   : > { %v5424_v24 = vunpack.i.h.bf16 %v5422_v20  ;;  %v5423_v28 = vunpack.i.l.bf16 %v5422_v20  ;;  %v5419_v31 = vunpack.i.h.bf16 %v5417_v22  ;;  %v5418_v32 = vunpack.i.l.bf16 %v5417_v22 }
  0xe4   : > { %5701 = vrot.lane.b32.xlu1 %v6632_v40, %s6502_s13  ;;  %5696 = vrot.lane.b32.xlu0 %v6650_v44, %s6502_s13 }
  0xe5   : > { %1071 = vst.msk [vmem:[#allocation2 + $0xae] sm:$0xff] %vm1049_vm5, %v5418_v32  ;;  %1072 = vst.msk [vmem:[#allocation2 + $0xb6] sm:$0xff] %vm1049_vm5, %v5419_v31 }
  0xe6   : > { %1073 = vst.msk [vmem:[#allocation2 + $0xbe] sm:$0xff] %vm1049_vm5, %v5423_v28  ;;  %1074 = vst.msk [vmem:[#allocation2 + $0xc6] sm:$0xff] %vm1049_vm5, %v5424_v24  ;;  %v5432_v37 = vpop.permute.xlu1 %5431  ;;  %v5427_v41 = vpop.permute.xlu0 %5426 }
  0xe7   : > { %v5434_v30 = vunpack.i.h.bf16 %v5432_v37  ;;  %v5433_v45 = vunpack.i.l.bf16 %v5432_v37  ;;  %v5429_v23 = vunpack.i.h.bf16 %v5427_v41  ;;  %v5428_v29 = vunpack.i.l.bf16 %v5427_v41 }
  0xe8   : > { %5711 = vrot.lane.b32.xlu1 %v6696_v57, %s6502_s13  ;;  %5706 = vrot.lane.b32.xlu0 %v6717_v62, %s6502_s13 }
  0xe9   : > { %1075 = vst.msk [vmem:[#allocation2 + $0xce] sm:$0xff] %vm1049_vm5, %v5428_v29  ;;  %1076 = vst.msk [vmem:[#allocation2 + $0xd6] sm:$0xff] %vm1049_vm5, %v5429_v23 }
  0xea   : > { %1077 = vst.msk [vmem:[#allocation2 + $0xde] sm:$0xff] %vm1049_vm5, %v5433_v45  ;;  %1078 = vst.msk [vmem:[#allocation2 + $0xe6] sm:$0xff] %vm1049_vm5, %v5434_v30  ;;  %v5442_v35 = vpop.permute.xlu1 %5441  ;;  %v5437_v49 = vpop.permute.xlu0 %5436 }
  0xeb   : > { %v5444_v51 = vunpack.i.h.bf16 %v5442_v35  ;;  %v5443_v52 = vunpack.i.l.bf16 %v5442_v35  ;;  %v5439_v58 = vunpack.i.h.bf16 %v5437_v49  ;;  %v5438_v60 = vunpack.i.l.bf16 %v5437_v49 }
  0xec   : > { %5721 = vrot.lane.b32.xlu1 %v6786_v18, %s6502_s13  ;;  %5716 = vrot.lane.b32.xlu0 %v6792_v19, %s6502_s13 }
  0xed   : > { %1079 = vst.msk [vmem:[#allocation2 + $0xee] sm:$0xff] %vm1049_vm5, %v5438_v60  ;;  %1080 = vst.msk [vmem:[#allocation2 + $0xf6] sm:$0xff] %vm1049_vm5, %v5439_v58 }
  0xee   : > { %1081 = vst.msk [vmem:[#allocation2 + $0xfe] sm:$0xff] %vm1049_vm5, %v5443_v52  ;;  %1082 = vst.msk [vmem:[#allocation2 + $0x106] sm:$0xff] %vm1049_vm5, %v5444_v51  ;;  %v5452_v17 = vpop.permute.xlu1 %5451  ;;  %v5447_v6 = vpop.permute.xlu0 %5446 }
  0xef   : > { %v5454_v7 = vunpack.i.h.bf16 %v5452_v17  ;;  %v5453_v8 = vunpack.i.l.bf16 %v5452_v17  ;;  %v5449_v9 = vunpack.i.h.bf16 %v5447_v6  ;;  %v5448_v10 = vunpack.i.l.bf16 %v5447_v6 }
  0xf0   : > { %5731 = vrot.lane.b32.xlu1 %v6842_v13, %s6502_s13  ;;  %5726 = vrot.lane.b32.xlu0 %v6866_v25, %s6502_s13 }
  0xf1   : > { %1083 = vst.msk [vmem:[#allocation2 + $0x10e] sm:$0xff] %vm1049_vm5, %v5448_v10  ;;  %1084 = vst.msk [vmem:[#allocation2 + $0x116] sm:$0xff] %vm1049_vm5, %v5449_v9 }
  0xf2   : > { %1085 = vst.msk [vmem:[#allocation2 + $0x11e] sm:$0xff] %vm1049_vm5, %v5453_v8  ;;  %1086 = vst.msk [vmem:[#allocation2 + $0x126] sm:$0xff] %vm1049_vm5, %v5454_v7  ;;  %v5462_v11 = vpop.permute.xlu1 %5461  ;;  %v5457_v12 = vpop.permute.xlu0 %5456 }
  0xf3   : > { %v5464_v14 = vunpack.i.h.bf16 %v5462_v11  ;;  %v5463_v15 = vunpack.i.l.bf16 %v5462_v11  ;;  %v5459_v20 = vunpack.i.h.bf16 %v5457_v12  ;;  %v5458_v22 = vunpack.i.l.bf16 %v5457_v12 }
  0xf4   : > { %5741 = vrot.lane.b32.xlu1 %v6902_v36, %s6502_s13  ;;  %5736 = vrot.lane.b32.xlu0 %v6908_v33, %s6502_s13 }
  0xf5   : > { %1087 = vst.msk [vmem:[#allocation2 + $0x12e] sm:$0xff] %vm1049_vm5, %v5458_v22  ;;  %1088 = vst.msk [vmem:[#allocation2 + $0x136] sm:$0xff] %vm1049_vm5, %v5459_v20 }
  0xf6   : > { %1089 = vst.msk [vmem:[#allocation2 + $0x13e] sm:$0xff] %vm1049_vm5, %v5463_v15  ;;  %1090 = vst.msk [vmem:[#allocation2 + $0x146] sm:$0xff] %vm1049_vm5, %v5464_v14  ;;  %v5472_v24 = vpop.permute.xlu1 %5471  ;;  %v5467_v28 = vpop.permute.xlu0 %5466 }
  0xf7   : > { %v5474_v31 = vunpack.i.h.bf16 %v5472_v24  ;;  %v5473_v32 = vunpack.i.l.bf16 %v5472_v24  ;;  %v5469_v37 = vunpack.i.h.bf16 %v5467_v28  ;;  %v5468_v41 = vunpack.i.l.bf16 %v5467_v28 }
  0xf8   : > { %5751 = vrot.lane.b32.xlu1 %v6921_v34, %s6502_s13  ;;  %5746 = vrot.lane.b32.xlu0 %v6927_v38, %s6502_s13 }
  0xf9   : > { %1091 = vst.msk [vmem:[#allocation2 + $0x14e] sm:$0xff] %vm1049_vm5, %v5468_v41  ;;  %1092 = vst.msk [vmem:[#allocation2 + $0x156] sm:$0xff] %vm1049_vm5, %v5469_v37 }
  0xfa   : > { %1093 = vst.msk [vmem:[#allocation2 + $0x15e] sm:$0xff] %vm1049_vm5, %v5473_v32  ;;  %1094 = vst.msk [vmem:[#allocation2 + $0x166] sm:$0xff] %vm1049_vm5, %v5474_v31  ;;  %v5482_v30 = vpop.permute.xlu1 %5481  ;;  %v5477_v45 = vpop.permute.xlu0 %5476 }
  0xfb   : > { %v5484_v23 = vunpack.i.h.bf16 %v5482_v30  ;;  %v5483_v29 = vunpack.i.l.bf16 %v5482_v30  ;;  %v5479_v35 = vunpack.i.h.bf16 %v5477_v45  ;;  %v5478_v49 = vunpack.i.l.bf16 %v5477_v45 }
  0xfc   : > { %5761 = vrot.lane.b32.xlu1 %v6937_v39, %s6502_s13  ;;  %5756 = vrot.lane.b32.xlu0 %v6943_v43, %s6502_s13 }
  0xfd   : > { %1095 = vst.msk [vmem:[#allocation2 + $0x16e] sm:$0xff] %vm1049_vm5, %v5478_v49  ;;  %1096 = vst.msk [vmem:[#allocation2 + $0x176] sm:$0xff] %vm1049_vm5, %v5479_v35 }
  0xfe   : > { %1097 = vst.msk [vmem:[#allocation2 + $0x17e] sm:$0xff] %vm1049_vm5, %v5483_v29  ;;  %1098 = vst.msk [vmem:[#allocation2 + $0x186] sm:$0xff] %vm1049_vm5, %v5484_v23  ;;  %v5492_v51 = vpop.permute.xlu1 %5491  ;;  %v5487_v52 = vpop.permute.xlu0 %5486 }
  0xff   : > { %v5494_v58 = vunpack.i.h.bf16 %v5492_v51  ;;  %v5493_v60 = vunpack.i.l.bf16 %v5492_v51  ;;  %v5489_v17 = vunpack.i.h.bf16 %v5487_v52  ;;  %v5488_v6 = vunpack.i.l.bf16 %v5487_v52 }
 0x100   : > { %5771 = vrot.lane.b32.xlu1 %v6953_v46, %s6502_s13  ;;  %5766 = vrot.lane.b32.xlu0 %v6959_v47, %s6502_s13 }
 0x101   : > { %1099 = vst.msk [vmem:[#allocation2 + $0x18e] sm:$0xff] %vm1049_vm5, %v5488_v6  ;;  %1100 = vst.msk [vmem:[#allocation2 + $0x196] sm:$0xff] %vm1049_vm5, %v5489_v17 }
 0x102   : > { %1101 = vst.msk [vmem:[#allocation2 + $0x19e] sm:$0xff] %vm1049_vm5, %v5493_v60  ;;  %1102 = vst.msk [vmem:[#allocation2 + $0x1a6] sm:$0xff] %vm1049_vm5, %v5494_v58  ;;  %v5502_v7 = vpop.permute.xlu1 %5501  ;;  %v5497_v8 = vpop.permute.xlu0 %5496 }
 0x103   : > { %v5504_v9 = vunpack.i.h.bf16 %v5502_v7  ;;  %v5503_v10 = vunpack.i.l.bf16 %v5502_v7  ;;  %v5499_v11 = vunpack.i.h.bf16 %v5497_v8  ;;  %v5498_v12 = vunpack.i.l.bf16 %v5497_v8 }
 0x104   : > { %5781 = vrot.lane.b32.xlu1 %v6969_v48, %s6502_s13  ;;  %5776 = vrot.lane.b32.xlu0 %v6975_v50, %s6502_s13 }
 0x105   : > { %1103 = vst.msk [vmem:[#allocation2 + $0x1ae] sm:$0xff] %vm1049_vm5, %v5498_v12  ;;  %1104 = vst.msk [vmem:[#allocation2 + $0x1b6] sm:$0xff] %vm1049_vm5, %v5499_v11 }
 0x106   : > { %1105 = vst.msk [vmem:[#allocation2 + $0x1be] sm:$0xff] %vm1049_vm5, %v5503_v10  ;;  %1106 = vst.msk [vmem:[#allocation2 + $0x1c6] sm:$0xff] %vm1049_vm5, %v5504_v9  ;;  %v5512_v14 = vpop.permute.xlu1 %5511  ;;  %v5507_v15 = vpop.permute.xlu0 %5506 }
 0x107   : > { %v5514_v20 = vunpack.i.h.bf16 %v5512_v14  ;;  %v5513_v22 = vunpack.i.l.bf16 %v5512_v14  ;;  %v5509_v24 = vunpack.i.h.bf16 %v5507_v15  ;;  %v5508_v28 = vunpack.i.l.bf16 %v5507_v15 }
 0x108   : > { %5791 = vrot.lane.b32.xlu1 %v6985_v53, %s6502_s13  ;;  %5786 = vrot.lane.b32.xlu0 %v6991_v55, %s6502_s13 }
 0x109   : > { %1107 = vst.msk [vmem:[#allocation2 + $0x1ce] sm:$0xff] %vm1049_vm5, %v5508_v28  ;;  %1108 = vst.msk [vmem:[#allocation2 + $0x1d6] sm:$0xff] %vm1049_vm5, %v5509_v24 }
 0x10a   : > { %1109 = vst.msk [vmem:[#allocation2 + $0x1de] sm:$0xff] %vm1049_vm5, %v5513_v22  ;;  %1110 = vst.msk [vmem:[#allocation2 + $0x1e6] sm:$0xff] %vm1049_vm5, %v5514_v20  ;;  %v1114_v31 = vpop.permute.xlu1 %1113  ;;  %v5517_v32 = vpop.permute.xlu0 %5516 }
 0x10b   : > { %1117 = vst.msk [vmem:[#allocation2 + $0x1fe] sm:$0x3] %vm1116_vm6, %v1114_v31  ;;  %v5519_v37 = vunpack.i.h.bf16 %v5517_v32  ;;  %v5518_v41 = vunpack.i.l.bf16 %v5517_v32  ;;  %vm2617_vm6 = vcmask 294150  }
 0x10c   : > { %5801 = vrot.lane.b32.xlu1 %v7002_v56, %s6502_s13  ;;  %5796 = vrot.lane.b32.xlu0 %v7008_v59, %s6502_s13 }
 0x10d   : > { %1111 = vst.msk [vmem:[#allocation2 + $0x1ee] sm:$0xff] %vm1049_vm5, %v5518_v41  ;;  %1112 = vst.msk [vmem:[#allocation2 + $0x1f6] sm:$0xff] %vm1049_vm5, %v5519_v37  ;;  %vm2354_vm5 = vcmask 261349  }
 0x10e   : > { %v5527_v30 = vpop.permute.xlu1 %5526  ;;  %v5522_v45 = vpop.permute.xlu0 %5521 }
 0x10f   : > { %v5529_v23 = vunpack.i.h.bf16 %v5527_v30  ;;  %v5528_v29 = vunpack.i.l.bf16 %v5527_v30  ;;  %v5524_v35 = vunpack.i.h.bf16 %v5522_v45  ;;  %v5523_v49 = vunpack.i.l.bf16 %v5522_v45 }
 0x110   : > { %5811 = vrot.lane.b32.xlu1 %v7016_v61, %s6502_s13  ;;  %5806 = vrot.lane.b32.xlu0 %v7018_v63, %s6502_s13 }
 0x111   : > { %1308 = vst.msk [vmem:[#allocation2 + $0xe] sm:$0xff] %vm1306_vm7, %v5528_v29  ;;  %1309 = vst.msk [vmem:[#allocation2 + $0x16] sm:$0xff] %vm1306_vm7, %v5529_v23 }
 0x112   : > { %1305 = vst.msk [vmem:[#allocation2 - $0x2] sm:$0xfc] %vm1304_vm8, %v5523_v49  ;;  %v5537_v51 = vpop.permute.xlu1 %5536  ;;  %v5532_v52 = vpop.permute.xlu0 %5531  ;;  %vm2816_vm8 = vcmask 293888  }
 0x113   : > { %1307 = vst.msk [vmem:[#allocation2 + $0x6] sm:$0xff] %vm1306_vm7, %v5524_v35  ;;  %v5539_v58 = vunpack.i.h.bf16 %v5537_v51  ;;  %v5538_v60 = vunpack.i.l.bf16 %v5537_v51  ;;  %v5534_v17 = vunpack.i.h.bf16 %v5532_v52  ;;  %v5533_v6 = vunpack.i.l.bf16 %v5532_v52 }
 0x114   : > { %5821 = vrot.lane.b32.xlu1 %v7024_v0, %s6502_s13  ;;  %5816 = vrot.lane.b32.xlu0 %v7026_v1, %s6502_s13 }
 0x115   : > { %1312 = vst.msk [vmem:[#allocation2 + $0x2e] sm:$0xff] %vm1306_vm7, %v5538_v60  ;;  %1313 = vst.msk [vmem:[#allocation2 + $0x36] sm:$0xff] %vm1306_vm7, %v5539_v58 }
 0x116   : > { %1311 = vst.msk [vmem:[#allocation2 + $0x26] sm:$0xff] %vm1306_vm7, %v5534_v17  ;;  %1310 = vst.msk [vmem:[#allocation2 + $0x1e] sm:$0xff] %vm1306_vm7, %v5533_v6  ;;  %v5547_v7 = vpop.permute.xlu1 %5546  ;;  %v5542_v8 = vpop.permute.xlu0 %5541 }
 0x117   : > { %v5549_v9 = vunpack.i.h.bf16 %v5547_v7  ;;  %v5548_v10 = vunpack.i.l.bf16 %v5547_v7  ;;  %v5544_v11 = vunpack.i.h.bf16 %v5542_v8  ;;  %v5543_v12 = vunpack.i.l.bf16 %v5542_v8 }
 0x118   : > { %5831 = vrot.lane.b32.xlu1 %v7037_v2, %s6502_s13  ;;  %5826 = vrot.lane.b32.xlu0 %v7039_v3, %s6502_s13 }
 0x119   : > { %1316 = vst.msk [vmem:[#allocation2 + $0x4e] sm:$0xff] %vm1306_vm7, %v5548_v10  ;;  %1317 = vst.msk [vmem:[#allocation2 + $0x56] sm:$0xff] %vm1306_vm7, %v5549_v9 }
 0x11a   : > { %1314 = vst.msk [vmem:[#allocation2 + $0x3e] sm:$0xff] %vm1306_vm7, %v5543_v12  ;;  %1315 = vst.msk [vmem:[#allocation2 + $0x46] sm:$0xff] %vm1306_vm7, %v5544_v11  ;;  %v5557_v14 = vpop.permute.xlu1 %5556  ;;  %v5552_v15 = vpop.permute.xlu0 %5551 }
 0x11b   : > { %v5559_v20 = vunpack.i.h.bf16 %v5557_v14  ;;  %v5558_v22 = vunpack.i.l.bf16 %v5557_v14  ;;  %v5554_v24 = vunpack.i.h.bf16 %v5552_v15  ;;  %v5553_v28 = vunpack.i.l.bf16 %v5552_v15 }
 0x11c   : > { %1637 = vrot.lane.b32.xlu1 %v7262_v54, %s6502_s13  ;;  %5836 = vrot.lane.b32.xlu0 %v7251_v42, %s6502_s13 }
 0x11d   : > { %1320 = vst.msk [vmem:[#allocation2 + $0x6e] sm:$0xff] %vm1306_vm7, %v5558_v22  ;;  %1321 = vst.msk [vmem:[#allocation2 + $0x76] sm:$0xff] %vm1306_vm7, %v5559_v20 }
 0x11e   : > { %1318 = vst.msk [vmem:[#allocation2 + $0x5e] sm:$0xff] %vm1306_vm7, %v5553_v28  ;;  %1319 = vst.msk [vmem:[#allocation2 + $0x66] sm:$0xff] %vm1306_vm7, %v5554_v24  ;;  %v5567_v31 = vpop.permute.xlu1 %5566  ;;  %v5562_v32 = vpop.permute.xlu0 %5561 }
 0x11f   : > { %v5569_v37 = vunpack.i.h.bf16 %v5567_v31  ;;  %v5568_v41 = vunpack.i.l.bf16 %v5567_v31  ;;  %v5564_v30 = vunpack.i.h.bf16 %v5562_v32  ;;  %v5563_v45 = vunpack.i.l.bf16 %v5562_v32 }
 0x120   : > { %5846 = vrot.lane.b32.xlu1 %v6575_v16, %s6503_s14  ;;  %5841 = vrot.lane.b32.xlu0 %v6602_v26, %s6503_s14 }
 0x121   : > { %1324 = vst.msk [vmem:[#allocation2 + $0x8e] sm:$0xff] %vm1306_vm7, %v5568_v41  ;;  %1325 = vst.msk [vmem:[#allocation2 + $0x96] sm:$0xff] %vm1306_vm7, %v5569_v37 }
 0x122   : > { %1322 = vst.msk [vmem:[#allocation2 + $0x7e] sm:$0xff] %vm1306_vm7, %v5563_v45  ;;  %1323 = vst.msk [vmem:[#allocation2 + $0x86] sm:$0xff] %vm1306_vm7, %v5564_v30  ;;  %v5577_v23 = vpop.permute.xlu1 %5576  ;;  %v5572_v29 = vpop.permute.xlu0 %5571 }
 0x123   : > { %v5579_v35 = vunpack.i.h.bf16 %v5577_v23  ;;  %v5578_v49 = vunpack.i.l.bf16 %v5577_v23  ;;  %v5574_v51 = vunpack.i.h.bf16 %v5572_v29  ;;  %v5573_v52 = vunpack.i.l.bf16 %v5572_v29 }
 0x124   : > { %5856 = vrot.lane.b32.xlu1 %v6650_v44, %s6503_s14  ;;  %5851 = vrot.lane.b32.xlu0 %v6586_v21, %s6503_s14 }
 0x125   : > { %1328 = vst.msk [vmem:[#allocation2 + $0xae] sm:$0xff] %vm1306_vm7, %v5578_v49  ;;  %1329 = vst.msk [vmem:[#allocation2 + $0xb6] sm:$0xff] %vm1306_vm7, %v5579_v35 }
 0x126   : > { %1326 = vst.msk [vmem:[#allocation2 + $0x9e] sm:$0xff] %vm1306_vm7, %v5573_v52  ;;  %1327 = vst.msk [vmem:[#allocation2 + $0xa6] sm:$0xff] %vm1306_vm7, %v5574_v51  ;;  %v5587_v26 = vpop.permute.xlu1 %5586  ;;  %v5582_v58 = vpop.permute.xlu0 %5581 }
 0x127   : > { %v5589_v60 = vunpack.i.h.bf16 %v5587_v26  ;;  %v5588_v17 = vunpack.i.l.bf16 %v5587_v26  ;;  %v5584_v6 = vunpack.i.h.bf16 %v5582_v58  ;;  %v5583_v7 = vunpack.i.l.bf16 %v5582_v58 }
 0x128   : > { %5866 = vrot.lane.b32.xlu1 %v6717_v62, %s6503_s14  ;;  %5861 = vrot.lane.b32.xlu0 %v6632_v40, %s6503_s14 }
 0x129   : > { %1332 = vst.msk [vmem:[#allocation2 + $0xce] sm:$0xff] %vm1306_vm7, %v5588_v17  ;;  %1333 = vst.msk [vmem:[#allocation2 + $0xd6] sm:$0xff] %vm1306_vm7, %v5589_v60 }
 0x12a   : > { %1330 = vst.msk [vmem:[#allocation2 + $0xbe] sm:$0xff] %vm1306_vm7, %v5583_v7  ;;  %1331 = vst.msk [vmem:[#allocation2 + $0xc6] sm:$0xff] %vm1306_vm7, %v5584_v6  ;;  %v5597_v8 = vpop.permute.xlu1 %5596  ;;  %v5592_v9 = vpop.permute.xlu0 %5591 }
 0x12b   : > { %v5599_v10 = vunpack.i.h.bf16 %v5597_v8  ;;  %v5598_v11 = vunpack.i.l.bf16 %v5597_v8  ;;  %v5594_v12 = vunpack.i.h.bf16 %v5592_v9  ;;  %v5593_v14 = vunpack.i.l.bf16 %v5592_v9 }
 0x12c   : > { %5876 = vrot.lane.b32.xlu1 %v6792_v19, %s6503_s14  ;;  %5871 = vrot.lane.b32.xlu0 %v6696_v57, %s6503_s14 }
 0x12d   : > { %1336 = vst.msk [vmem:[#allocation2 + $0xee] sm:$0xff] %vm1306_vm7, %v5598_v11  ;;  %1337 = vst.msk [vmem:[#allocation2 + $0xf6] sm:$0xff] %vm1306_vm7, %v5599_v10 }
 0x12e   : > { %1334 = vst.msk [vmem:[#allocation2 + $0xde] sm:$0xff] %vm1306_vm7, %v5593_v14  ;;  %1335 = vst.msk [vmem:[#allocation2 + $0xe6] sm:$0xff] %vm1306_vm7, %v5594_v12  ;;  %v5607_v15 = vpop.permute.xlu1 %5606  ;;  %v5602_v20 = vpop.permute.xlu0 %5601 }
 0x12f   : > { %v5609_v22 = vunpack.i.h.bf16 %v5607_v15  ;;  %v5608_v24 = vunpack.i.l.bf16 %v5607_v15  ;;  %v5604_v28 = vunpack.i.h.bf16 %v5602_v20  ;;  %v5603_v31 = vunpack.i.l.bf16 %v5602_v20 }
 0x130   : > { %5886 = vrot.lane.b32.xlu1 %v6866_v25, %s6503_s14  ;;  %5881 = vrot.lane.b32.xlu0 %v6786_v18, %s6503_s14 }
 0x131   : > { %1340 = vst.msk [vmem:[#allocation2 + $0x10e] sm:$0xff] %vm1306_vm7, %v5608_v24  ;;  %1341 = vst.msk [vmem:[#allocation2 + $0x116] sm:$0xff] %vm1306_vm7, %v5609_v22 }
 0x132   : > { %1338 = vst.msk [vmem:[#allocation2 + $0xfe] sm:$0xff] %vm1306_vm7, %v5603_v31  ;;  %1339 = vst.msk [vmem:[#allocation2 + $0x106] sm:$0xff] %vm1306_vm7, %v5604_v28  ;;  %v5617_v32 = vpop.permute.xlu1 %5616  ;;  %v5612_v37 = vpop.permute.xlu0 %5611 }
 0x133   : > { %v5619_v41 = vunpack.i.h.bf16 %v5617_v32  ;;  %v5618_v30 = vunpack.i.l.bf16 %v5617_v32  ;;  %v5614_v45 = vunpack.i.h.bf16 %v5612_v37  ;;  %v5613_v23 = vunpack.i.l.bf16 %v5612_v37 }
 0x134   : > { %5896 = vrot.lane.b32.xlu1 %v6908_v33, %s6503_s14  ;;  %5891 = vrot.lane.b32.xlu0 %v6842_v13, %s6503_s14 }
 0x135   : > { %1344 = vst.msk [vmem:[#allocation2 + $0x12e] sm:$0xff] %vm1306_vm7, %v5618_v30  ;;  %1345 = vst.msk [vmem:[#allocation2 + $0x136] sm:$0xff] %vm1306_vm7, %v5619_v41 }
 0x136   : > { %1342 = vst.msk [vmem:[#allocation2 + $0x11e] sm:$0xff] %vm1306_vm7, %v5613_v23  ;;  %1343 = vst.msk [vmem:[#allocation2 + $0x126] sm:$0xff] %vm1306_vm7, %v5614_v45  ;;  %v5627_v29 = vpop.permute.xlu1 %5626  ;;  %v5622_v35 = vpop.permute.xlu0 %5621 }
 0x137   : > { %v5629_v49 = vunpack.i.h.bf16 %v5627_v29  ;;  %v5628_v51 = vunpack.i.l.bf16 %v5627_v29  ;;  %v5624_v52 = vunpack.i.h.bf16 %v5622_v35  ;;  %v5623_v26 = vunpack.i.l.bf16 %v5622_v35 }
 0x138   : > { %5906 = vrot.lane.b32.xlu1 %v6927_v38, %s6503_s14  ;;  %5901 = vrot.lane.b32.xlu0 %v6902_v36, %s6503_s14 }
 0x139   : > { %1348 = vst.msk [vmem:[#allocation2 + $0x14e] sm:$0xff] %vm1306_vm7, %v5628_v51  ;;  %1349 = vst.msk [vmem:[#allocation2 + $0x156] sm:$0xff] %vm1306_vm7, %v5629_v49 }
 0x13a   : > { %1346 = vst.msk [vmem:[#allocation2 + $0x13e] sm:$0xff] %vm1306_vm7, %v5623_v26  ;;  %1347 = vst.msk [vmem:[#allocation2 + $0x146] sm:$0xff] %vm1306_vm7, %v5624_v52  ;;  %v5637_v58 = vpop.permute.xlu1 %5636  ;;  %v5632_v60 = vpop.permute.xlu0 %5631 }
 0x13b   : > { %v5639_v17 = vunpack.i.h.bf16 %v5637_v58  ;;  %v5638_v6 = vunpack.i.l.bf16 %v5637_v58  ;;  %v5634_v7 = vunpack.i.h.bf16 %v5632_v60  ;;  %v5633_v8 = vunpack.i.l.bf16 %v5632_v60 }
 0x13c   : > { %5916 = vrot.lane.b32.xlu1 %v6943_v43, %s6503_s14  ;;  %5911 = vrot.lane.b32.xlu0 %v6921_v34, %s6503_s14 }
 0x13d   : > { %1352 = vst.msk [vmem:[#allocation2 + $0x16e] sm:$0xff] %vm1306_vm7, %v5638_v6  ;;  %1353 = vst.msk [vmem:[#allocation2 + $0x176] sm:$0xff] %vm1306_vm7, %v5639_v17 }
 0x13e   : > { %1350 = vst.msk [vmem:[#allocation2 + $0x15e] sm:$0xff] %vm1306_vm7, %v5633_v8  ;;  %1351 = vst.msk [vmem:[#allocation2 + $0x166] sm:$0xff] %vm1306_vm7, %v5634_v7  ;;  %v5647_v9 = vpop.permute.xlu1 %5646  ;;  %v5642_v10 = vpop.permute.xlu0 %5641 }
 0x13f   : > { %v5649_v11 = vunpack.i.h.bf16 %v5647_v9  ;;  %v5648_v12 = vunpack.i.l.bf16 %v5647_v9  ;;  %v5644_v14 = vunpack.i.h.bf16 %v5642_v10  ;;  %v5643_v15 = vunpack.i.l.bf16 %v5642_v10 }
 0x140   : > { %5926 = vrot.lane.b32.xlu1 %v6959_v47, %s6503_s14  ;;  %5921 = vrot.lane.b32.xlu0 %v6937_v39, %s6503_s14 }
 0x141   : > { %1356 = vst.msk [vmem:[#allocation2 + $0x18e] sm:$0xff] %vm1306_vm7, %v5648_v12  ;;  %1357 = vst.msk [vmem:[#allocation2 + $0x196] sm:$0xff] %vm1306_vm7, %v5649_v11 }
 0x142   : > { %1354 = vst.msk [vmem:[#allocation2 + $0x17e] sm:$0xff] %vm1306_vm7, %v5643_v15  ;;  %1355 = vst.msk [vmem:[#allocation2 + $0x186] sm:$0xff] %vm1306_vm7, %v5644_v14  ;;  %v5657_v20 = vpop.permute.xlu1 %5656  ;;  %v5652_v22 = vpop.permute.xlu0 %5651 }
 0x143   : > { %v5659_v24 = vunpack.i.h.bf16 %v5657_v20  ;;  %v5658_v28 = vunpack.i.l.bf16 %v5657_v20  ;;  %v5654_v31 = vunpack.i.h.bf16 %v5652_v22  ;;  %v5653_v32 = vunpack.i.l.bf16 %v5652_v22 }
 0x144   : > { %5936 = vrot.lane.b32.xlu1 %v6975_v50, %s6503_s14  ;;  %5931 = vrot.lane.b32.xlu0 %v6953_v46, %s6503_s14 }
 0x145   : > { %1360 = vst.msk [vmem:[#allocation2 + $0x1ae] sm:$0xff] %vm1306_vm7, %v5658_v28  ;;  %1361 = vst.msk [vmem:[#allocation2 + $0x1b6] sm:$0xff] %vm1306_vm7, %v5659_v24 }
 0x146   : > { %1358 = vst.msk [vmem:[#allocation2 + $0x19e] sm:$0xff] %vm1306_vm7, %v5653_v32  ;;  %1359 = vst.msk [vmem:[#allocation2 + $0x1a6] sm:$0xff] %vm1306_vm7, %v5654_v31  ;;  %v5667_v37 = vpop.permute.xlu1 %5666  ;;  %v5662_v41 = vpop.permute.xlu0 %5661 }
 0x147   : > { %v5669_v30 = vunpack.i.h.bf16 %v5667_v37  ;;  %v5668_v45 = vunpack.i.l.bf16 %v5667_v37  ;;  %v5664_v23 = vunpack.i.h.bf16 %v5662_v41  ;;  %v5663_v29 = vunpack.i.l.bf16 %v5662_v41 }
 0x148   : > { %5946 = vrot.lane.b32.xlu1 %v6991_v55, %s6503_s14  ;;  %5941 = vrot.lane.b32.xlu0 %v6969_v48, %s6503_s14 }
 0x149   : > { %1364 = vst.msk [vmem:[#allocation2 + $0x1ce] sm:$0xff] %vm1306_vm7, %v5668_v45  ;;  %1365 = vst.msk [vmem:[#allocation2 + $0x1d6] sm:$0xff] %vm1306_vm7, %v5669_v30 }
 0x14a   : > { %1362 = vst.msk [vmem:[#allocation2 + $0x1be] sm:$0xff] %vm1306_vm7, %v5663_v29  ;;  %1363 = vst.msk [vmem:[#allocation2 + $0x1c6] sm:$0xff] %vm1306_vm7, %v5664_v23  ;;  %v5677_v35 = vpop.permute.xlu1 %5676  ;;  %v5672_v49 = vpop.permute.xlu0 %5671 }
 0x14b   : > { %v5679_v51 = vunpack.i.h.bf16 %v5677_v35  ;;  %v5678_v52 = vunpack.i.l.bf16 %v5677_v35  ;;  %v5674_v26 = vunpack.i.h.bf16 %v5672_v49  ;;  %v5673_v58 = vunpack.i.l.bf16 %v5672_v49 }
 0x14c   : > { %5956 = vrot.lane.b32.xlu1 %v7008_v59, %s6503_s14  ;;  %5951 = vrot.lane.b32.xlu0 %v6985_v53, %s6503_s14 }
 0x14d   : > { %1379 = vst.msk [vmem:[#allocation2 + $0x1ee] sm:$0xff] %vm1306_vm7, %v5678_v52  ;;  %1380 = vst.msk [vmem:[#allocation2 + $0x1f6] sm:$0xff] %vm1306_vm7, %v5679_v51 }
 0x14e   : > { %1366 = vst.msk [vmem:[#allocation2 + $0x1de] sm:$0xff] %vm1306_vm7, %v5673_v58  ;;  %1367 = vst.msk [vmem:[#allocation2 + $0x1e6] sm:$0xff] %vm1306_vm7, %v5674_v26  ;;  %v5682_v60 = vpop.permute.xlu1 %5681  ;;  %v1375_v17 = vpop.permute.xlu0 %1374  ;;  %vm2619_vm7 = vcmask 294144  }
 0x14f   : > { %v5684_v6 = vunpack.i.h.bf16 %v5682_v60  ;;  %v5683_v7 = vunpack.i.l.bf16 %v5682_v60  ;;  %1382 = vst.msk [vmem:[#allocation2 + $0x1fe] sm:$0x3] %vm1381_vm9, %v1375_v17  ;;  %vm2435_vm9 = vcmask 258272  }
 0x150   : > { %5966 = vrot.lane.b32.xlu1 %v7018_v63, %s6503_s14  ;;  %5961 = vrot.lane.b32.xlu0 %v7002_v56, %s6503_s14 }
 0x151   : > { %1570 = vst.msk [vmem:[#allocation2 - $0x3] sm:$0xf8] %vm1569_vm10, %v5683_v7  ;;  %vm2698_vm10 = vcmask 292096  }
 0x152   : > { %1572 = vst.msk [vmem:[#allocation2 + $0x5] sm:$0xff] %vm1571_vm11, %v5684_v6  ;;  %v5692_v8 = vpop.permute.xlu1 %5691  ;;  %v5687_v9 = vpop.permute.xlu0 %5686 }
 0x153   : > { %v5694_v10 = vunpack.i.h.bf16 %v5692_v8  ;;  %v5693_v11 = vunpack.i.l.bf16 %v5692_v8  ;;  %v5689_v12 = vunpack.i.h.bf16 %v5687_v9  ;;  %v5688_v14 = vunpack.i.l.bf16 %v5687_v9 }
 0x154   : > { %5976 = vrot.lane.b32.xlu1 %v7026_v1, %s6503_s14  ;;  %5971 = vrot.lane.b32.xlu0 %v7016_v61, %s6503_s14 }
 0x155   : > { %1575 = vst.msk [vmem:[#allocation2 + $0x1d] sm:$0xff] %vm1571_vm11, %v5693_v11  ;;  %1576 = vst.msk [vmem:[#allocation2 + $0x25] sm:$0xff] %vm1571_vm11, %v5694_v10 }
 0x156   : > { %1573 = vst.msk [vmem:[#allocation2 + $0xd] sm:$0xff] %vm1571_vm11, %v5688_v14  ;;  %1574 = vst.msk [vmem:[#allocation2 + $0x15] sm:$0xff] %vm1571_vm11, %v5689_v12  ;;  %v5702_v15 = vpop.permute.xlu1 %5701  ;;  %v5697_v20 = vpop.permute.xlu0 %5696 }
 0x157   : > { %v5704_v22 = vunpack.i.h.bf16 %v5702_v15  ;;  %v5703_v24 = vunpack.i.l.bf16 %v5702_v15  ;;  %v5699_v28 = vunpack.i.h.bf16 %v5697_v20  ;;  %v5698_v31 = vunpack.i.l.bf16 %v5697_v20 }
 0x158   : > { %5986 = vrot.lane.b32.xlu1 %v7039_v3, %s6503_s14  ;;  %5981 = vrot.lane.b32.xlu0 %v7024_v0, %s6503_s14 }
 0x159   : > { %1579 = vst.msk [vmem:[#allocation2 + $0x3d] sm:$0xff] %vm1571_vm11, %v5703_v24  ;;  %1580 = vst.msk [vmem:[#allocation2 + $0x45] sm:$0xff] %vm1571_vm11, %v5704_v22 }
 0x15a   : > { %1577 = vst.msk [vmem:[#allocation2 + $0x2d] sm:$0xff] %vm1571_vm11, %v5698_v31  ;;  %1578 = vst.msk [vmem:[#allocation2 + $0x35] sm:$0xff] %vm1571_vm11, %v5699_v28  ;;  %v5712_v32 = vpop.permute.xlu1 %5711  ;;  %v5707_v37 = vpop.permute.xlu0 %5706 }
 0x15b   : > { %v5714_v41 = vunpack.i.h.bf16 %v5712_v32  ;;  %v5713_v30 = vunpack.i.l.bf16 %v5712_v32  ;;  %v5709_v45 = vunpack.i.h.bf16 %v5707_v37  ;;  %v5708_v23 = vunpack.i.l.bf16 %v5707_v37 }
 0x15c   : > { %5996 = vrot.lane.b32.xlu1 %v7251_v42, %s6503_s14  ;;  %5991 = vrot.lane.b32.xlu0 %v7037_v2, %s6503_s14 }
 0x15d   : > { %1583 = vst.msk [vmem:[#allocation2 + $0x5d] sm:$0xff] %vm1571_vm11, %v5713_v30  ;;  %1584 = vst.msk [vmem:[#allocation2 + $0x65] sm:$0xff] %vm1571_vm11, %v5714_v41 }
 0x15e   : > { %1581 = vst.msk [vmem:[#allocation2 + $0x4d] sm:$0xff] %vm1571_vm11, %v5708_v23  ;;  %1582 = vst.msk [vmem:[#allocation2 + $0x55] sm:$0xff] %vm1571_vm11, %v5709_v45  ;;  %v5722_v29 = vpop.permute.xlu1 %5721  ;;  %v5717_v35 = vpop.permute.xlu0 %5716 }
 0x15f   : > { %v5724_v49 = vunpack.i.h.bf16 %v5722_v29  ;;  %v5723_v51 = vunpack.i.l.bf16 %v5722_v29  ;;  %v5719_v52 = vunpack.i.h.bf16 %v5717_v35  ;;  %v5718_v26 = vunpack.i.l.bf16 %v5717_v35 }
 0x160   : > { %6001 = vrot.lane.b32.xlu1 %v6575_v16, %s6504_s15  ;;  %1900 = vrot.lane.b32.xlu0 %v7262_v54, %s6503_s14  ;;  %s322_s14 = scalar_lea.vmem %s8457_s6, %s8475_s22 }
 0x161   : > { %1587 = vst.msk [vmem:[#allocation2 + $0x7d] sm:$0xff] %vm1571_vm11, %v5723_v51  ;;  %1588 = vst.msk [vmem:[#allocation2 + $0x85] sm:$0xff] %vm1571_vm11, %v5724_v49 }
 0x162   : > { %1585 = vst.msk [vmem:[#allocation2 + $0x6d] sm:$0xff] %vm1571_vm11, %v5718_v26  ;;  %1586 = vst.msk [vmem:[#allocation2 + $0x75] sm:$0xff] %vm1571_vm11, %v5719_v52  ;;  %v5732_v58 = vpop.permute.xlu1 %5731  ;;  %v5727_v60 = vpop.permute.xlu0 %5726 }
 0x163   : > { %v5734_v17 = vunpack.i.h.bf16 %v5732_v58  ;;  %v5733_v6 = vunpack.i.l.bf16 %v5732_v58  ;;  %v5729_v7 = vunpack.i.h.bf16 %v5727_v60  ;;  %v5728_v8 = vunpack.i.l.bf16 %v5727_v60 }
 0x164   : > { %6011 = vrot.lane.b32.xlu1 %v6650_v44, %s6504_s15  ;;  %6006 = vrot.lane.b32.xlu0 %v6586_v21, %s6504_s15 }
 0x165   : > { %1591 = vst.msk [vmem:[#allocation2 + $0x9d] sm:$0xff] %vm1571_vm11, %v5733_v6  ;;  %1592 = vst.msk [vmem:[#allocation2 + $0xa5] sm:$0xff] %vm1571_vm11, %v5734_v17 }
 0x166   : > { %1589 = vst.msk [vmem:[#allocation2 + $0x8d] sm:$0xff] %vm1571_vm11, %v5728_v8  ;;  %1590 = vst.msk [vmem:[#allocation2 + $0x95] sm:$0xff] %vm1571_vm11, %v5729_v7  ;;  %v5742_v9 = vpop.permute.xlu1 %5741  ;;  %v5737_v10 = vpop.permute.xlu0 %5736 }
 0x167   : > { %v5744_v11 = vunpack.i.h.bf16 %v5742_v9  ;;  %v5743_v12 = vunpack.i.l.bf16 %v5742_v9  ;;  %v5739_v14 = vunpack.i.h.bf16 %v5737_v10  ;;  %v5738_v15 = vunpack.i.l.bf16 %v5737_v10 }
 0x168   : > { %6021 = vrot.lane.b32.xlu1 %v6717_v62, %s6504_s15  ;;  %6016 = vrot.lane.b32.xlu0 %v6632_v40, %s6504_s15 }
 0x169   : > { %1595 = vst.msk [vmem:[#allocation2 + $0xbd] sm:$0xff] %vm1571_vm11, %v5743_v12  ;;  %1596 = vst.msk [vmem:[#allocation2 + $0xc5] sm:$0xff] %vm1571_vm11, %v5744_v11 }
 0x16a   : > { %1593 = vst.msk [vmem:[#allocation2 + $0xad] sm:$0xff] %vm1571_vm11, %v5738_v15  ;;  %1594 = vst.msk [vmem:[#allocation2 + $0xb5] sm:$0xff] %vm1571_vm11, %v5739_v14  ;;  %v5752_v20 = vpop.permute.xlu1 %5751  ;;  %v5747_v22 = vpop.permute.xlu0 %5746 }
 0x16b   : > { %v5754_v24 = vunpack.i.h.bf16 %v5752_v20  ;;  %v5753_v28 = vunpack.i.l.bf16 %v5752_v20  ;;  %v5749_v31 = vunpack.i.h.bf16 %v5747_v22  ;;  %v5748_v32 = vunpack.i.l.bf16 %v5747_v22 }
 0x16c   : > { %6031 = vrot.lane.b32.xlu1 %v6792_v19, %s6504_s15  ;;  %6026 = vrot.lane.b32.xlu0 %v6696_v57, %s6504_s15 }
 0x16d   : > { %1599 = vst.msk [vmem:[#allocation2 + $0xdd] sm:$0xff] %vm1571_vm11, %v5753_v28  ;;  %1600 = vst.msk [vmem:[#allocation2 + $0xe5] sm:$0xff] %vm1571_vm11, %v5754_v24 }
 0x16e   : > { %1597 = vst.msk [vmem:[#allocation2 + $0xcd] sm:$0xff] %vm1571_vm11, %v5748_v32  ;;  %1598 = vst.msk [vmem:[#allocation2 + $0xd5] sm:$0xff] %vm1571_vm11, %v5749_v31  ;;  %v5762_v37 = vpop.permute.xlu1 %5761  ;;  %v5757_v41 = vpop.permute.xlu0 %5756 }
 0x16f   : > { %v5764_v30 = vunpack.i.h.bf16 %v5762_v37  ;;  %v5763_v45 = vunpack.i.l.bf16 %v5762_v37  ;;  %v5759_v23 = vunpack.i.h.bf16 %v5757_v41  ;;  %v5758_v29 = vunpack.i.l.bf16 %v5757_v41 }
 0x170   : > { %6041 = vrot.lane.b32.xlu1 %v6866_v25, %s6504_s15  ;;  %6036 = vrot.lane.b32.xlu0 %v6786_v18, %s6504_s15 }
 0x171   : > { %1603 = vst.msk [vmem:[#allocation2 + $0xfd] sm:$0xff] %vm1571_vm11, %v5763_v45  ;;  %1604 = vst.msk [vmem:[#allocation2 + $0x105] sm:$0xff] %vm1571_vm11, %v5764_v30 }
 0x172   : > { %1601 = vst.msk [vmem:[#allocation2 + $0xed] sm:$0xff] %vm1571_vm11, %v5758_v29  ;;  %1602 = vst.msk [vmem:[#allocation2 + $0xf5] sm:$0xff] %vm1571_vm11, %v5759_v23  ;;  %v5772_v35 = vpop.permute.xlu1 %5771  ;;  %v5767_v49 = vpop.permute.xlu0 %5766 }
 0x173   : > { %v5774_v51 = vunpack.i.h.bf16 %v5772_v35  ;;  %v5773_v52 = vunpack.i.l.bf16 %v5772_v35  ;;  %v5769_v26 = vunpack.i.h.bf16 %v5767_v49  ;;  %v5768_v58 = vunpack.i.l.bf16 %v5767_v49 }
 0x174   : > { %6051 = vrot.lane.b32.xlu1 %v6908_v33, %s6504_s15  ;;  %6046 = vrot.lane.b32.xlu0 %v6842_v13, %s6504_s15 }
 0x175   : > { %1607 = vst.msk [vmem:[#allocation2 + $0x11d] sm:$0xff] %vm1571_vm11, %v5773_v52  ;;  %1608 = vst.msk [vmem:[#allocation2 + $0x125] sm:$0xff] %vm1571_vm11, %v5774_v51 }
 0x176   : > { %1605 = vst.msk [vmem:[#allocation2 + $0x10d] sm:$0xff] %vm1571_vm11, %v5768_v58  ;;  %1606 = vst.msk [vmem:[#allocation2 + $0x115] sm:$0xff] %vm1571_vm11, %v5769_v26  ;;  %v5782_v60 = vpop.permute.xlu1 %5781  ;;  %v5777_v17 = vpop.permute.xlu0 %5776 }
 0x177   : > { %v5784_v6 = vunpack.i.h.bf16 %v5782_v60  ;;  %v5783_v7 = vunpack.i.l.bf16 %v5782_v60  ;;  %v5779_v8 = vunpack.i.h.bf16 %v5777_v17  ;;  %v5778_v9 = vunpack.i.l.bf16 %v5777_v17 }
 0x178   : > { %6061 = vrot.lane.b32.xlu1 %v6927_v38, %s6504_s15  ;;  %6056 = vrot.lane.b32.xlu0 %v6902_v36, %s6504_s15 }
 0x179   : > { %1611 = vst.msk [vmem:[#allocation2 + $0x13d] sm:$0xff] %vm1571_vm11, %v5783_v7  ;;  %1612 = vst.msk [vmem:[#allocation2 + $0x145] sm:$0xff] %vm1571_vm11, %v5784_v6 }
 0x17a   : > { %1609 = vst.msk [vmem:[#allocation2 + $0x12d] sm:$0xff] %vm1571_vm11, %v5778_v9  ;;  %1610 = vst.msk [vmem:[#allocation2 + $0x135] sm:$0xff] %vm1571_vm11, %v5779_v8  ;;  %v5792_v10 = vpop.permute.xlu1 %5791  ;;  %v5787_v11 = vpop.permute.xlu0 %5786 }
 0x17b   : > { %v5794_v12 = vunpack.i.h.bf16 %v5792_v10  ;;  %v5793_v14 = vunpack.i.l.bf16 %v5792_v10  ;;  %v5789_v15 = vunpack.i.h.bf16 %v5787_v11  ;;  %v5788_v20 = vunpack.i.l.bf16 %v5787_v11 }
 0x17c   : > { %6071 = vrot.lane.b32.xlu1 %v6943_v43, %s6504_s15  ;;  %6066 = vrot.lane.b32.xlu0 %v6921_v34, %s6504_s15 }
 0x17d   : > { %1615 = vst.msk [vmem:[#allocation2 + $0x15d] sm:$0xff] %vm1571_vm11, %v5793_v14  ;;  %1616 = vst.msk [vmem:[#allocation2 + $0x165] sm:$0xff] %vm1571_vm11, %v5794_v12 }
 0x17e   : > { %1613 = vst.msk [vmem:[#allocation2 + $0x14d] sm:$0xff] %vm1571_vm11, %v5788_v20  ;;  %1614 = vst.msk [vmem:[#allocation2 + $0x155] sm:$0xff] %vm1571_vm11, %v5789_v15  ;;  %v5802_v22 = vpop.permute.xlu1 %5801  ;;  %v5797_v24 = vpop.permute.xlu0 %5796 }
 0x17f   : > { %v5804_v28 = vunpack.i.h.bf16 %v5802_v22  ;;  %v5803_v31 = vunpack.i.l.bf16 %v5802_v22  ;;  %v5799_v32 = vunpack.i.h.bf16 %v5797_v24  ;;  %v5798_v37 = vunpack.i.l.bf16 %v5797_v24 }
 0x180   : > { %6081 = vrot.lane.b32.xlu1 %v6959_v47, %s6504_s15  ;;  %6076 = vrot.lane.b32.xlu0 %v6937_v39, %s6504_s15 }
 0x181   : > { %1619 = vst.msk [vmem:[#allocation2 + $0x17d] sm:$0xff] %vm1571_vm11, %v5803_v31  ;;  %1620 = vst.msk [vmem:[#allocation2 + $0x185] sm:$0xff] %vm1571_vm11, %v5804_v28 }
 0x182   : > { %1617 = vst.msk [vmem:[#allocation2 + $0x16d] sm:$0xff] %vm1571_vm11, %v5798_v37  ;;  %1618 = vst.msk [vmem:[#allocation2 + $0x175] sm:$0xff] %vm1571_vm11, %v5799_v32  ;;  %v5812_v41 = vpop.permute.xlu1 %5811  ;;  %v5807_v30 = vpop.permute.xlu0 %5806 }
 0x183   : > { %v5814_v45 = vunpack.i.h.bf16 %v5812_v41  ;;  %v5813_v23 = vunpack.i.l.bf16 %v5812_v41  ;;  %v5809_v29 = vunpack.i.h.bf16 %v5807_v30  ;;  %v5808_v35 = vunpack.i.l.bf16 %v5807_v30 }
 0x184   : > { %6091 = vrot.lane.b32.xlu1 %v6975_v50, %s6504_s15  ;;  %6086 = vrot.lane.b32.xlu0 %v6953_v46, %s6504_s15 }
 0x185   : > { %1623 = vst.msk [vmem:[#allocation2 + $0x19d] sm:$0xff] %vm1571_vm11, %v5813_v23  ;;  %1624 = vst.msk [vmem:[#allocation2 + $0x1a5] sm:$0xff] %vm1571_vm11, %v5814_v45 }
 0x186   : > { %1621 = vst.msk [vmem:[#allocation2 + $0x18d] sm:$0xff] %vm1571_vm11, %v5808_v35  ;;  %1622 = vst.msk [vmem:[#allocation2 + $0x195] sm:$0xff] %vm1571_vm11, %v5809_v29  ;;  %v5822_v49 = vpop.permute.xlu1 %5821  ;;  %v5817_v51 = vpop.permute.xlu0 %5816  ;;  %v7640_v35 = vld [vmem:[%s7031_s10 + $0x8] sm:$0xff]  }
 0x187   : > { %v5824_v52 = vunpack.i.h.bf16 %v5822_v49  ;;  %v5823_v26 = vunpack.i.l.bf16 %v5822_v49  ;;  %v5819_v58 = vunpack.i.h.bf16 %v5817_v51  ;;  %v5818_v60 = vunpack.i.l.bf16 %v5817_v51  ;;  %v456_v51 = vld [vmem:[%s7031_s10 + $0x10] sm:$0xf] }
 0x188   : > { %6101 = vrot.lane.b32.xlu1 %v6991_v55, %s6504_s15  ;;  %6096 = vrot.lane.b32.xlu0 %v6969_v48, %s6504_s15  ;;  %v4687_v49 = vunpack.c.h.bf16 %v7640_v35 }
 0x189   : > { %1627 = vst.msk [vmem:[#allocation2 + $0x1bd] sm:$0xff] %vm1571_vm11, %v5823_v26  ;;  %1628 = vst.msk [vmem:[#allocation2 + $0x1c5] sm:$0xff] %vm1571_vm11, %v5824_v52 }
 0x18a   : > { %1625 = vst.msk [vmem:[#allocation2 + $0x1ad] sm:$0xff] %vm1571_vm11, %v5818_v60  ;;  %1626 = vst.msk [vmem:[#allocation2 + $0x1b5] sm:$0xff] %vm1571_vm11, %v5819_v58  ;;  %v5832_v17 = vpop.permute.xlu1 %5831  ;;  %v5827_v6 = vpop.permute.xlu0 %5826 }
 0x18b   : > { %v5834_v7 = vunpack.i.h.bf16 %v5832_v17  ;;  %v5833_v8 = vunpack.i.l.bf16 %v5832_v17  ;;  %v5829_v9 = vunpack.i.h.bf16 %v5827_v6  ;;  %v5828_v10 = vunpack.i.l.bf16 %v5827_v6 }
 0x18c   : > { %6111 = vrot.lane.b32.xlu1 %v7008_v59, %s6504_s15  ;;  %6106 = vrot.lane.b32.xlu0 %v6985_v53, %s6504_s15 }
 0x18d   : > { %1631 = vst.msk [vmem:[#allocation2 + $0x1dd] sm:$0xff] %vm1571_vm11, %v5833_v8  ;;  %1632 = vst.msk [vmem:[#allocation2 + $0x1e5] sm:$0xff] %vm1571_vm11, %v5834_v7  ;;  %v7652_v7 = vunpack.c.l.bf16 %v456_v51  ;;  %v7657_v8 = vpack.i.bf16 %v4687_v49, %v7262_v54 }
 0x18e   : > { %1629 = vst.msk [vmem:[#allocation2 + $0x1cd] sm:$0xff] %vm1571_vm11, %v5828_v10  ;;  %1630 = vst.msk [vmem:[#allocation2 + $0x1d5] sm:$0xff] %vm1571_vm11, %v5829_v9  ;;  %v1638_v11 = vpop.permute.xlu1 %1637  ;;  %v5837_v12 = vpop.permute.xlu0 %5836 }
 0x18f   : > { %1645 = vst.msk [vmem:[#allocation2 + $0x1fd] sm:$0x7] %vm1644_vm12, %v1638_v11  ;;  %v5839_v14 = vunpack.i.h.bf16 %v5837_v12  ;;  %v5838_v15 = vunpack.i.l.bf16 %v5837_v12 }
 0x190   : > { %6121 = vrot.lane.b32.xlu1 %v7018_v63, %s6504_s15  ;;  %6116 = vrot.lane.b32.xlu0 %v7002_v56, %s6504_s15 }
 0x191   : > { %1642 = vst.msk [vmem:[#allocation2 + $0x1ed] sm:$0xff] %vm1571_vm11, %v5838_v15  ;;  %1643 = vst.msk [vmem:[#allocation2 + $0x1f5] sm:$0xff] %vm1571_vm11, %v5839_v14 }
 0x192   : > { %v5847_v20 = vpop.permute.xlu1 %5846  ;;  %v5842_v22 = vpop.permute.xlu0 %5841 }
 0x193   : > { %v5849_v24 = vunpack.i.h.bf16 %v5847_v20  ;;  %v5848_v28 = vunpack.i.l.bf16 %v5847_v20  ;;  %v5844_v31 = vunpack.i.h.bf16 %v5842_v22  ;;  %v5843_v32 = vunpack.i.l.bf16 %v5842_v22 }
 0x194   : > { %6131 = vrot.lane.b32.xlu1 %v7026_v1, %s6504_s15  ;;  %6126 = vrot.lane.b32.xlu0 %v7016_v61, %s6504_s15 }
 0x195   : > { %1833 = vst.msk [vmem:[#allocation2 - $0x4] sm:$0xf0] %vm1832_vm13, %v5843_v32 }
 0x196   : > { %1835 = vst.msk [vmem:[#allocation2 + $0x4] sm:$0xff] %vm1834_vm14, %v5844_v31  ;;  %1836 = vst.msk [vmem:[#allocation2 + $0xc] sm:$0xff] %vm1834_vm14, %v5848_v28  ;;  %v5857_v37 = vpop.permute.xlu1 %5856  ;;  %v5852_v41 = vpop.permute.xlu0 %5851 }
 0x197   : > { %1837 = vst.msk [vmem:[#allocation2 + $0x14] sm:$0xff] %vm1834_vm14, %v5849_v24  ;;  %v5859_v30 = vunpack.i.h.bf16 %v5857_v37  ;;  %v5858_v45 = vunpack.i.l.bf16 %v5857_v37  ;;  %v5854_v23 = vunpack.i.h.bf16 %v5852_v41  ;;  %v5853_v29 = vunpack.i.l.bf16 %v5852_v41 }
 0x198   : > { %6141 = vrot.lane.b32.xlu1 %v7039_v3, %s6504_s15  ;;  %6136 = vrot.lane.b32.xlu0 %v7024_v0, %s6504_s15 }
 0x199   : > { %1838 = vst.msk [vmem:[#allocation2 + $0x1c] sm:$0xff] %vm1834_vm14, %v5853_v29  ;;  %1839 = vst.msk [vmem:[#allocation2 + $0x24] sm:$0xff] %vm1834_vm14, %v5854_v23 }
 0x19a   : > { %1840 = vst.msk [vmem:[#allocation2 + $0x2c] sm:$0xff] %vm1834_vm14, %v5858_v45  ;;  %1841 = vst.msk [vmem:[#allocation2 + $0x34] sm:$0xff] %vm1834_vm14, %v5859_v30  ;;  %v5867_v52 = vpop.permute.xlu1 %5866  ;;  %v5862_v26 = vpop.permute.xlu0 %5861 }
 0x19b   : > { %v5869_v58 = vunpack.i.h.bf16 %v5867_v52  ;;  %v5868_v60 = vunpack.i.l.bf16 %v5867_v52  ;;  %v5864_v17 = vunpack.i.h.bf16 %v5862_v26  ;;  %v5863_v6 = vunpack.i.l.bf16 %v5862_v26 }
 0x19c   : > { %6151 = vrot.lane.b32.xlu1 %v7251_v42, %s6504_s15  ;;  %6146 = vrot.lane.b32.xlu0 %v7037_v2, %s6504_s15 }
 0x19d   : > { %1842 = vst.msk [vmem:[#allocation2 + $0x3c] sm:$0xff] %vm1834_vm14, %v5863_v6  ;;  %1843 = vst.msk [vmem:[#allocation2 + $0x44] sm:$0xff] %vm1834_vm14, %v5864_v17 }
 0x19e   : > { %1844 = vst.msk [vmem:[#allocation2 + $0x4c] sm:$0xff] %vm1834_vm14, %v5868_v60  ;;  %1845 = vst.msk [vmem:[#allocation2 + $0x54] sm:$0xff] %vm1834_vm14, %v5869_v58  ;;  %v5877_v9 = vpop.permute.xlu1 %5876  ;;  %v5872_v10 = vpop.permute.xlu0 %5871 }
 0x19f   : > { %v5879_v11 = vunpack.i.h.bf16 %v5877_v9  ;;  %v5878_v12 = vunpack.i.l.bf16 %v5877_v9  ;;  %v5874_v14 = vunpack.i.h.bf16 %v5872_v10  ;;  %v5873_v15 = vunpack.i.l.bf16 %v5872_v10 }
 0x1a0   : > { %2161 = vrot.lane.b32.xlu1 %v7652_v7, %s6504_s15  ;;  %6156 = vrot.lane.b32.xlu0 %v7657_v8, %s6504_s15  ;;  %v6506_v10 = vmov 0  }
 0x1a1   : > { %1846 = vst.msk [vmem:[#allocation2 + $0x5c] sm:$0xff] %vm1834_vm14, %v5873_v15  ;;  %1847 = vst.msk [vmem:[#allocation2 + $0x64] sm:$0xff] %vm1834_vm14, %v5874_v14  ;;  %6486 = vset.pattern.permute.xlu1 %v6506_v10  ;;  %6480 = vset.pattern.permute.xlu0 %v6506_v10 }
 0x1a2   : > { %1848 = vst.msk [vmem:[#allocation2 + $0x6c] sm:$0xff] %vm1834_vm14, %v5878_v12  ;;  %1849 = vst.msk [vmem:[#allocation2 + $0x74] sm:$0xff] %vm1834_vm14, %v5879_v11  ;;  %v5887_v20 = vpop.permute.xlu1 %5886  ;;  %v5882_v22 = vpop.permute.xlu0 %5881 }
 0x1a3   : > { %v5889_v24 = vunpack.i.h.bf16 %v5887_v20  ;;  %v5888_v28 = vunpack.i.l.bf16 %v5887_v20  ;;  %v5884_v31 = vunpack.i.h.bf16 %v5882_v22  ;;  %v5883_v32 = vunpack.i.l.bf16 %v5882_v22 }
 0x1a4   : > { %6166 = vrot.lane.b32.xlu1 %v6586_v21, %s6505_s16  ;;  %6161 = vrot.lane.b32.xlu0 %v6575_v16, %s6505_s16 }
 0x1a5   : > { %1850 = vst.msk [vmem:[#allocation2 + $0x7c] sm:$0xff] %vm1834_vm14, %v5883_v32  ;;  %1851 = vst.msk [vmem:[#allocation2 + $0x84] sm:$0xff] %vm1834_vm14, %v5884_v31 }
 0x1a6   : > { %1852 = vst.msk [vmem:[#allocation2 + $0x8c] sm:$0xff] %vm1834_vm14, %v5888_v28  ;;  %1853 = vst.msk [vmem:[#allocation2 + $0x94] sm:$0xff] %vm1834_vm14, %v5889_v24  ;;  %v5897_v37 = vpop.permute.xlu1 %5896  ;;  %v5892_v41 = vpop.permute.xlu0 %5891 }
 0x1a7   : > { %v5899_v30 = vunpack.i.h.bf16 %v5897_v37  ;;  %v5898_v45 = vunpack.i.l.bf16 %v5897_v37  ;;  %v5894_v23 = vunpack.i.h.bf16 %v5892_v41  ;;  %v5893_v29 = vunpack.i.l.bf16 %v5892_v41 }
 0x1a8   : > { %6176 = vrot.lane.b32.xlu1 %v6632_v40, %s6505_s16  ;;  %6171 = vrot.lane.b32.xlu0 %v6650_v44, %s6505_s16 }
 0x1a9   : > { %1854 = vst.msk [vmem:[#allocation2 + $0x9c] sm:$0xff] %vm1834_vm14, %v5893_v29  ;;  %1855 = vst.msk [vmem:[#allocation2 + $0xa4] sm:$0xff] %vm1834_vm14, %v5894_v23 }
 0x1aa   : > { %1856 = vst.msk [vmem:[#allocation2 + $0xac] sm:$0xff] %vm1834_vm14, %v5898_v45  ;;  %1857 = vst.msk [vmem:[#allocation2 + $0xb4] sm:$0xff] %vm1834_vm14, %v5899_v30  ;;  %v5907_v51 = vpop.permute.xlu1 %5906  ;;  %v5902_v52 = vpop.permute.xlu0 %5901 }
 0x1ab   : > { %v5909_v26 = vunpack.i.h.bf16 %v5907_v51  ;;  %v5908_v58 = vunpack.i.l.bf16 %v5907_v51  ;;  %v5904_v60 = vunpack.i.h.bf16 %v5902_v52  ;;  %v5903_v17 = vunpack.i.l.bf16 %v5902_v52 }
 0x1ac   : > { %6186 = vrot.lane.b32.xlu1 %v6696_v57, %s6505_s16  ;;  %6181 = vrot.lane.b32.xlu0 %v6717_v62, %s6505_s16 }
 0x1ad   : > { %1858 = vst.msk [vmem:[#allocation2 + $0xbc] sm:$0xff] %vm1834_vm14, %v5903_v17  ;;  %1859 = vst.msk [vmem:[#allocation2 + $0xc4] sm:$0xff] %vm1834_vm14, %v5904_v60 }
 0x1ae   : > { %1860 = vst.msk [vmem:[#allocation2 + $0xcc] sm:$0xff] %vm1834_vm14, %v5908_v58  ;;  %1861 = vst.msk [vmem:[#allocation2 + $0xd4] sm:$0xff] %vm1834_vm14, %v5909_v26  ;;  %v5917_v6 = vpop.permute.xlu1 %5916  ;;  %v5912_v9 = vpop.permute.xlu0 %5911 }
 0x1af   : > { %v5919_v11 = vunpack.i.h.bf16 %v5917_v6  ;;  %v5918_v12 = vunpack.i.l.bf16 %v5917_v6  ;;  %v5914_v14 = vunpack.i.h.bf16 %v5912_v9  ;;  %v5913_v15 = vunpack.i.l.bf16 %v5912_v9 }
 0x1b0   : > { %6196 = vrot.lane.b32.xlu1 %v6786_v18, %s6505_s16  ;;  %6191 = vrot.lane.b32.xlu0 %v6792_v19, %s6505_s16 }
 0x1b1   : > { %1862 = vst.msk [vmem:[#allocation2 + $0xdc] sm:$0xff] %vm1834_vm14, %v5913_v15  ;;  %1863 = vst.msk [vmem:[#allocation2 + $0xe4] sm:$0xff] %vm1834_vm14, %v5914_v14 }
 0x1b2   : > { %1864 = vst.msk [vmem:[#allocation2 + $0xec] sm:$0xff] %vm1834_vm14, %v5918_v12  ;;  %1865 = vst.msk [vmem:[#allocation2 + $0xf4] sm:$0xff] %vm1834_vm14, %v5919_v11  ;;  %v5927_v20 = vpop.permute.xlu1 %5926  ;;  %v5922_v22 = vpop.permute.xlu0 %5921 }
 0x1b3   : > { %v5929_v24 = vunpack.i.h.bf16 %v5927_v20  ;;  %v5928_v28 = vunpack.i.l.bf16 %v5927_v20  ;;  %v5924_v31 = vunpack.i.h.bf16 %v5922_v22  ;;  %v5923_v32 = vunpack.i.l.bf16 %v5922_v22 }
 0x1b4   : > { %6206 = vrot.lane.b32.xlu1 %v6842_v13, %s6505_s16  ;;  %6201 = vrot.lane.b32.xlu0 %v6866_v25, %s6505_s16 }
 0x1b5   : > { %1866 = vst.msk [vmem:[#allocation2 + $0xfc] sm:$0xff] %vm1834_vm14, %v5923_v32  ;;  %1867 = vst.msk [vmem:[#allocation2 + $0x104] sm:$0xff] %vm1834_vm14, %v5924_v31 }
 0x1b6   : > { %1868 = vst.msk [vmem:[#allocation2 + $0x10c] sm:$0xff] %vm1834_vm14, %v5928_v28  ;;  %1869 = vst.msk [vmem:[#allocation2 + $0x114] sm:$0xff] %vm1834_vm14, %v5929_v24  ;;  %v5937_v37 = vpop.permute.xlu1 %5936  ;;  %v5932_v41 = vpop.permute.xlu0 %5931 }
 0x1b7   : > { %v5939_v30 = vunpack.i.h.bf16 %v5937_v37  ;;  %v5938_v45 = vunpack.i.l.bf16 %v5937_v37  ;;  %v5934_v23 = vunpack.i.h.bf16 %v5932_v41  ;;  %v5933_v29 = vunpack.i.l.bf16 %v5932_v41  ;;  %v6487_v41 = vld [vmem:[%s8453_s2] sm:$0xff]  }
 0x1b8   : > { %6216 = vrot.lane.b32.xlu1 %v6902_v36, %s6505_s16  ;;  %6211 = vrot.lane.b32.xlu0 %v6908_v33, %s6505_s16 }
 0x1b9   : > { %1870 = vst.msk [vmem:[#allocation2 + $0x11c] sm:$0xff] %vm1834_vm14, %v5933_v29  ;;  %1871 = vst.msk [vmem:[#allocation2 + $0x124] sm:$0xff] %vm1834_vm14, %v5934_v23  ;;  %5105 = vmatprep.subr.bf16.mxu0 %v6487_v41  ;;  %5175 = vmatprep.subr.bf16.mxu1 %v6487_v41 }
 0x1ba   : > { %1872 = vst.msk [vmem:[#allocation2 + $0x12c] sm:$0xff] %vm1834_vm14, %v5938_v45  ;;  %1873 = vst.msk [vmem:[#allocation2 + $0x134] sm:$0xff] %vm1834_vm14, %v5939_v30  ;;  %v5947_v51 = vpop.permute.xlu1 %5946  ;;  %v5942_v52 = vpop.permute.xlu0 %5941  ;;  %5106 = vmatpush3.bf16.msra.mxu0 %v6487_v41  ;;  %5178 = vmatpush3.bf16.msra.mxu1 %v6487_v41 }
 0x1bb   : > { %v5949_v26 = vunpack.i.h.bf16 %v5947_v51  ;;  %v5948_v58 = vunpack.i.l.bf16 %v5947_v51  ;;  %v5944_v60 = vunpack.i.h.bf16 %v5942_v52  ;;  %v5943_v17 = vunpack.i.l.bf16 %v5942_v52 }
 0x1bc   : > { %6226 = vrot.lane.b32.xlu1 %v6921_v34, %s6505_s16  ;;  %6221 = vrot.lane.b32.xlu0 %v6927_v38, %s6505_s16 }
 0x1bd   : > { %1874 = vst.msk [vmem:[#allocation2 + $0x13c] sm:$0xff] %vm1834_vm14, %v5943_v17  ;;  %1875 = vst.msk [vmem:[#allocation2 + $0x144] sm:$0xff] %vm1834_vm14, %v5944_v60 }
 0x1be   : > { %1876 = vst.msk [vmem:[#allocation2 + $0x14c] sm:$0xff] %vm1834_vm14, %v5948_v58  ;;  %1877 = vst.msk [vmem:[#allocation2 + $0x154] sm:$0xff] %vm1834_vm14, %v5949_v26  ;;  %v5957_v6 = vpop.permute.xlu1 %5956  ;;  %v5952_v9 = vpop.permute.xlu0 %5951  ;;  %v6488_v26 = vld [vmem:[%s8453_s2 + $0x8] sm:$0xff]  }
 0x1bf   : > { %v5959_v10 = vunpack.i.h.bf16 %v5957_v6  ;;  %v5958_v11 = vunpack.i.l.bf16 %v5957_v6  ;;  %v5954_v12 = vunpack.i.h.bf16 %v5952_v9  ;;  %v5953_v14 = vunpack.i.l.bf16 %v5952_v9  ;;  %5107 = vmatprep.subr.bf16.mxu0 %v6488_v26  ;;  %5176 = vmatprep.subr.bf16.mxu1 %v6488_v26 }
 0x1c0   : > { %6236 = vrot.lane.b32.xlu1 %v6937_v39, %s6505_s16  ;;  %6231 = vrot.lane.b32.xlu0 %v6943_v43, %s6505_s16 }
 0x1c1   : > { %1878 = vst.msk [vmem:[#allocation2 + $0x15c] sm:$0xff] %vm1834_vm14, %v5953_v14  ;;  %1879 = vst.msk [vmem:[#allocation2 + $0x164] sm:$0xff] %vm1834_vm14, %v5954_v12  ;;  %5108 = vmatpush3.bf16.msra.mxu0 %v6488_v26  ;;  %5179 = vmatpush3.bf16.msra.mxu1 %v6488_v26 }
 0x1c2   : > { %1880 = vst.msk [vmem:[#allocation2 + $0x16c] sm:$0xff] %vm1834_vm14, %v5958_v11  ;;  %1881 = vst.msk [vmem:[#allocation2 + $0x174] sm:$0xff] %vm1834_vm14, %v5959_v10  ;;  %v5967_v15 = vpop.permute.xlu1 %5966  ;;  %v5962_v20 = vpop.permute.xlu0 %5961  ;;  %v6489_v11 = vld [vmem:[%s8453_s2 + $0x10] ss:$0 sps:$4 sm:$0x33]  }
 0x1c3   : > { %v5969_v22 = vunpack.i.h.bf16 %v5967_v15  ;;  %v5968_v24 = vunpack.i.l.bf16 %v5967_v15  ;;  %v5964_v28 = vunpack.i.h.bf16 %v5962_v20  ;;  %v5963_v31 = vunpack.i.l.bf16 %v5962_v20  ;;  %5181 = vmatprep.subr.msk.bf16.mxu0 %vm2913_vm0, %v6489_v11  ;;  %5182 = vmatprep.subr.msk.bf16.mxu1 %vm2913_vm0, %v6489_v11 }
 0x1c4   : > { %6246 = vrot.lane.b32.xlu1 %v6953_v46, %s6505_s16  ;;  %6241 = vrot.lane.b32.xlu0 %v6959_v47, %s6505_s16 }
 0x1c5   : > { %1882 = vst.msk [vmem:[#allocation2 + $0x17c] sm:$0xff] %vm1834_vm14, %v5963_v31  ;;  %1883 = vst.msk [vmem:[#allocation2 + $0x184] sm:$0xff] %vm1834_vm14, %v5964_v28 }
 0x1c6   : > { %1884 = vst.msk [vmem:[#allocation2 + $0x18c] sm:$0xff] %vm1834_vm14, %v5968_v24  ;;  %1885 = vst.msk [vmem:[#allocation2 + $0x194] sm:$0xff] %vm1834_vm14, %v5969_v22  ;;  %v5977_v32 = vpop.permute.xlu1 %5976  ;;  %v5972_v37 = vpop.permute.xlu0 %5971  ;;  %v2915_v22 = vsel %vm2913_vm0, %v6489_v11, 0 }
 0x1c7   : > { %v5979_v30 = vunpack.i.h.bf16 %v5977_v32  ;;  %v5978_v45 = vunpack.i.l.bf16 %v5977_v32  ;;  %v5974_v23 = vunpack.i.h.bf16 %v5972_v37  ;;  %v5973_v29 = vunpack.i.l.bf16 %v5972_v37  ;;  %5110 = vmatpush3.bf16.msra.mxu0 %v2915_v22  ;;  %5180 = vmatpush3.bf16.msra.mxu1 %v2915_v22 }
 0x1c8   : > { %6256 = vrot.lane.b32.xlu1 %v6969_v48, %s6505_s16  ;;  %6251 = vrot.lane.b32.xlu0 %v6975_v50, %s6505_s16 }
 0x1c9   : > { %1886 = vst.msk [vmem:[#allocation2 + $0x19c] sm:$0xff] %vm1834_vm14, %v5973_v29  ;;  %1887 = vst.msk [vmem:[#allocation2 + $0x1a4] sm:$0xff] %vm1834_vm14, %v5974_v23 }
 0x1ca   : > { %1888 = vst.msk [vmem:[#allocation2 + $0x1ac] sm:$0xff] %vm1834_vm14, %v5978_v45  ;;  %1889 = vst.msk [vmem:[#allocation2 + $0x1b4] sm:$0xff] %vm1834_vm14, %v5979_v30  ;;  %v5987_v51 = vpop.permute.xlu1 %5986  ;;  %v5982_v52 = vpop.permute.xlu0 %5981 }
 0x1cb   : > { %v5989_v58 = vunpack.i.h.bf16 %v5987_v51  ;;  %v5988_v60 = vunpack.i.l.bf16 %v5987_v51  ;;  %v5984_v17 = vunpack.i.h.bf16 %v5982_v52  ;;  %v5983_v6 = vunpack.i.l.bf16 %v5982_v52 }
 0x1cc   : > { %6266 = vrot.lane.b32.xlu1 %v6985_v53, %s6505_s16  ;;  %6261 = vrot.lane.b32.xlu0 %v6991_v55, %s6505_s16 }
 0x1cd   : > { %1890 = vst.msk [vmem:[#allocation2 + $0x1bc] sm:$0xff] %vm1834_vm14, %v5983_v6  ;;  %1891 = vst.msk [vmem:[#allocation2 + $0x1c4] sm:$0xff] %vm1834_vm14, %v5984_v17 }
 0x1ce   : > { %1892 = vst.msk [vmem:[#allocation2 + $0x1cc] sm:$0xff] %vm1834_vm14, %v5988_v60  ;;  %1893 = vst.msk [vmem:[#allocation2 + $0x1d4] sm:$0xff] %vm1834_vm14, %v5989_v58  ;;  %v5997_v9 = vpop.permute.xlu1 %5996  ;;  %v5992_v10 = vpop.permute.xlu0 %5991 }
 0x1cf   : > { %v5999_v12 = vunpack.i.h.bf16 %v5997_v9  ;;  %v5998_v14 = vunpack.i.l.bf16 %v5997_v9  ;;  %v5994_v15 = vunpack.i.h.bf16 %v5992_v10  ;;  %v5993_v20 = vunpack.i.l.bf16 %v5992_v10 }
 0x1d0   : > { %6276 = vrot.lane.b32.xlu1 %v6575_v16, %s6507_s26  ;;  %6271 = vrot.lane.b32.xlu0 %v7008_v59, %s6505_s16 }
 0x1d1   : > { %1894 = vst.msk [vmem:[#allocation2 + $0x1dc] sm:$0xff] %vm1834_vm14, %v5993_v20  ;;  %1895 = vst.msk [vmem:[#allocation2 + $0x1e4] sm:$0xff] %vm1834_vm14, %v5994_v15 }
 0x1d2   : > { %1905 = vst.msk [vmem:[#allocation2 + $0x1ec] sm:$0xff] %vm1834_vm14, %v5998_v14  ;;  %1906 = vst.msk [vmem:[#allocation2 + $0x1f4] sm:$0xff] %vm1834_vm14, %v5999_v12  ;;  %v6002_v24 = vpop.permute.xlu1 %6001  ;;  %v1901_v16 = vpop.permute.xlu0 %1900 }
 0x1d3   : > { %v6004_v28 = vunpack.i.h.bf16 %v6002_v24  ;;  %v6003_v31 = vunpack.i.l.bf16 %v6002_v24  ;;  %1908 = vst.msk [vmem:[#allocation2 + $0x1fc] sm:$0xf] %vm1907_vm15, %v1901_v16 }
 0x1d4   : > { %6286 = vrot.lane.b32.xlu1 %v6650_v44, %s6507_s26  ;;  %6281 = vrot.lane.b32.xlu0 %v6586_v21, %s6507_s26 }
 0x1d5   : > { %2090 = vst.msk [vmem:[#allocation2 - $0x4] sm:$0xf0] %vm2089_vm1, %v6003_v31 }
 0x1d6   : > { %2092 = vst.msk [vmem:[#allocation2 + $0x4] sm:$0xff] %vm2091_vm2, %v6004_v28  ;;  %v6012_v32 = vpop.permute.xlu1 %6011  ;;  %v6007_v37 = vpop.permute.xlu0 %6006 }
 0x1d7   : > { %v6014_v41 = vunpack.i.h.bf16 %v6012_v32  ;;  %v6013_v30 = vunpack.i.l.bf16 %v6012_v32  ;;  %v6009_v45 = vunpack.i.h.bf16 %v6007_v37  ;;  %v6008_v23 = vunpack.i.l.bf16 %v6007_v37 }
 0x1d8   : > { %6291 = vrot.lane.b32.xlu0 %v6632_v40, %s6507_s26  ;;  %6296 = vrot.lane.b32.xlu1 %v6717_v62, %s6507_s26 }
 0x1d9   : > { %2095 = vst.msk [vmem:[#allocation2 + $0x1c] sm:$0xff] %vm2091_vm2, %v6013_v30  ;;  %2096 = vst.msk [vmem:[#allocation2 + $0x24] sm:$0xff] %vm2091_vm2, %v6014_v41 }
 0x1da   : > { %2093 = vst.msk [vmem:[#allocation2 + $0xc] sm:$0xff] %vm2091_vm2, %v6008_v23  ;;  %2094 = vst.msk [vmem:[#allocation2 + $0x14] sm:$0xff] %vm2091_vm2, %v6009_v45  ;;  %v6022_v21 = vpop.permute.xlu1 %6021  ;;  %v6017_v44 = vpop.permute.xlu0 %6016 }
 0x1db   : > { %v6024_v29 = vunpack.i.h.bf16 %v6022_v21  ;;  %v6023_v51 = vunpack.i.l.bf16 %v6022_v21  ;;  %v6019_v52 = vunpack.i.h.bf16 %v6017_v44  ;;  %v6018_v26 = vunpack.i.l.bf16 %v6017_v44 }
 0x1dc   : > { %6301 = vrot.lane.b32.xlu0 %v6696_v57, %s6507_s26  ;;  %6306 = vrot.lane.b32.xlu1 %v6792_v19, %s6507_s26 }
 0x1dd   : > { %2099 = vst.msk [vmem:[#allocation2 + $0x3c] sm:$0xff] %vm2091_vm2, %v6023_v51  ;;  %2100 = vst.msk [vmem:[#allocation2 + $0x44] sm:$0xff] %vm2091_vm2, %v6024_v29 }
 0x1de   : > { %2097 = vst.msk [vmem:[#allocation2 + $0x2c] sm:$0xff] %vm2091_vm2, %v6018_v26  ;;  %2098 = vst.msk [vmem:[#allocation2 + $0x34] sm:$0xff] %vm2091_vm2, %v6019_v52  ;;  %v6032_v40 = vpop.permute.xlu1 %6031  ;;  %v6027_v62 = vpop.permute.xlu0 %6026 }
 0x1df   : > { %v6034_v58 = vunpack.i.h.bf16 %v6032_v40  ;;  %v6033_v60 = vunpack.i.l.bf16 %v6032_v40  ;;  %v6029_v17 = vunpack.i.h.bf16 %v6027_v62  ;;  %v6028_v6 = vunpack.i.l.bf16 %v6027_v62 }
 0x1e0   : > { %6311 = vrot.lane.b32.xlu0 %v6786_v18, %s6507_s26  ;;  %6316 = vrot.lane.b32.xlu1 %v6866_v25, %s6507_s26 }
 0x1e1   : > { %2103 = vst.msk [vmem:[#allocation2 + $0x5c] sm:$0xff] %vm2091_vm2, %v6033_v60  ;;  %2104 = vst.msk [vmem:[#allocation2 + $0x64] sm:$0xff] %vm2091_vm2, %v6034_v58 }
 0x1e2   : > { %2101 = vst.msk [vmem:[#allocation2 + $0x4c] sm:$0xff] %vm2091_vm2, %v6028_v6  ;;  %2102 = vst.msk [vmem:[#allocation2 + $0x54] sm:$0xff] %vm2091_vm2, %v6029_v17  ;;  %v6042_v57 = vpop.permute.xlu1 %6041  ;;  %v6037_v19 = vpop.permute.xlu0 %6036 }
 0x1e3   : > { %v6044_v9 = vunpack.i.h.bf16 %v6042_v57  ;;  %v6043_v10 = vunpack.i.l.bf16 %v6042_v57  ;;  %v6039_v11 = vunpack.i.h.bf16 %v6037_v19  ;;  %v6038_v12 = vunpack.i.l.bf16 %v6037_v19 }
 0x1e4   : > { %6321 = vrot.lane.b32.xlu0 %v6842_v13, %s6507_s26  ;;  %6326 = vrot.lane.b32.xlu1 %v6908_v33, %s6507_s26 }
 0x1e5   : > { %2107 = vst.msk [vmem:[#allocation2 + $0x7c] sm:$0xff] %vm2091_vm2, %v6043_v10  ;;  %2108 = vst.msk [vmem:[#allocation2 + $0x84] sm:$0xff] %vm2091_vm2, %v6044_v9 }
 0x1e6   : > { %2105 = vst.msk [vmem:[#allocation2 + $0x6c] sm:$0xff] %vm2091_vm2, %v6038_v12  ;;  %2106 = vst.msk [vmem:[#allocation2 + $0x74] sm:$0xff] %vm2091_vm2, %v6039_v11  ;;  %v6052_v18 = vpop.permute.xlu1 %6051  ;;  %v6047_v25 = vpop.permute.xlu0 %6046 }
 0x1e7   : > { %v6054_v14 = vunpack.i.h.bf16 %v6052_v18  ;;  %v6053_v15 = vunpack.i.l.bf16 %v6052_v18  ;;  %v6049_v20 = vunpack.i.h.bf16 %v6047_v25  ;;  %v6048_v22 = vunpack.i.l.bf16 %v6047_v25 }
 0x1e8   : > { %6331 = vrot.lane.b32.xlu0 %v6902_v36, %s6507_s26  ;;  %6336 = vrot.lane.b32.xlu1 %v6927_v38, %s6507_s26 }
 0x1e9   : > { %2111 = vst.msk [vmem:[#allocation2 + $0x9c] sm:$0xff] %vm2091_vm2, %v6053_v15  ;;  %2112 = vst.msk [vmem:[#allocation2 + $0xa4] sm:$0xff] %vm2091_vm2, %v6054_v14 }
 0x1ea   : > { %2109 = vst.msk [vmem:[#allocation2 + $0x8c] sm:$0xff] %vm2091_vm2, %v6048_v22  ;;  %2110 = vst.msk [vmem:[#allocation2 + $0x94] sm:$0xff] %vm2091_vm2, %v6049_v20  ;;  %v6062_v13 = vpop.permute.xlu1 %6061  ;;  %v6057_v33 = vpop.permute.xlu0 %6056 }
 0x1eb   : > { %v6064_v24 = vunpack.i.h.bf16 %v6062_v13  ;;  %v6063_v16 = vunpack.i.l.bf16 %v6062_v13  ;;  %v6059_v28 = vunpack.i.h.bf16 %v6057_v33  ;;  %v6058_v31 = vunpack.i.l.bf16 %v6057_v33 }
 0x1ec   : > { %6341 = vrot.lane.b32.xlu0 %v6921_v34, %s6507_s26  ;;  %6346 = vrot.lane.b32.xlu1 %v6943_v43, %s6507_s26 }
 0x1ed   : > { %2115 = vst.msk [vmem:[#allocation2 + $0xbc] sm:$0xff] %vm2091_vm2, %v6063_v16  ;;  %2116 = vst.msk [vmem:[#allocation2 + $0xc4] sm:$0xff] %vm2091_vm2, %v6064_v24 }
 0x1ee   : > { %2113 = vst.msk [vmem:[#allocation2 + $0xac] sm:$0xff] %vm2091_vm2, %v6058_v31  ;;  %2114 = vst.msk [vmem:[#allocation2 + $0xb4] sm:$0xff] %vm2091_vm2, %v6059_v28  ;;  %v6072_v36 = vpop.permute.xlu1 %6071  ;;  %v6067_v38 = vpop.permute.xlu0 %6066 }
 0x1ef   : > { %v6074_v32 = vunpack.i.h.bf16 %v6072_v36  ;;  %v6073_v37 = vunpack.i.l.bf16 %v6072_v36  ;;  %v6069_v41 = vunpack.i.h.bf16 %v6067_v38  ;;  %v6068_v30 = vunpack.i.l.bf16 %v6067_v38 }
 0x1f0   : > { %6351 = vrot.lane.b32.xlu0 %v6937_v39, %s6507_s26  ;;  %6356 = vrot.lane.b32.xlu1 %v6959_v47, %s6507_s26 }
 0x1f1   : > { %2119 = vst.msk [vmem:[#allocation2 + $0xdc] sm:$0xff] %vm2091_vm2, %v6073_v37  ;;  %2120 = vst.msk [vmem:[#allocation2 + $0xe4] sm:$0xff] %vm2091_vm2, %v6074_v32 }
 0x1f2   : > { %2117 = vst.msk [vmem:[#allocation2 + $0xcc] sm:$0xff] %vm2091_vm2, %v6068_v30  ;;  %2118 = vst.msk [vmem:[#allocation2 + $0xd4] sm:$0xff] %vm2091_vm2, %v6069_v41  ;;  %v6082_v34 = vpop.permute.xlu1 %6081  ;;  %v6077_v43 = vpop.permute.xlu0 %6076 }
 0x1f3   : > { %v6084_v45 = vunpack.i.h.bf16 %v6082_v34  ;;  %v6083_v23 = vunpack.i.l.bf16 %v6082_v34  ;;  %v6079_v21 = vunpack.i.h.bf16 %v6077_v43  ;;  %v6078_v44 = vunpack.i.l.bf16 %v6077_v43 }
 0x1f4   : > { %6361 = vrot.lane.b32.xlu0 %v6953_v46, %s6507_s26  ;;  %6366 = vrot.lane.b32.xlu1 %v6975_v50, %s6507_s26 }
 0x1f5   : > { %2123 = vst.msk [vmem:[#allocation2 + $0xfc] sm:$0xff] %vm2091_vm2, %v6083_v23  ;;  %2124 = vst.msk [vmem:[#allocation2 + $0x104] sm:$0xff] %vm2091_vm2, %v6084_v45 }
 0x1f6   : > { %2121 = vst.msk [vmem:[#allocation2 + $0xec] sm:$0xff] %vm2091_vm2, %v6078_v44  ;;  %2122 = vst.msk [vmem:[#allocation2 + $0xf4] sm:$0xff] %vm2091_vm2, %v6079_v21  ;;  %v6092_v39 = vpop.permute.xlu1 %6091  ;;  %v6087_v47 = vpop.permute.xlu0 %6086 }
 0x1f7   : > { %v6094_v29 = vunpack.i.h.bf16 %v6092_v39  ;;  %v6093_v51 = vunpack.i.l.bf16 %v6092_v39  ;;  %v6089_v52 = vunpack.i.h.bf16 %v6087_v47  ;;  %v6088_v26 = vunpack.i.l.bf16 %v6087_v47 }
 0x1f8   : > { %6371 = vrot.lane.b32.xlu0 %v6969_v48, %s6507_s26  ;;  %6376 = vrot.lane.b32.xlu1 %v6991_v55, %s6507_s26 }
 0x1f9   : > { %2127 = vst.msk [vmem:[#allocation2 + $0x11c] sm:$0xff] %vm2091_vm2, %v6093_v51  ;;  %2128 = vst.msk [vmem:[#allocation2 + $0x124] sm:$0xff] %vm2091_vm2, %v6094_v29  ;;  %v4849_v51 = vld [vmem:[%s7925_s30] sm:$0xff]  }
 0x1fa   : > { %2125 = vst.msk [vmem:[#allocation2 + $0x10c] sm:$0xff] %vm2091_vm2, %v6088_v26  ;;  %2126 = vst.msk [vmem:[#allocation2 + $0x114] sm:$0xff] %vm2091_vm2, %v6089_v52  ;;  %v6102_v46 = vpop.permute.xlu1 %6101  ;;  %v6097_v50 = vpop.permute.xlu0 %6096 }
 0x1fb   : > { %v6104_v40 = vunpack.i.h.bf16 %v6102_v46  ;;  %v6103_v62 = vunpack.i.l.bf16 %v6102_v46  ;;  %v6099_v58 = vunpack.i.h.bf16 %v6097_v50  ;;  %v6098_v60 = vunpack.i.l.bf16 %v6097_v50 }
 0x1fc   : > { %6386 = vrot.lane.b32.xlu1 %v7008_v59, %s6507_s26  ;;  %6381 = vrot.lane.b32.xlu0 %v6985_v53, %s6507_s26 }
 0x1fd   : > { %2131 = vst.msk [vmem:[#allocation2 + $0x13c] sm:$0xff] %vm2091_vm2, %v6103_v62  ;;  %2132 = vst.msk [vmem:[#allocation2 + $0x144] sm:$0xff] %vm2091_vm2, %v6104_v40 }
 0x1fe   : > { %2129 = vst.msk [vmem:[#allocation2 + $0x12c] sm:$0xff] %vm2091_vm2, %v6098_v60  ;;  %2130 = vst.msk [vmem:[#allocation2 + $0x134] sm:$0xff] %vm2091_vm2, %v6099_v58  ;;  %v6112_v48 = vpop.permute.xlu1 %6111  ;;  %v6107_v55 = vpop.permute.xlu0 %6106  ;;  %v4850_v58 = vunpack.c.l.bf16 %v4849_v51  ;;  %v4851_v60 = vunpack.c.h.bf16 %v4849_v51 }
 0x1ff   : > { %v6114_v17 = vunpack.i.h.bf16 %v6112_v48  ;;  %v6113_v6 = vunpack.i.l.bf16 %v6112_v48  ;;  %v6109_v57 = vunpack.i.h.bf16 %v6107_v55  ;;  %v6108_v19 = vunpack.i.l.bf16 %v6107_v55 }
 0x200   : > { %6396 = vrot.lane.b32.xlu1 %v7018_v63, %s6505_s16  ;;  %6391 = vrot.lane.b32.xlu0 %v7002_v56, %s6505_s16 }
 0x201   : > { %2135 = vst.msk [vmem:[#allocation2 + $0x15c] sm:$0xff] %vm2091_vm2, %v6113_v6  ;;  %2136 = vst.msk [vmem:[#allocation2 + $0x164] sm:$0xff] %vm2091_vm2, %v6114_v17  ;;  %v5040_v17 = vld [vmem:[%s7925_s30 + $0x10] sm:$0xff]  }
 0x202   : > { %2133 = vst.msk [vmem:[#allocation2 + $0x14c] sm:$0xff] %vm2091_vm2, %v6108_v19  ;;  %2134 = vst.msk [vmem:[#allocation2 + $0x154] sm:$0xff] %vm2091_vm2, %v6109_v57  ;;  %v6122_v53 = vpop.permute.xlu1 %6121  ;;  %v6117_v59 = vpop.permute.xlu0 %6116 }
 0x203   : > { %v6124_v9 = vunpack.i.h.bf16 %v6122_v53  ;;  %v6123_v10 = vunpack.i.l.bf16 %v6122_v53  ;;  %v6119_v11 = vunpack.i.h.bf16 %v6117_v59  ;;  %v6118_v12 = vunpack.i.l.bf16 %v6117_v59 }
 0x204   : > { %6406 = vrot.lane.b32.xlu1 %v7018_v63, %s6507_s26  ;;  %6401 = vrot.lane.b32.xlu0 %v7002_v56, %s6507_s26 }
 0x205   : > { %2139 = vst.msk [vmem:[#allocation2 + $0x17c] sm:$0xff] %vm2091_vm2, %v6123_v10  ;;  %2140 = vst.msk [vmem:[#allocation2 + $0x184] sm:$0xff] %vm2091_vm2, %v6124_v9 }
 0x206   : > { %2137 = vst.msk [vmem:[#allocation2 + $0x16c] sm:$0xff] %vm2091_vm2, %v6118_v12  ;;  %2138 = vst.msk [vmem:[#allocation2 + $0x174] sm:$0xff] %vm2091_vm2, %v6119_v11  ;;  %v6132_v18 = vpop.permute.xlu1 %6131  ;;  %v6127_v25 = vpop.permute.xlu0 %6126  ;;  %v4858_v11 = vunpack.c.l.bf16 %v5040_v17  ;;  %v5041_v12 = vld [vmem:[%s7925_s30 + $0x18] sm:$0xff]  }
 0x207   : > { %v6134_v14 = vunpack.i.h.bf16 %v6132_v18  ;;  %v6133_v15 = vunpack.i.l.bf16 %v6132_v18  ;;  %v6129_v20 = vunpack.i.h.bf16 %v6127_v25  ;;  %v6128_v22 = vunpack.i.l.bf16 %v6127_v25 }
 0x208   : > { %6416 = vrot.lane.b32.xlu1 %v7026_v1, %s6505_s16  ;;  %6411 = vrot.lane.b32.xlu0 %v7016_v61, %s6505_s16 }
 0x209   : > { %2143 = vst.msk [vmem:[#allocation2 + $0x19c] sm:$0xff] %vm2091_vm2, %v6133_v15  ;;  %2144 = vst.msk [vmem:[#allocation2 + $0x1a4] sm:$0xff] %vm2091_vm2, %v6134_v14 }
 0x20a   : > { %2141 = vst.msk [vmem:[#allocation2 + $0x18c] sm:$0xff] %vm2091_vm2, %v6128_v22  ;;  %2142 = vst.msk [vmem:[#allocation2 + $0x194] sm:$0xff] %vm2091_vm2, %v6129_v20  ;;  %v6142_v56 = vpop.permute.xlu1 %6141  ;;  %v6137_v63 = vpop.permute.xlu0 %6136 }
 0x20b   : > { %v6144_v13 = vunpack.i.h.bf16 %v6142_v56  ;;  %v6143_v33 = vunpack.i.l.bf16 %v6142_v56  ;;  %v6139_v24 = vunpack.i.h.bf16 %v6137_v63  ;;  %v6138_v16 = vunpack.i.l.bf16 %v6137_v63 }
 0x20c   : > { %6426 = vrot.lane.b32.xlu1 %v7026_v1, %s6507_s26  ;;  %6421 = vrot.lane.b32.xlu0 %v7016_v61, %s6507_s26  ;;  %v4859_v56 = vunpack.c.h.bf16 %v5040_v17  ;;  %v4862_v63 = vunpack.c.l.bf16 %v5041_v12 }
 0x20d   : > { %2147 = vst.msk [vmem:[#allocation2 + $0x1bc] sm:$0xff] %vm2091_vm2, %v6143_v33  ;;  %2148 = vst.msk [vmem:[#allocation2 + $0x1c4] sm:$0xff] %vm2091_vm2, %v6144_v13  ;;  %v5042_v13 = vld [vmem:[%s7925_s30 + $0x20] sm:$0xff]  }
 0x20e   : > { %2145 = vst.msk [vmem:[#allocation2 + $0x1ac] sm:$0xff] %vm2091_vm2, %v6138_v16  ;;  %2146 = vst.msk [vmem:[#allocation2 + $0x1b4] sm:$0xff] %vm2091_vm2, %v6139_v24  ;;  %v6152_v28 = vpop.permute.xlu1 %6151  ;;  %v6147_v31 = vpop.permute.xlu0 %6146 }
 0x20f   : > { %v6154_v36 = vunpack.i.h.bf16 %v6152_v28  ;;  %v6153_v38 = vunpack.i.l.bf16 %v6152_v28  ;;  %v6149_v32 = vunpack.i.h.bf16 %v6147_v31  ;;  %v6148_v37 = vunpack.i.l.bf16 %v6147_v31 }
 0x210   : > { %6436 = vrot.lane.b32.xlu1 %v7039_v3, %s6505_s16  ;;  %6431 = vrot.lane.b32.xlu0 %v7024_v0, %s6505_s16 }
 0x211   : > { %2168 = vst.msk [vmem:[#allocation2 + $0x1dc] sm:$0xff] %vm2091_vm2, %v6153_v38  ;;  %2169 = vst.msk [vmem:[#allocation2 + $0x1e4] sm:$0xff] %vm2091_vm2, %v6154_v36  ;;  %v4863_v38 = vunpack.c.h.bf16 %v5041_v12 }
 0x212   : > { %2149 = vst.msk [vmem:[#allocation2 + $0x1cc] sm:$0xff] %vm2091_vm2, %v6148_v37  ;;  %2150 = vst.msk [vmem:[#allocation2 + $0x1d4] sm:$0xff] %vm2091_vm2, %v6149_v32  ;;  %v2162_v61 = vpop.permute.xlu1 %2161  ;;  %v6157_v1 = vpop.permute.xlu0 %6156  ;;  %v4866_v32 = vunpack.c.l.bf16 %v5042_v13  ;;  %v5043_v37 = vld [vmem:[%s7925_s30 + $0x28] sm:$0xff]  }
 0x213   : > { %2173 = vst.msk [vmem:[#allocation2 + $0x1fc] sm:$0xf] %vm2172_vm3, %v2162_v61  ;;  %v6159_v41 = vunpack.i.h.bf16 %v6157_v1  ;;  %v6158_v30 = vunpack.i.l.bf16 %v6157_v1 }
 0x214   : > { %6446 = vrot.lane.b32.xlu1 %v7039_v3, %s6507_s26  ;;  %6441 = vrot.lane.b32.xlu0 %v7024_v0, %s6507_s26 }
 0x215   : > { %2170 = vst.msk [vmem:[#allocation2 + $0x1ec] sm:$0xff] %vm2091_vm2, %v6158_v30  ;;  %2171 = vst.msk [vmem:[#allocation2 + $0x1f4] sm:$0xff] %vm2091_vm2, %v6159_v41 }
 0x216   : > { %v6167_v34 = vpop.permute.xlu1 %6166  ;;  %v6162_v43 = vpop.permute.xlu0 %6161 }
 0x217   : > { %v6169_v45 = vunpack.i.h.bf16 %v6167_v34  ;;  %v6168_v23 = vunpack.i.l.bf16 %v6167_v34  ;;  %v6164_v21 = vunpack.i.h.bf16 %v6162_v43  ;;  %v6163_v44 = vunpack.i.l.bf16 %v6162_v43 }
 0x218   : > { %6456 = vrot.lane.b32.xlu1 %v7251_v42, %s6505_s16  ;;  %6451 = vrot.lane.b32.xlu0 %v7037_v2, %s6505_s16 }
 0x219   : > { %2358 = vst.msk [vmem:[#allocation2 + $0xb] sm:$0xff] %vm2356_vm4, %v6168_v23  ;;  %2359 = vst.msk [vmem:[#allocation2 + $0x13] sm:$0xff] %vm2356_vm4, %v6169_v45  ;;  %v4867_v45 = vunpack.c.h.bf16 %v5042_v13  ;;  %v4870_v23 = vunpack.c.l.bf16 %v5043_v37 }
 0x21a   : > { %2355 = vst.msk [vmem:[#allocation2 - $0x5] sm:$0xe0] %vm2354_vm5, %v6163_v44  ;;  %v6177_v0 = vpop.permute.xlu1 %6176  ;;  %v6172_v3 = vpop.permute.xlu0 %6171 }
 0x21b   : > { %2357 = vst.msk [vmem:[#allocation2 + $0x3] sm:$0xff] %vm2356_vm4, %v6164_v21  ;;  %v6179_v42 = vunpack.i.h.bf16 %v6177_v0  ;;  %v6178_v39 = vunpack.i.l.bf16 %v6177_v0  ;;  %v6174_v47 = vunpack.i.h.bf16 %v6172_v3  ;;  %v6173_v29 = vunpack.i.l.bf16 %v6172_v3  ;;  %v5044_v21 = vld [vmem:[%s7925_s30 + $0x30] sm:$0xff]  }
 0x21c   : > { %2679 = vrot.lane.b32.xlu1 %v7049_v5, %s6507_s26  ;;  %6461 = vrot.lane.b32.xlu0 %v7037_v2, %s6507_s26  ;;  %v6475_v2 = vpack.i.bf16 %v7652_v7, %v4687_v49  ;;  %v6470_v5 = vpack.i.bf16 %v7262_v54, %v4683_v27  ;;  %v6481_v54 = vpack.i.bf16 %v4851_v60, %v4850_v58  ;;  %v4874_v51 = vunpack.c.l.bf16 %v5044_v21  ;;  %v5046_v60 = vld [vmem:[%s7925_s30 + $0x40] sm:$0xff]  }
 0x21d   : > { %2362 = vst.msk [vmem:[#allocation2 + $0x2b] sm:$0xff] %vm2356_vm4, %v6178_v39  ;;  %2363 = vst.msk [vmem:[#allocation2 + $0x33] sm:$0xff] %vm2356_vm4, %v6179_v42 }
 0x21e   : > { %2360 = vst.msk [vmem:[#allocation2 + $0x1b] sm:$0xff] %vm2356_vm4, %v6173_v29  ;;  %2361 = vst.msk [vmem:[#allocation2 + $0x23] sm:$0xff] %vm2356_vm4, %v6174_v47  ;;  %v6187_v52 = vpop.permute.xlu1 %6186  ;;  %v6182_v26 = vpop.permute.xlu0 %6181  ;;  %v4871_v29 = vunpack.c.h.bf16 %v5043_v37 }
 0x21f   : > { %v6189_v46 = vunpack.i.h.bf16 %v6187_v52  ;;  %v6188_v50 = vunpack.i.l.bf16 %v6187_v52  ;;  %v6184_v40 = vunpack.i.h.bf16 %v6182_v26  ;;  %v6183_v62 = vunpack.i.l.bf16 %v6182_v26  ;;  %v5045_v52 = vld [vmem:[%s7925_s30 + $0x38] sm:$0xff]  }
 0x220   : > { %2424 = vrot.lane.b32.xlu1 %v7652_v7, %s6505_s16  ;;  %6466 = vrot.lane.b32.xlu0 %v7657_v8, %s6505_s16  ;;  %v5039_v8 = vld [vmem:[%s7925_s30 + $0x8] sm:$0xff]   ;;  %v4878_v58 = vunpack.c.l.bf16 %v5045_v52 }
 0x221   : > { %2366 = vst.msk [vmem:[#allocation2 + $0x4b] sm:$0xff] %vm2356_vm4, %v6188_v50  ;;  %2367 = vst.msk [vmem:[#allocation2 + $0x53] sm:$0xff] %vm2356_vm4, %v6189_v46  ;;  %v4854_v27 = vunpack.c.l.bf16 %v5039_v8  ;;  %v4855_v10 = vunpack.c.h.bf16 %v5039_v8 }
 0x222   : > { %2364 = vst.msk [vmem:[#allocation2 + $0x3b] sm:$0xff] %vm2356_vm4, %v6183_v62  ;;  %2365 = vst.msk [vmem:[#allocation2 + $0x43] sm:$0xff] %vm2356_vm4, %v6184_v40  ;;  %v6197_v48 = vpop.permute.xlu1 %6196  ;;  %v6192_v35 = vpop.permute.xlu0 %6191 }
 0x223   : > { %v6199_v55 = vunpack.i.h.bf16 %v6197_v48  ;;  %v6198_v49 = vunpack.i.l.bf16 %v6197_v48  ;;  %v6194_v7 = vunpack.i.h.bf16 %v6192_v35  ;;  %v6193_v4 = vunpack.i.l.bf16 %v6192_v35 }
 0x224   : > { %6476 = vrot.lane.b32.xlu1 %v6475_v2, %s6507_s26  ;;  %6471 = vrot.lane.b32.xlu0 %v6470_v5, %s6507_s26  ;;  %v4875_v5 = vunpack.c.h.bf16 %v5044_v21 }
 0x225   : > { %2370 = vst.msk [vmem:[#allocation2 + $0x6b] sm:$0xff] %vm2356_vm4, %v6198_v49  ;;  %2371 = vst.msk [vmem:[#allocation2 + $0x73] sm:$0xff] %vm2356_vm4, %v6199_v55 }
 0x226   : > { %2368 = vst.msk [vmem:[#allocation2 + $0x5b] sm:$0xff] %vm2356_vm4, %v6193_v4  ;;  %2369 = vst.msk [vmem:[#allocation2 + $0x63] sm:$0xff] %vm2356_vm4, %v6194_v7  ;;  %v6207_v6 = vpop.permute.xlu1 %6206  ;;  %v6202_v57 = vpop.permute.xlu0 %6201  ;;  %v4879_v4 = vunpack.c.h.bf16 %v5045_v52 }
 0x227   : > { %v6209_v19 = vunpack.i.h.bf16 %v6207_v6  ;;  %v6208_v53 = vunpack.i.l.bf16 %v6207_v6  ;;  %v6204_v59 = vunpack.i.h.bf16 %v6202_v57  ;;  %v6203_v9 = vunpack.i.l.bf16 %v6202_v57 }
 0x228   : > { %3666 = vperm.xlu1 %6486, %v4854_v27   ;;  %6482 = vperm.xlu0 %6480, %v6481_v54   ;;  %v4882_v27 = vunpack.c.l.bf16 %v5046_v60  ;;  %v5047_v54 = vld [vmem:[%s7925_s30 + $0x48] sm:$0xff]  }
 0x229   : > { %2374 = vst.msk [vmem:[#allocation2 + $0x8b] sm:$0xff] %vm2356_vm4, %v6208_v53  ;;  %2375 = vst.msk [vmem:[#allocation2 + $0x93] sm:$0xff] %vm2356_vm4, %v6209_v19 }
 0x22a   : > { %2372 = vst.msk [vmem:[#allocation2 + $0x7b] sm:$0xff] %vm2356_vm4, %v6203_v9  ;;  %2373 = vst.msk [vmem:[#allocation2 + $0x83] sm:$0xff] %vm2356_vm4, %v6204_v59  ;;  %v6217_v18 = vpop.permute.xlu1 %6216  ;;  %v6212_v25 = vpop.permute.xlu0 %6211  ;;  %v4883_v9 = vunpack.c.h.bf16 %v5046_v60 }
 0x22b   : > { %v6219_v14 = vunpack.i.h.bf16 %v6217_v18  ;;  %v6218_v15 = vunpack.i.l.bf16 %v6217_v18  ;;  %v6214_v20 = vunpack.i.h.bf16 %v6212_v25  ;;  %v6213_v22 = vunpack.i.l.bf16 %v6212_v25 }
 0x22c   : > { %3671 = vperm.xlu1 %6486, %v4855_v10   ;;  %3676 = vperm.xlu0 %6480, %v4858_v11   ;;  %v4886_v10 = vunpack.c.l.bf16 %v5047_v54  ;;  %v5048_v11 = vld [vmem:[%s7925_s30 + $0x50] sm:$0xff]  }
 0x22d   : > { %2378 = vst.msk [vmem:[#allocation2 + $0xab] sm:$0xff] %vm2356_vm4, %v6218_v15  ;;  %2379 = vst.msk [vmem:[#allocation2 + $0xb3] sm:$0xff] %vm2356_vm4, %v6219_v14 }
 0x22e   : > { %2376 = vst.msk [vmem:[#allocation2 + $0x9b] sm:$0xff] %vm2356_vm4, %v6213_v22  ;;  %2377 = vst.msk [vmem:[#allocation2 + $0xa3] sm:$0xff] %vm2356_vm4, %v6214_v20  ;;  %v6227_v33 = vpop.permute.xlu1 %6226  ;;  %v6222_v24 = vpop.permute.xlu0 %6221  ;;  %v4887_v22 = vunpack.c.h.bf16 %v5047_v54 }
 0x22f   : > { %v6229_v16 = vunpack.i.h.bf16 %v6227_v33  ;;  %v6228_v28 = vunpack.i.l.bf16 %v6227_v33  ;;  %v6224_v31 = vunpack.i.h.bf16 %v6222_v24  ;;  %v6223_v36 = vunpack.i.l.bf16 %v6222_v24 }
 0x230   : > { %3681 = vperm.xlu1 %6486, %v4859_v56   ;;  %3686 = vperm.xlu0 %6480, %v4862_v63   ;;  %v4890_v56 = vunpack.c.l.bf16 %v5048_v11  ;;  %v5049_v63 = vld [vmem:[%s7925_s30 + $0x58] sm:$0xff]  }
 0x231   : > { %2382 = vst.msk [vmem:[#allocation2 + $0xcb] sm:$0xff] %vm2356_vm4, %v6228_v28  ;;  %2383 = vst.msk [vmem:[#allocation2 + $0xd3] sm:$0xff] %vm2356_vm4, %v6229_v16 }
 0x232   : > { %2380 = vst.msk [vmem:[#allocation2 + $0xbb] sm:$0xff] %vm2356_vm4, %v6223_v36  ;;  %2381 = vst.msk [vmem:[#allocation2 + $0xc3] sm:$0xff] %vm2356_vm4, %v6224_v31  ;;  %v6237_v61 = vpop.permute.xlu1 %6236  ;;  %v6232_v1 = vpop.permute.xlu0 %6231  ;;  %v4891_v36 = vunpack.c.h.bf16 %v5048_v11 }
 0x233   : > { %v6239_v41 = vunpack.i.h.bf16 %v6237_v61  ;;  %v6238_v30 = vunpack.i.l.bf16 %v6237_v61  ;;  %v6234_v34 = vunpack.i.h.bf16 %v6232_v1  ;;  %v6233_v43 = vunpack.i.l.bf16 %v6232_v1  ;;  %v5050_v61 = vld [vmem:[%s7925_s30 + $0x60] sm:$0xff]  }
 0x234   : > { %3691 = vperm.xlu1 %6486, %v4863_v38   ;;  %3696 = vperm.xlu0 %6480, %v4866_v32   ;;  %v4894_v38 = vunpack.c.l.bf16 %v5049_v63 }
 0x235   : > { %2386 = vst.msk [vmem:[#allocation2 + $0xeb] sm:$0xff] %vm2356_vm4, %v6238_v30  ;;  %2387 = vst.msk [vmem:[#allocation2 + $0xf3] sm:$0xff] %vm2356_vm4, %v6239_v41 }
 0x236   : > { %2384 = vst.msk [vmem:[#allocation2 + $0xdb] sm:$0xff] %vm2356_vm4, %v6233_v43  ;;  %2385 = vst.msk [vmem:[#allocation2 + $0xe3] sm:$0xff] %vm2356_vm4, %v6234_v34  ;;  %v6247_v44 = vpop.permute.xlu1 %6246  ;;  %v6242_v0 = vpop.permute.xlu0 %6241 }
 0x237   : > { %v6249_v3 = vunpack.i.h.bf16 %v6247_v44  ;;  %v6248_v42 = vunpack.i.l.bf16 %v6247_v44  ;;  %v6244_v39 = vunpack.i.h.bf16 %v6242_v0  ;;  %v6243_v47 = vunpack.i.l.bf16 %v6242_v0 }
 0x238   : > { %3701 = vperm.xlu1 %6486, %v4867_v45   ;;  %3706 = vperm.xlu0 %6480, %v4870_v23   ;;  %v4895_v44 = vunpack.c.h.bf16 %v5049_v63 }
 0x239   : > { %2390 = vst.msk [vmem:[#allocation2 + $0x10b] sm:$0xff] %vm2356_vm4, %v6248_v42  ;;  %2391 = vst.msk [vmem:[#allocation2 + $0x113] sm:$0xff] %vm2356_vm4, %v6249_v3  ;;  %v4898_v42 = vunpack.c.l.bf16 %v5050_v61 }
 0x23a   : > { %2388 = vst.msk [vmem:[#allocation2 + $0xfb] sm:$0xff] %vm2356_vm4, %v6243_v47  ;;  %2389 = vst.msk [vmem:[#allocation2 + $0x103] sm:$0xff] %vm2356_vm4, %v6244_v39  ;;  %v6257_v26 = vpop.permute.xlu1 %6256  ;;  %v6252_v46 = vpop.permute.xlu0 %6251 }
 0x23b   : > { %v6259_v50 = vunpack.i.h.bf16 %v6257_v26  ;;  %v6258_v40 = vunpack.i.l.bf16 %v6257_v26  ;;  %v6254_v62 = vunpack.i.h.bf16 %v6252_v46  ;;  %v6253_v2 = vunpack.i.l.bf16 %v6252_v46 }
 0x23c   : > { %3711 = vperm.xlu1 %6486, %v4871_v29   ;;  %3716 = vperm.xlu0 %6480, %v4874_v51   ;;  %v5051_v29 = vld [vmem:[%s7925_s30 + $0x68] sm:$0xff]  }
 0x23d   : > { %2394 = vst.msk [vmem:[#allocation2 + $0x12b] sm:$0xff] %vm2356_vm4, %v6258_v40  ;;  %2395 = vst.msk [vmem:[#allocation2 + $0x133] sm:$0xff] %vm2356_vm4, %v6259_v50  ;;  %v4902_v60 = vunpack.c.l.bf16 %v5051_v29 }
 0x23e   : > { %2392 = vst.msk [vmem:[#allocation2 + $0x11b] sm:$0xff] %vm2356_vm4, %v6253_v2  ;;  %2393 = vst.msk [vmem:[#allocation2 + $0x123] sm:$0xff] %vm2356_vm4, %v6254_v62  ;;  %v6267_v8 = vpop.permute.xlu1 %6266  ;;  %v6262_v48 = vpop.permute.xlu0 %6261  ;;  %v4899_v62 = vunpack.c.h.bf16 %v5050_v61 }
 0x23f   : > { %v6269_v35 = vunpack.i.h.bf16 %v6267_v8  ;;  %v6268_v55 = vunpack.i.l.bf16 %v6267_v8  ;;  %v6264_v49 = vunpack.i.h.bf16 %v6262_v48  ;;  %v6263_v7 = vunpack.i.l.bf16 %v6262_v48 }
 0x240   : > { %3721 = vperm.xlu1 %6486, %v4875_v5   ;;  %3726 = vperm.xlu0 %6480, %v4878_v58  }
 0x241   : > { %2398 = vst.msk [vmem:[#allocation2 + $0x14b] sm:$0xff] %vm2356_vm4, %v6268_v55  ;;  %2399 = vst.msk [vmem:[#allocation2 + $0x153] sm:$0xff] %vm2356_vm4, %v6269_v35  ;;  %v5052_v55 = vld [vmem:[%s7925_s30 + $0x70] sm:$0xff]  }
 0x242   : > { %2396 = vst.msk [vmem:[#allocation2 + $0x13b] sm:$0xff] %vm2356_vm4, %v6263_v7  ;;  %2397 = vst.msk [vmem:[#allocation2 + $0x143] sm:$0xff] %vm2356_vm4, %v6264_v49  ;;  %v6277_v17 = vpop.permute.xlu1 %6276  ;;  %v6272_v6 = vpop.permute.xlu0 %6271 }
 0x243   : > { %v6279_v57 = vunpack.i.h.bf16 %v6277_v17  ;;  %v6278_v19 = vunpack.i.l.bf16 %v6277_v17  ;;  %v6274_v53 = vunpack.i.h.bf16 %v6272_v6  ;;  %v6273_v59 = vunpack.i.l.bf16 %v6272_v6 }
 0x244   : > { %3731 = vperm.xlu1 %6486, %v4879_v4   ;;  %3736 = vperm.xlu0 %6480, %v4882_v27   ;;  %v4903_v6 = vunpack.c.h.bf16 %v5051_v29  ;;  %v5056_v29 = vld [vmem:[%s7925_s30 + $0x90] sm:$0xff]  }
 0x245   : > { %2618 = vst.msk [vmem:[#allocation2 - $0x6] sm:$0xc0] %vm2617_vm6, %v6278_v19  ;;  %v4906_v19 = vunpack.c.l.bf16 %v5052_v55 }
 0x246   : > { %2620 = vst.msk [vmem:[#allocation2 + $0x2] sm:$0xff] %vm2619_vm7, %v6279_v57  ;;  %v6287_v12 = vpop.permute.xlu1 %6286  ;;  %v6282_v18 = vpop.permute.xlu0 %6281 }
 0x247   : > { %2400 = vst.msk [vmem:[#allocation2 + $0x15b] sm:$0xff] %vm2356_vm4, %v6273_v59  ;;  %2401 = vst.msk [vmem:[#allocation2 + $0x163] sm:$0xff] %vm2356_vm4, %v6274_v53  ;;  %v6289_v25 = vunpack.i.h.bf16 %v6287_v12  ;;  %v6288_v14 = vunpack.i.l.bf16 %v6287_v12  ;;  %v6284_v15 = vunpack.i.h.bf16 %v6282_v18  ;;  %v6283_v20 = vunpack.i.l.bf16 %v6282_v18 }
 0x248   : > { %3741 = vperm.xlu1 %6486, %v4883_v9   ;;  %3746 = vperm.xlu0 %6480, %v4886_v10   ;;  %v5053_v9 = vld [vmem:[%s7925_s30 + $0x78] sm:$0xff]  }
 0x249   : > { %2623 = vst.msk [vmem:[#allocation2 + $0x1a] sm:$0xff] %vm2619_vm7, %v6288_v14  ;;  %2624 = vst.msk [vmem:[#allocation2 + $0x22] sm:$0xff] %vm2619_vm7, %v6289_v25  ;;  %v4907_v25 = vunpack.c.h.bf16 %v5052_v55 }
 0x24a   : > { %2621 = vst.msk [vmem:[#allocation2 + $0xa] sm:$0xff] %vm2619_vm7, %v6283_v20  ;;  %2622 = vst.msk [vmem:[#allocation2 + $0x12] sm:$0xff] %vm2619_vm7, %v6284_v15  ;;  %v6292_v13 = vpop.permute.xlu0 %6291  ;;  %v6297_v33 = vpop.permute.xlu1 %6296  ;;  %v4910_v20 = vunpack.c.l.bf16 %v5053_v9 }
 0x24b   : > { %v6294_v24 = vunpack.i.h.bf16 %v6292_v13  ;;  %v6293_v16 = vunpack.i.l.bf16 %v6292_v13  ;;  %v6299_v28 = vunpack.i.h.bf16 %v6297_v33  ;;  %v6298_v31 = vunpack.i.l.bf16 %v6297_v33  ;;  %v5054_v33 = vld [vmem:[%s7925_s30 + $0x80] sm:$0xff]  }
 0x24c   : > { %3751 = vperm.xlu1 %6486, %v4887_v22   ;;  %3756 = vperm.xlu0 %6480, %v4890_v56  }
 0x24d   : > { %2625 = vst.msk [vmem:[#allocation2 + $0x2a] sm:$0xff] %vm2619_vm7, %v6293_v16  ;;  %2626 = vst.msk [vmem:[#allocation2 + $0x32] sm:$0xff] %vm2619_vm7, %v6294_v24  ;;  %v2700_v43 = vld [vmem:[#allocation2] sm:$0xff] }
 0x24e   : > { %2627 = vst.msk [vmem:[#allocation2 + $0x3a] sm:$0xff] %vm2619_vm7, %v6298_v31  ;;  %2628 = vst.msk [vmem:[#allocation2 + $0x42] sm:$0xff] %vm2619_vm7, %v6299_v28  ;;  %v6302_v32 = vpop.permute.xlu0 %6301  ;;  %v6307_v37 = vpop.permute.xlu1 %6306 }
 0x24f   : > { %v6304_v1 = vunpack.i.h.bf16 %v6302_v32  ;;  %v6303_v41 = vunpack.i.l.bf16 %v6302_v32  ;;  %v6309_v30 = vunpack.i.h.bf16 %v6307_v37  ;;  %v6308_v34 = vunpack.i.l.bf16 %v6307_v37 }
 0x250   : > { %3761 = vperm.xlu1 %6486, %v4891_v36   ;;  %3766 = vperm.xlu0 %6480, %v4894_v38   ;;  %v2704_v50 = vld [vmem:[#allocation2 + $0x20] sm:$0xff]  ;;  %v4911_v38 = vunpack.c.h.bf16 %v5053_v9  ;;  %v4914_v37 = vunpack.c.l.bf16 %v5054_v33 }
 0x251   : > { %v2701_v45 = vld [vmem:[#allocation2 + $0x8] sm:$0xff]  ;;  %v2702_v23 = vld [vmem:[#allocation2 + $0x10] sm:$0xff]  ;;  %v2703_v21 = vld [vmem:[#allocation2 + $0x18] sm:$0xff]  ;;  %2629 = vst.msk [vmem:[#allocation2 + $0x4a] sm:$0xff] %vm2619_vm7, %v6303_v41 }
 0x252   : > { %2630 = vst.msk [vmem:[#allocation2 + $0x52] sm:$0xff] %vm2619_vm7, %v6304_v1  ;;  %2631 = vst.msk [vmem:[#allocation2 + $0x5a] sm:$0xff] %vm2619_vm7, %v6308_v34  ;;  %v2764_v0 = vpack.c.bf16 %v2701_v45, %v2700_v43  ;;  %v2765_v3 = vpack.c.bf16 %v2703_v21, %v2702_v23  ;;  %v6312_v39 = vpop.permute.xlu0 %6311  ;;  %v6317_v47 = vpop.permute.xlu1 %6316  ;;  %v5055_v41 = vld [vmem:[%s7925_s30 + $0x88] sm:$0xff]   ;;  %v4915_v23 = vunpack.c.h.bf16 %v5054_v33 }
 0x253   : > { %2632 = vst.msk [vmem:[#allocation2 + $0x62] sm:$0xff] %vm2619_vm7, %v6309_v30  ;;  %v6314_v51 = vunpack.i.h.bf16 %v6312_v39  ;;  %v6313_v52 = vunpack.i.l.bf16 %v6312_v39  ;;  %v6319_v26 = vunpack.i.h.bf16 %v6317_v47  ;;  %v6318_v46 = vunpack.i.l.bf16 %v6317_v47 }
 0x254   : > { %5111 = vmatprep.mubr.msk.bf16.mxu0 %vm2816_vm8, %v2764_v0  ;;  %v2705_v40 = vld [vmem:[#allocation2 + $0x28] sm:$0xff]  ;;  %3771 = vperm.xlu1 %6486, %v4895_v44   ;;  %v2706_v5 = vld [vmem:[#allocation2 + $0x30] sm:$0xff]  ;;  %v4918_v0 = vunpack.c.l.bf16 %v5055_v41 }
 0x255   : > { %5112 = vmatmul.mubr.msk.bf16.vlgmr.msra.gmra.mrb[0].mxu0 %vm2816_vm8, %v2765_v3  ;;  %2633 = vst.msk [vmem:[#allocation2 + $0x6a] sm:$0xff] %vm2619_vm7, %v6313_v52  ;;  %2634 = vst.msk [vmem:[#allocation2 + $0x72] sm:$0xff] %vm2619_vm7, %v6314_v51  ;;  %v2766_v2 = vpack.c.bf16 %v2705_v40, %v2704_v50  ;;  %v2707_v58 = vld [vmem:[#allocation2 + $0x38] sm:$0xff]  ;;  %3776 = vperm.xlu0 %6480, %v4898_v42   ;;  %v2708_v35 = vld [vmem:[#allocation2 + $0x40] sm:$0xff]  ;;  %v4919_v40 = vunpack.c.h.bf16 %v5055_v41 }
 0x256   : > { %2635 = vst.msk [vmem:[#allocation2 + $0x7a] sm:$0xff] %vm2619_vm7, %v6318_v46  ;;  %2636 = vst.msk [vmem:[#allocation2 + $0x82] sm:$0xff] %vm2619_vm7, %v6319_v26  ;;  %v6322_v8 = vpop.permute.xlu0 %6321  ;;  %v6327_v48 = vpop.permute.xlu1 %6326  ;;  %v2767_v54 = vpack.c.bf16 %v2707_v58, %v2706_v5 }
 0x257   : > { %v6324_v49 = vunpack.i.h.bf16 %v6322_v8  ;;  %v6323_v7 = vunpack.i.l.bf16 %v6322_v8  ;;  %v6329_v4 = vunpack.i.h.bf16 %v6327_v48  ;;  %v6328_v27 = vunpack.i.l.bf16 %v6327_v48  ;;  %5115 = vmatprep.mubr.msk.bf16.mxu0 %vm2816_vm8, %v2766_v2 }
 0x258   : > { %v2709_v17 = vld [vmem:[#allocation2 + $0x48] sm:$0xff]  ;;  %3781 = vperm.xlu1 %6486, %v4899_v62   ;;  %v4922_v2 = vunpack.c.l.bf16 %v5056_v29 }
 0x259   : > { %2637 = vst.msk [vmem:[#allocation2 + $0x8a] sm:$0xff] %vm2619_vm7, %v6323_v7  ;;  %2638 = vst.msk [vmem:[#allocation2 + $0x92] sm:$0xff] %vm2619_vm7, %v6324_v49  ;;  %v2768_v57 = vpack.c.bf16 %v2709_v17, %v2708_v35  ;;  %3786 = vperm.xlu0 %6480, %v4902_v60   ;;  %v2710_v14 = vld [vmem:[#allocation2 + $0x50] sm:$0xff]  ;;  %v2711_v15 = vld [vmem:[#allocation2 + $0x58] sm:$0xff]  ;;  %v4923_v49 = vunpack.c.h.bf16 %v5056_v29 }
 0x25a   : > { %2639 = vst.msk [vmem:[#allocation2 + $0x9a] sm:$0xff] %vm2619_vm7, %v6328_v27  ;;  %2640 = vst.msk [vmem:[#allocation2 + $0xa2] sm:$0xff] %vm2619_vm7, %v6329_v4  ;;  %v6332_v53 = vpop.permute.xlu0 %6331  ;;  %v6337_v59 = vpop.permute.xlu1 %6336  ;;  %v2712_v63 = vld [vmem:[#allocation2 + $0x60] sm:$0xff]  ;;  %v2769_v36 = vpack.c.bf16 %v2711_v15, %v2710_v14  ;;  %v5057_v60 = vld [vmem:[%s7925_s30 + $0x98] sm:$0xff]  }
 0x25b   : > { %v6334_v10 = vunpack.i.h.bf16 %v6332_v53  ;;  %v6333_v11 = vunpack.i.l.bf16 %v6332_v53  ;;  %v6339_v12 = vunpack.i.h.bf16 %v6337_v59  ;;  %v6338_v18 = vunpack.i.l.bf16 %v6337_v59  ;;  %v5060_v29 = vld [vmem:[%s7925_s30 + $0xb0] sm:$0xff]  }
 0x25c   : > { %3791 = vperm.xlu1 %6486, %v4903_v6   ;;  %v2713_v13 = vld [vmem:[#allocation2 + $0x68] sm:$0xff]  ;;  %v2714_v21 = vld [vmem:[#allocation2 + $0x70] sm:$0xff]  ;;  %v4926_v27 = vunpack.c.l.bf16 %v5057_v60 }
 0x25d   : > { %5116 = vmatmul.mubr.msk.bf16.gmra.mrb[4].mxu0 %vm2816_vm8, %v2767_v54  ;;  %2641 = vst.msk [vmem:[#allocation2 + $0xaa] sm:$0xff] %vm2619_vm7, %v6333_v11  ;;  %2642 = vst.msk [vmem:[#allocation2 + $0xb2] sm:$0xff] %vm2619_vm7, %v6334_v10  ;;  %3796 = vperm.xlu0 %6480, %v4906_v19   ;;  %v2770_v32 = vpack.c.bf16 %v2713_v13, %v2712_v63  ;;  %v2715_v44 = vld [vmem:[#allocation2 + $0x78] sm:$0xff]  ;;  %v2716_v39 = vld [vmem:[#allocation2 + $0x80] sm:$0xff] }
 0x25e   : > { %2643 = vst.msk [vmem:[#allocation2 + $0xba] sm:$0xff] %vm2619_vm7, %v6338_v18  ;;  %2644 = vst.msk [vmem:[#allocation2 + $0xc2] sm:$0xff] %vm2619_vm7, %v6339_v12  ;;  %5119 = vmatprep.mubr.msk.bf16.mxu0 %vm2816_vm8, %v2768_v57  ;;  %v6342_v22 = vpop.permute.xlu0 %6341  ;;  %v6347_v56 = vpop.permute.xlu1 %6346  ;;  %v2771_v50 = vpack.c.bf16 %v2715_v44, %v2714_v21  ;;  %v5058_v11 = vld [vmem:[%s7925_s30 + $0xa0] sm:$0xff]  }
 0x25f   : > { %v6344_v24 = vunpack.i.h.bf16 %v6342_v22  ;;  %v6343_v16 = vunpack.i.l.bf16 %v6342_v22  ;;  %v6349_v28 = vunpack.i.h.bf16 %v6347_v56  ;;  %v6348_v31 = vunpack.i.l.bf16 %v6347_v56 }
 0x260   : > { %3801 = vperm.xlu1 %6486, %v4907_v25   ;;  %v2717_v47 = vld [vmem:[#allocation2 + $0x88] sm:$0xff]  ;;  %v2718_v7 = vld [vmem:[#allocation2 + $0x90] sm:$0xff]  ;;  %v4927_v56 = vunpack.c.h.bf16 %v5057_v60 }
 0x261   : > { %2645 = vst.msk [vmem:[#allocation2 + $0xca] sm:$0xff] %vm2619_vm7, %v6343_v16  ;;  %2646 = vst.msk [vmem:[#allocation2 + $0xd2] sm:$0xff] %vm2619_vm7, %v6344_v24  ;;  %3806 = vperm.xlu0 %6480, %v4910_v20   ;;  %v2772_v62 = vpack.c.bf16 %v2717_v47, %v2716_v39  ;;  %v2719_v4 = vld [vmem:[#allocation2 + $0x98] sm:$0xff]  ;;  %v2720_v17 = vld [vmem:[#allocation2 + $0xa0] sm:$0xff]  ;;  %v4930_v24 = vunpack.c.l.bf16 %v5058_v11 }
 0x262   : > { %2647 = vst.msk [vmem:[#allocation2 + $0xda] sm:$0xff] %vm2619_vm7, %v6348_v31  ;;  %2648 = vst.msk [vmem:[#allocation2 + $0xe2] sm:$0xff] %vm2619_vm7, %v6349_v28  ;;  %v6352_v61 = vpop.permute.xlu0 %6351  ;;  %v6357_v1 = vpop.permute.xlu1 %6356  ;;  %v2773_v18 = vpack.c.bf16 %v2719_v4, %v2718_v7 }
 0x263   : > { %v6354_v30 = vunpack.i.h.bf16 %v6352_v61  ;;  %v6353_v34 = vunpack.i.l.bf16 %v6352_v61  ;;  %v6359_v43 = vunpack.i.h.bf16 %v6357_v1  ;;  %v6358_v45 = vunpack.i.l.bf16 %v6357_v1 }
 0x264   : > { %3811 = vperm.xlu1 %6486, %v4911_v38   ;;  %v2721_v6 = vld [vmem:[#allocation2 + $0xa8] sm:$0xff] }
 0x265   : > { %5120 = vmatmul.mubr.msk.bf16.gmra.mrb[8].mxu0 %vm2816_vm8, %v2769_v36  ;;  %2649 = vst.msk [vmem:[#allocation2 + $0xea] sm:$0xff] %vm2619_vm7, %v6353_v34  ;;  %2650 = vst.msk [vmem:[#allocation2 + $0xf2] sm:$0xff] %vm2619_vm7, %v6354_v30  ;;  %3816 = vperm.xlu0 %6480, %v4914_v37   ;;  %v2774_v22 = vpack.c.bf16 %v2721_v6, %v2720_v17  ;;  %v5059_v38 = vld [vmem:[%s7925_s30 + $0xa8] sm:$0xff]   ;;  %v2722_v37 = vld [vmem:[#allocation2 + $0xb0] sm:$0xff]  ;;  %v4931_v34 = vunpack.c.h.bf16 %v5058_v11 }
 0x266   : > { %2651 = vst.msk [vmem:[#allocation2 + $0xfa] sm:$0xff] %vm2619_vm7, %v6358_v45  ;;  %2652 = vst.msk [vmem:[#allocation2 + $0x102] sm:$0xff] %vm2619_vm7, %v6359_v43  ;;  %5123 = vmatprep.mubr.msk.bf16.mxu0 %vm2816_vm8, %v2770_v32  ;;  %v6362_v3 = vpop.permute.xlu0 %6361  ;;  %v6367_v42 = vpop.permute.xlu1 %6366  ;;  %v2723_v1 = vld [vmem:[#allocation2 + $0xb8] sm:$0xff]  ;;  %v2724_v43 = vld [vmem:[#allocation2 + $0xc0] sm:$0xff]  ;;  %v4934_v44 = vunpack.c.l.bf16 %v5059_v38 }
 0x267   : > { %v6364_v51 = vunpack.i.h.bf16 %v6362_v3  ;;  %v6363_v52 = vunpack.i.l.bf16 %v6362_v3  ;;  %v6369_v26 = vunpack.i.h.bf16 %v6367_v42  ;;  %v6368_v46 = vunpack.i.l.bf16 %v6367_v42 }
 0x268   : > { %3821 = vperm.xlu1 %6486, %v4915_v23   ;;  %v2725_v45 = vld [vmem:[#allocation2 + $0xc8] sm:$0xff] }
 0x269   : > { %2653 = vst.msk [vmem:[#allocation2 + $0x10a] sm:$0xff] %vm2619_vm7, %v6363_v52  ;;  %2654 = vst.msk [vmem:[#allocation2 + $0x112] sm:$0xff] %vm2619_vm7, %v6364_v51  ;;  %3826 = vperm.xlu0 %6480, %v4918_v0   ;;  %v2775_v51 = vpack.c.bf16 %v2723_v1, %v2722_v37 }
 0x26a   : > { %2655 = vst.msk [vmem:[#allocation2 + $0x11a] sm:$0xff] %vm2619_vm7, %v6368_v46  ;;  %2656 = vst.msk [vmem:[#allocation2 + $0x122] sm:$0xff] %vm2619_vm7, %v6369_v26  ;;  %v6372_v5 = vpop.permute.xlu0 %6371  ;;  %v6377_v58 = vpop.permute.xlu1 %6376  ;;  %v2776_v46 = vpack.c.bf16 %v2725_v45, %v2724_v43 }
 0x26b   : > { %v6374_v8 = vunpack.i.h.bf16 %v6372_v5  ;;  %v6373_v48 = vunpack.i.l.bf16 %v6372_v5  ;;  %v6379_v35 = vunpack.i.h.bf16 %v6377_v58  ;;  %v6378_v55 = vunpack.i.l.bf16 %v6377_v58 }
 0x26c   : > { %3831 = vperm.xlu1 %6486, %v4919_v40   ;;  %v4938_v5 = vunpack.c.l.bf16 %v5060_v29  ;;  %v2729_v17 = vld [vmem:[#allocation2 + $0xe8] sm:$0xff] }
 0x26d   : > { %5124 = vmatmul.mubr.msk.bf16.gmra.mrb[12].mxu0 %vm2816_vm8, %v2771_v50  ;;  %2657 = vst.msk [vmem:[#allocation2 + $0x12a] sm:$0xff] %vm2619_vm7, %v6373_v48  ;;  %2658 = vst.msk [vmem:[#allocation2 + $0x132] sm:$0xff] %vm2619_vm7, %v6374_v8  ;;  %3836 = vperm.xlu0 %6480, %v4922_v2   ;;  %v2732_v54 = vld [vmem:[#allocation2 + $0x100] sm:$0xff]  ;;  %v4935_v50 = vunpack.c.h.bf16 %v5059_v38  ;;  %v2731_v38 = vld [vmem:[#allocation2 + $0xf8] sm:$0xff] }
 0x26e   : > { %5127 = vmatprep.mubr.msk.bf16.mxu0 %vm2816_vm8, %v2772_v62  ;;  %2659 = vst.msk [vmem:[#allocation2 + $0x13a] sm:$0xff] %vm2619_vm7, %v6378_v55  ;;  %2660 = vst.msk [vmem:[#allocation2 + $0x142] sm:$0xff] %vm2619_vm7, %v6379_v35  ;;  %v6382_v57 = vpop.permute.xlu0 %6381  ;;  %v6387_v19 = vpop.permute.xlu1 %6386  ;;  %v5061_v35 = vld [vmem:[%s7925_s30 + $0xb8] sm:$0xff]   ;;  %v2726_v55 = vld [vmem:[#allocation2 + $0xd0] sm:$0xff] }
 0x26f   : > { %v6384_v53 = vunpack.i.h.bf16 %v6382_v57  ;;  %v6383_v59 = vunpack.i.l.bf16 %v6382_v57  ;;  %v6389_v9 = vunpack.i.h.bf16 %v6387_v19  ;;  %v6388_v10 = vunpack.i.l.bf16 %v6387_v19 }
 0x270   : > { %v2733_v12 = vld [vmem:[#allocation2 + $0x108] sm:$0xff]  ;;  %v2734_v25 = vld [vmem:[#allocation2 + $0x110] sm:$0xff]  ;;  %3841 = vperm.xlu1 %6486, %v4923_v49   ;;  %v2727_v49 = vld [vmem:[#allocation2 + $0xd8] sm:$0xff]  ;;  %v4942_v19 = vunpack.c.l.bf16 %v5061_v35 }
 0x271   : > { %v2735_v14 = vld [vmem:[#allocation2 + $0x118] sm:$0xff]  ;;  %v2780_v15 = vpack.c.bf16 %v2733_v12, %v2732_v54  ;;  %2661 = vst.msk [vmem:[#allocation2 + $0x14a] sm:$0xff] %vm2619_vm7, %v6383_v59  ;;  %2662 = vst.msk [vmem:[#allocation2 + $0x152] sm:$0xff] %vm2619_vm7, %v6384_v53  ;;  %3846 = vperm.xlu0 %6480, %v4926_v27   ;;  %v2736_v33 = vld [vmem:[#allocation2 + $0x120] sm:$0xff]  ;;  %v4939_v27 = vunpack.c.h.bf16 %v5060_v29 }
 0x272   : > { %v2781_v20 = vpack.c.bf16 %v2735_v14, %v2734_v25  ;;  %2663 = vst.msk [vmem:[#allocation2 + $0x15a] sm:$0xff] %vm2619_vm7, %v6388_v10  ;;  %2664 = vst.msk [vmem:[#allocation2 + $0x162] sm:$0xff] %vm2619_vm7, %v6389_v9  ;;  %v6392_v63 = vpop.permute.xlu0 %6391  ;;  %v6397_v13 = vpop.permute.xlu1 %6396  ;;  %v2728_v54 = vld [vmem:[#allocation2 + $0xe0] sm:$0xff] }
 0x273   : > { %5143 = vmatprep.mubr.msk.bf16.mxu1 %vm2816_vm8, %v2780_v15  ;;  %v6394_v16 = vunpack.i.h.bf16 %v6392_v63  ;;  %v6393_v28 = vunpack.i.l.bf16 %v6392_v63  ;;  %v6399_v31 = vunpack.i.h.bf16 %v6397_v13  ;;  %v6398_v36 = vunpack.i.l.bf16 %v6397_v13  ;;  %v5062_v12 = vld [vmem:[%s7925_s30 + $0xc0] sm:$0xff]  }
 0x274   : > { %5144 = vmatmul.mubr.msk.bf16.vlgmr.msra.gmra.mrb[0].mxu1 %vm2816_vm8, %v2781_v20  ;;  %v2737_v32 = vld [vmem:[#allocation2 + $0x128] sm:$0xff]  ;;  %3851 = vperm.xlu1 %6486, %v4927_v56   ;;  %v2738_v41 = vld [vmem:[#allocation2 + $0x130] sm:$0xff]  ;;  %v2778_v15 = vpack.c.bf16 %v2729_v17, %v2728_v54  ;;  %v4943_v20 = vunpack.c.h.bf16 %v5061_v35  ;;  %v4946_v13 = vunpack.c.l.bf16 %v5062_v12 }
 0x275   : > { %5128 = vmatmul.mubr.msk.bf16.gmra.mrb[16].mxu0 %vm2816_vm8, %v2773_v18  ;;  %2402 = vst.msk [vmem:[#allocation2 + $0x16b] sm:$0xff] %vm2356_vm4, %v6393_v28  ;;  %2403 = vst.msk [vmem:[#allocation2 + $0x173] sm:$0xff] %vm2356_vm4, %v6394_v16  ;;  %v2782_v61 = vpack.c.bf16 %v2737_v32, %v2736_v33  ;;  %v2739_v30 = vld [vmem:[#allocation2 + $0x138] sm:$0xff]  ;;  %3856 = vperm.xlu0 %6480, %v4930_v24   ;;  %v2740_v47 = vld [vmem:[#allocation2 + $0x140] sm:$0xff]  ;;  %v2777_v18 = vpack.c.bf16 %v2727_v49, %v2726_v55 }
 0x276   : > { %5131 = vmatprep.mubr.msk.bf16.mxu0 %vm2816_vm8, %v2774_v22  ;;  %2404 = vst.msk [vmem:[#allocation2 + $0x17b] sm:$0xff] %vm2356_vm4, %v6398_v36  ;;  %2405 = vst.msk [vmem:[#allocation2 + $0x183] sm:$0xff] %vm2356_vm4, %v6399_v31  ;;  %v6402_v23 = vpop.permute.xlu0 %6401  ;;  %v6407_v21 = vpop.permute.xlu1 %6406  ;;  %v2783_v52 = vpack.c.bf16 %v2739_v30, %v2738_v41  ;;  %v5063_v31 = vld [vmem:[%s7925_s30 + $0xc8] sm:$0xff]   ;;  %v2730_v36 = vld [vmem:[#allocation2 + $0xf0] sm:$0xff] }
 0x277   : > { %5147 = vmatprep.mubr.msk.bf16.mxu1 %vm2816_vm8, %v2782_v61  ;;  %v6404_v0 = vunpack.i.h.bf16 %v6402_v23  ;;  %v6403_v3 = vunpack.i.l.bf16 %v6402_v23  ;;  %v6409_v42 = vunpack.i.h.bf16 %v6407_v21  ;;  %v6408_v39 = vunpack.i.l.bf16 %v6407_v21 }
 0x278   : > { %v2741_v26 = vld [vmem:[#allocation2 + $0x148] sm:$0xff]  ;;  %3861 = vperm.xlu1 %6486, %v4931_v34   ;;  %v2742_v7 = vld [vmem:[#allocation2 + $0x150] sm:$0xff]  ;;  %v4947_v61 = vunpack.c.h.bf16 %v5062_v12  ;;  %v4950_v30 = vunpack.c.l.bf16 %v5063_v31 }
 0x279   : > { %2665 = vst.msk [vmem:[#allocation2 + $0x16a] sm:$0xff] %vm2619_vm7, %v6403_v3  ;;  %2666 = vst.msk [vmem:[#allocation2 + $0x172] sm:$0xff] %vm2619_vm7, %v6404_v0  ;;  %3866 = vperm.xlu0 %6480, %v4934_v44   ;;  %v2784_v2 = vpack.c.bf16 %v2741_v26, %v2740_v47  ;;  %v2743_v4 = vld [vmem:[#allocation2 + $0x158] sm:$0xff]  ;;  %v2744_v11 = vld [vmem:[#allocation2 + $0x160] sm:$0xff]  ;;  %v2779_v0 = vpack.c.bf16 %v2731_v38, %v2730_v36 }
 0x27a   : > { %2667 = vst.msk [vmem:[#allocation2 + $0x17a] sm:$0xff] %vm2619_vm7, %v6408_v39  ;;  %2668 = vst.msk [vmem:[#allocation2 + $0x182] sm:$0xff] %vm2619_vm7, %v6409_v42  ;;  %v6412_v40 = vpop.permute.xlu0 %6411  ;;  %v6417_v62 = vpop.permute.xlu1 %6416  ;;  %v2785_v25 = vpack.c.bf16 %v2743_v4, %v2742_v7  ;;  %v5064_v44 = vld [vmem:[%s7925_s30 + $0xd0] sm:$0xff]   ;;  %v4951_v39 = vunpack.c.h.bf16 %v5063_v31  ;;  %v5066_v7 = vld [vmem:[%s7925_s30 + $0xe0] sm:$0xff]  }
 0x27b   : > { %v6414_v58 = vunpack.i.h.bf16 %v6412_v40  ;;  %v6413_v60 = vunpack.i.l.bf16 %v6412_v40  ;;  %v6419_v8 = vunpack.i.h.bf16 %v6417_v62  ;;  %v6418_v48 = vunpack.i.l.bf16 %v6417_v62  ;;  %v5065_v62 = vld [vmem:[%s7925_s30 + $0xd8] sm:$0xff]  }
 0x27c   : > { %5148 = vmatmul.mubr.msk.bf16.gmra.mrb[4].mxu1 %vm2816_vm8, %v2783_v52  ;;  %3871 = vperm.xlu1 %6486, %v4935_v50   ;;  %v4954_v52 = vunpack.c.l.bf16 %v5064_v44  ;;  %v4959_v54 = vunpack.c.h.bf16 %v5065_v62  ;;  %v4963_v12 = vunpack.c.h.bf16 %v5066_v7  ;;  %v5069_v36 = vld [vmem:[%s7925_s30 + $0xf8] sm:$0xff]  }
 0x27d   : > { %5132 = vmatmul.mubr.msk.bf16.gmra.mrb[20].mxu0 %vm2816_vm8, %v2775_v51  ;;  %2406 = vst.msk [vmem:[#allocation2 + $0x18b] sm:$0xff] %vm2356_vm4, %v6413_v60  ;;  %2407 = vst.msk [vmem:[#allocation2 + $0x193] sm:$0xff] %vm2356_vm4, %v6414_v58  ;;  %5151 = vmatprep.mubr.msk.bf16.mxu1 %vm2816_vm8, %v2784_v2  ;;  %v4955_v58 = vunpack.c.h.bf16 %v5064_v44 }
 0x27e   : > { %5135 = vmatprep.mubr.msk.bf16.mxu0 %vm2816_vm8, %v2776_v46  ;;  %2408 = vst.msk [vmem:[#allocation2 + $0x19b] sm:$0xff] %vm2356_vm4, %v6418_v48  ;;  %2409 = vst.msk [vmem:[#allocation2 + $0x1a3] sm:$0xff] %vm2356_vm4, %v6419_v8  ;;  %3876 = vperm.xlu0 %6480, %v4938_v5   ;;  %v6422_v6 = vpop.permute.xlu0 %6421  ;;  %v6427_v57 = vpop.permute.xlu1 %6426  ;;  %v4958_v48 = vunpack.c.l.bf16 %v5065_v62 }
 0x27f   : > { %v6424_v53 = vunpack.i.h.bf16 %v6422_v6  ;;  %v6423_v59 = vunpack.i.l.bf16 %v6422_v6  ;;  %v6429_v9 = vunpack.i.h.bf16 %v6427_v57  ;;  %v6428_v10 = vunpack.i.l.bf16 %v6427_v57 }
 0x280   : > { %v2745_v14 = vld [vmem:[#allocation2 + $0x168] sm:$0xff]  ;;  %3881 = vperm.xlu1 %6486, %v4939_v27   ;;  %v2746_v32 = vld [vmem:[#allocation2 + $0x170] sm:$0xff] }
 0x281   : > { %2669 = vst.msk [vmem:[#allocation2 + $0x18a] sm:$0xff] %vm2619_vm7, %v6423_v59  ;;  %2670 = vst.msk [vmem:[#allocation2 + $0x192] sm:$0xff] %vm2619_vm7, %v6424_v53  ;;  %v2786_v63 = vpack.c.bf16 %v2745_v14, %v2744_v11  ;;  %v2747_v37 = vld [vmem:[#allocation2 + $0x178] sm:$0xff]  ;;  %v2748_v34 = vld [vmem:[#allocation2 + $0x180] sm:$0xff] }
 0x282   : > { %2671 = vst.msk [vmem:[#allocation2 + $0x19a] sm:$0xff] %vm2619_vm7, %v6428_v10  ;;  %2672 = vst.msk [vmem:[#allocation2 + $0x1a2] sm:$0xff] %vm2619_vm7, %v6429_v9  ;;  %3886 = vperm.xlu0 %6480, %v4942_v19   ;;  %v6432_v22 = vpop.permute.xlu0 %6431  ;;  %v6437_v56 = vpop.permute.xlu1 %6436  ;;  %v2787_v3 = vpack.c.bf16 %v2747_v37, %v2746_v32  ;;  %v4962_v19 = vunpack.c.l.bf16 %v5066_v7  ;;  %v5067_v9 = vld [vmem:[%s7925_s30 + $0xe8] sm:$0xff]  }
 0x283   : > { %v6434_v33 = vunpack.i.h.bf16 %v6432_v22  ;;  %v6433_v24 = vunpack.i.l.bf16 %v6432_v22  ;;  %v6439_v16 = vunpack.i.h.bf16 %v6437_v56  ;;  %v6438_v28 = vunpack.i.l.bf16 %v6437_v56 }
 0x284   : > { %5152 = vmatmul.mubr.msk.bf16.gmra.mrb[8].mxu1 %vm2816_vm8, %v2785_v25  ;;  %3891 = vperm.xlu1 %6486, %v4943_v20   ;;  %v4966_v14 = vunpack.c.l.bf16 %v5067_v9 }
 0x285   : > { %5136 = vmatmul.mubr.msk.bf16.gmra.mrb[24].mxu0 %vm2816_vm8, %v2777_v18  ;;  %2410 = vst.msk [vmem:[#allocation2 + $0x1ab] sm:$0xff] %vm2356_vm4, %v6433_v24  ;;  %2411 = vst.msk [vmem:[#allocation2 + $0x1b3] sm:$0xff] %vm2356_vm4, %v6434_v33  ;;  %5155 = vmatprep.mubr.msk.bf16.mxu1 %vm2816_vm8, %v2786_v63 }
 0x286   : > { %5139 = vmatprep.mubr.msk.bf16.mxu0 %vm2816_vm8, %v2778_v15  ;;  %2412 = vst.msk [vmem:[#allocation2 + $0x1bb] sm:$0xff] %vm2356_vm4, %v6438_v28  ;;  %2413 = vst.msk [vmem:[#allocation2 + $0x1c3] sm:$0xff] %vm2356_vm4, %v6439_v16  ;;  %3896 = vperm.xlu0 %6480, %v4946_v13   ;;  %v6442_v1 = vpop.permute.xlu0 %6441  ;;  %v6447_v41 = vpop.permute.xlu1 %6446  ;;  %v5068_v13 = vld [vmem:[%s7925_s30 + $0xf0] sm:$0xff]   ;;  %v4967_v16 = vunpack.c.h.bf16 %v5067_v9 }
 0x287   : > { %v6444_v43 = vunpack.i.h.bf16 %v6442_v1  ;;  %v6443_v45 = vunpack.i.l.bf16 %v6442_v1  ;;  %v6449_v23 = vunpack.i.h.bf16 %v6447_v41  ;;  %v6448_v21 = vunpack.i.l.bf16 %v6447_v41 }
 0x288   : > { %v2749_v42 = vld [vmem:[#allocation2 + $0x188] sm:$0xff]  ;;  %3901 = vperm.xlu1 %6486, %v4947_v61   ;;  %v2750_v2 = vld [vmem:[#allocation2 + $0x190] sm:$0xff]  ;;  %v4970_v31 = vunpack.c.l.bf16 %v5068_v13  ;;  %v4971_v37 = vunpack.c.h.bf16 %v5068_v13  ;;  %v4974_v61 = vunpack.c.l.bf16 %v5069_v36 }
 0x289   : > { %2673 = vst.msk [vmem:[#allocation2 + $0x1aa] sm:$0xff] %vm2619_vm7, %v6443_v45  ;;  %2674 = vst.msk [vmem:[#allocation2 + $0x1b2] sm:$0xff] %vm2619_vm7, %v6444_v43  ;;  %v2788_v47 = vpack.c.bf16 %v2749_v42, %v2748_v34  ;;  %v2751_v5 = vld [vmem:[#allocation2 + $0x198] sm:$0xff]  ;;  %v2752_v35 = vld [vmem:[#allocation2 + $0x1a0] sm:$0xff]  ;;  %v4975_v34 = vunpack.c.h.bf16 %v5069_v36 }
 0x28a   : > { %2675 = vst.msk [vmem:[#allocation2 + $0x1ba] sm:$0xff] %vm2619_vm7, %v6448_v21  ;;  %2676 = vst.msk [vmem:[#allocation2 + $0x1c2] sm:$0xff] %vm2619_vm7, %v6449_v23  ;;  %3906 = vperm.xlu0 %6480, %v4950_v30   ;;  %v6452_v29 = vpop.permute.xlu0 %6451  ;;  %v6457_v51 = vpop.permute.xlu1 %6456  ;;  %v2789_v4 = vpack.c.bf16 %v2751_v5, %v2750_v2 }
 0x28b   : > { %v6454_v26 = vunpack.i.h.bf16 %v6452_v29  ;;  %v6453_v46 = vunpack.i.l.bf16 %v6452_v29  ;;  %v6459_v50 = vunpack.i.h.bf16 %v6457_v51  ;;  %v6458_v40 = vunpack.i.l.bf16 %v6457_v51 }
 0x28c   : > { %5156 = vmatmul.mubr.msk.bf16.gmra.mrb[12].mxu1 %vm2816_vm8, %v2787_v3  ;;  %3911 = vperm.xlu1 %6486, %v4951_v39  }
 0x28d   : > { %5140 = vmatmul.mubr.msk.bf16.gmra.mrb[28].mxu0 %vm2816_vm8, %v2779_v0  ;;  %2414 = vst.msk [vmem:[#allocation2 + $0x1cb] sm:$0xff] %vm2356_vm4, %v6453_v46  ;;  %2415 = vst.msk [vmem:[#allocation2 + $0x1d3] sm:$0xff] %vm2356_vm4, %v6454_v26  ;;  %5159 = vmatprep.mubr.msk.bf16.mxu1 %vm2816_vm8, %v2788_v47 }
 0x28e   : > { %2432 = vst.msk [vmem:[#allocation2 + $0x1e3] sm:$0xff] %vm2356_vm4, %v6459_v50  ;;  %2431 = vst.msk [vmem:[#allocation2 + $0x1db] sm:$0xff] %vm2356_vm4, %v6458_v40  ;;  %3916 = vperm.xlu0 %6480, %v4954_v52   ;;  %v6462_v60 = vpop.permute.xlu0 %6461  ;;  %v2680_v8 = vpop.permute.xlu1 %2679 }
 0x28f   : > { %v6464_v55 = vunpack.i.h.bf16 %v6462_v60  ;;  %v6463_v49 = vunpack.i.l.bf16 %v6462_v60  ;;  %2694 = vst.msk [vmem:[#allocation2 + $0x1da] sm:$0xff] %vm2619_vm7, %v2680_v8 }
 0x290   : > { %v2753_v27 = vld [vmem:[#allocation2 + $0x1a8] sm:$0xff]  ;;  %3921 = vperm.xlu1 %6486, %v4955_v58   ;;  %v2754_v10 = vld [vmem:[#allocation2 + $0x1b0] sm:$0xff] }
 0x291   : > { %2677 = vst.msk [vmem:[#allocation2 + $0x1ca] sm:$0xff] %vm2619_vm7, %v6463_v49  ;;  %2678 = vst.msk [vmem:[#allocation2 + $0x1d2] sm:$0xff] %vm2619_vm7, %v6464_v55  ;;  %v2790_v17 = vpack.c.bf16 %v2753_v27, %v2752_v35  ;;  %v2755_v11 = vld [vmem:[#allocation2 + $0x1b8] sm:$0xff]  ;;  %v2756_v15 = vld [vmem:[#allocation2 + $0x1c0] sm:$0xff] }
 0x292   : > { %3926 = vperm.xlu0 %6480, %v4958_v48   ;;  %v6467_v6 = vpop.permute.xlu0 %6466  ;;  %v2425_v57 = vpop.permute.xlu1 %2424  ;;  %v2791_v33 = vpack.c.bf16 %v2755_v11, %v2754_v10 }
 0x293   : > { %v6469_v53 = vunpack.i.h.bf16 %v6467_v6  ;;  %v6468_v59 = vunpack.i.l.bf16 %v6467_v6  ;;  %2436 = vst.msk [vmem:[#allocation2 + $0x1fb] sm:$0x1f] %vm2435_vm9, %v2425_v57 }
 0x294   : > { %5160 = vmatmul.mubr.msk.bf16.gmra.mrb[16].mxu1 %vm2816_vm8, %v2789_v4  ;;  %3931 = vperm.xlu1 %6486, %v4959_v54  }
 0x295   : > { %2433 = vst.msk [vmem:[#allocation2 + $0x1eb] sm:$0xff] %vm2356_vm4, %v6468_v59  ;;  %2434 = vst.msk [vmem:[#allocation2 + $0x1f3] sm:$0xff] %vm2356_vm4, %v6469_v53  ;;  %5163 = vmatprep.mubr.msk.bf16.mxu1 %vm2816_vm8, %v2790_v17 }
 0x296   : > { %3936 = vperm.xlu0 %6480, %v4962_v19   ;;  %v6472_v18 = vpop.permute.xlu0 %6471  ;;  %v6477_v25 = vpop.permute.xlu1 %6476 }
 0x297   : > { %v6474_v20 = vunpack.i.h.bf16 %v6472_v18  ;;  %v6473_v22 = vunpack.i.l.bf16 %v6472_v18  ;;  %v6479_v56 = vunpack.i.h.bf16 %v6477_v25  ;;  %v6478_v63 = vunpack.i.l.bf16 %v6477_v25 }
 0x298   : > { %v2757_v24 = vld [vmem:[#allocation2 + $0x1c8] sm:$0xff]  ;;  %3941 = vperm.xlu1 %6486, %v4963_v12   ;;  %v2758_v38 = vld [vmem:[#allocation2 + $0x1d0] sm:$0xff]  ;;  %v2759_v32 = vld [vmem:[#allocation2 + $0x1d8] sm:$0xff] }
 0x299   : > { %2695 = vst.msk [vmem:[#allocation2 + $0x1e2] sm:$0xff] %vm2619_vm7, %v6473_v22  ;;  %2696 = vst.msk [vmem:[#allocation2 + $0x1ea] sm:$0xff] %vm2619_vm7, %v6474_v20  ;;  %v2792_v28 = vpack.c.bf16 %v2757_v24, %v2756_v15  ;;  %v2793_v1 = vpack.c.bf16 %v2759_v32, %v2758_v38 }
 0x29a   : > { %2697 = vst.msk [vmem:[#allocation2 + $0x1f2] sm:$0xff] %vm2619_vm7, %v6478_v63  ;;  %3946 = vperm.xlu0 %6480, %v4966_v14  }
 0x29b   : > { %2699 = vst.msk [vmem:[#allocation2 + $0x1fa] sm:$0x3f] %vm2698_vm10, %v6479_v56 }
 0x29c   : > { %5164 = vmatmul.mubr.msk.bf16.gmra.mrb[20].mxu1 %vm2816_vm8, %v2791_v33  ;;  %3951 = vperm.xlu1 %6486, %v4967_v16  }
 0x29d   : > { %5167 = vmatprep.mubr.msk.bf16.mxu1 %vm2816_vm8, %v2792_v28 }
 0x29e   : > { %3956 = vperm.xlu0 %6480, %v4970_v31  }
 0x2a0   : > { %v2760_v41 = vld [vmem:[#allocation2 + $0x1e0] sm:$0xff]  ;;  %v2761_v30 = vld [vmem:[#allocation2 + $0x1e8] sm:$0xff]  ;;  %3961 = vperm.xlu1 %6486, %v4971_v37  }
 0x2a1   : > { %v2794_v43 = vpack.c.bf16 %v2761_v30, %v2760_v41  ;;  %v2762_v45 = vld [vmem:[#allocation2 + $0x1f0] sm:$0xff] }
 0x2a2   : > { %3966 = vperm.xlu0 %6480, %v4974_v61   ;;  %v2763_v23 = vld [vmem:[#allocation2 + $0x1f8] sm:$0xff] }
 0x2a3   : > { %v2795_v21 = vpack.c.bf16 %v2763_v23, %v2762_v45 }
 0x2a4   : > { %5168 = vmatmul.mubr.msk.bf16.gmra.mrb[24].mxu1 %vm2816_vm8, %v2793_v1  ;;  %3971 = vperm.xlu1 %6486, %v4975_v34  }
 0x2a5   : > { %5171 = vmatprep.mubr.msk.bf16.mxu1 %vm2816_vm8, %v2794_v43 }
 0x2a7   : > { %v3667_v44 = vpop.permute.xlu1 %3666  ;;  %v6483_v0 = vpop.permute.xlu0 %6482 }
 0x2a8   : > { %v6484_v49 = vunpack.i.l.bf16 %v6483_v0  ;;  %v6485_v7 = vunpack.i.h.bf16 %v6483_v0 }
 0x2ab   : > { %v3672_v3 = vpop.permute.xlu1 %3671  ;;  %v3677_v42 = vpop.permute.xlu0 %3676 }
 0x2ac   : > { %5172 = vmatmul.mubr.msk.bf16.gmra.mrb[28].mxu1 %vm2816_vm8, %v2795_v21 }
 0x2af   : > { %v3682_v39 = vpop.permute.xlu1 %3681  ;;  %v3687_v47 = vpop.permute.xlu0 %3686 }
 0x2b3   : > { %v3692_v29 = vpop.permute.xlu1 %3691  ;;  %v8130_v51 = vpop.permute.xlu0 %3696 }
 0x2b7   : > { %v8132_v52 = vpop.permute.xlu1 %3701  ;;  %v8134_v26 = vpop.permute.xlu0 %3706 }
 0x2bb   : > { %v8136_v46 = vpop.permute.xlu1 %3711  ;;  %v8138_v50 = vpop.permute.xlu0 %3716 }
 0x2bf   : > { %v8140_v40 = vpop.permute.xlu1 %3721  ;;  %v8142_v62 = vpop.permute.xlu0 %3726 }
 0x2c3   : > { %v8144_v2 = vpop.permute.xlu1 %3731  ;;  %v8146_v5 = vpop.permute.xlu0 %3736 }
 0x2c7   : > { %v8148_v58 = vpop.permute.xlu1 %3741  ;;  %v8150_v60 = vpop.permute.xlu0 %3746 }
 0x2cb   : > { %v8152_v8 = vpop.permute.xlu1 %3751  ;;  %v8154_v48 = vpop.permute.xlu0 %3756 }
 0x2cf   : > { %v8156_v35 = vpop.permute.xlu1 %3761  ;;  %v8158_v55 = vpop.permute.xlu0 %3766 }
 0x2d3   : > { %v8160_v4 = vpop.permute.xlu1 %3771 }
 0x2d4   : > { %v8162_v54 = vpop.permute.xlu0 %3776 }
 0x2d7   : > { %v8172_v11 = vpop.permute.xlu1 %3781 }
 0x2d8   : > { %v8175_v15 = vpop.permute.xlu0 %3786 }
 0x2db   : > { %v8177_v32 = vpop.permute.xlu1 %3791 }
 0x2dc   : > { %v8179_v30 = vpop.permute.xlu0 %3796 }
 0x328   : > { %v5113_v27 = vpop.f32.mrb[0].mxu0 }
 0x329   : > { %v2951_v17 = vpop.f32.mrb[1].mxu0  ;;  %v3976_v59 = vmul.f32 %v5113_v27, %v3667_v44 }
 0x32a   : > { %v3974_v6 = vmul.f32 %v6484_v49, %v2951_v17  ;;  %v5114_v57 = vpop.f32.mrb[2].mxu0 }
 0x32b   : > { %v4696_v19 = vpack.c.bf16 %v5114_v57, %v5113_v27  ;;  %v2954_v53 = vpop.f32.mrb[3].mxu0  ;;  %v3977_v18 = vmul.f32 %v5114_v57, %v3672_v3  ;;  %v4110_v20 = vmul.f32 %v5113_v27, %v3976_v59  ;;  %v8183_v27 = vpop.permute.xlu1 %3801 }
 0x32c   : > { %v4691_v9 = vpack.c.bf16 %v2954_v53, %v2951_v17  ;;  %v3975_v10 = vmul.f32 %v6485_v7, %v2954_v53  ;;  %v4108_v12 = vmul.f32 %v3974_v6, %v2951_v17 }
 0x32d   : > { %5008 = vst [vmem:[%s8169_s9 + $0x8] sm:$0xff] %v4696_v19   ;;  %v4111_v33 = vmul.f32 %v5114_v57, %v3977_v18 }
 0x32e   : > { %4692 = vst [vmem:[%s8169_s9] sm:$0xff] %v4691_v9   ;;  %v4038_v25 = vadd.f32 %v3975_v10, %v3974_v6  ;;  %v4109_v14 = vmul.f32 %v3975_v10, %v2954_v53 }
 0x330   : > { %v4039_v22 = vadd.f32 %v4038_v25, %v3976_v59  ;;  %v4172_v56 = vadd.f32 %v4109_v14, %v4108_v12  ;;  %v5117_v63 = vpop.f32.mrb[4].mxu0 }
 0x331   : > { %v2967_v13 = vpop.f32.mrb[5].mxu0  ;;  %v3980_v34 = vmul.f32 %v5117_v63, %v3687_v47  ;;  %v8186_v47 = vpop.permute.xlu0 %3806 }
 0x332   : > { %v4173_v24 = vadd.f32 %v4172_v56, %v4110_v20  ;;  %v3978_v16 = vmul.f32 %v3677_v42, %v2967_v13  ;;  %v4040_v28 = vadd.f32 %v4039_v22, %v3977_v18  ;;  %v5118_v31 = vpop.f32.mrb[6].mxu0  ;;  %v8193_v56 = vpop.permute.xlu1 %3811 }
 0x333   : > { %v4706_v36 = vpack.c.bf16 %v5118_v31, %v5117_v63  ;;  %v2970_v38 = vpop.f32.mrb[7].mxu0  ;;  %v3981_v23 = vmul.f32 %v5118_v31, %v3692_v29  ;;  %v4114_v3 = vmul.f32 %v5117_v63, %v3980_v34 }
 0x334   : > { %v4041_v37 = vadd.f32 %v4040_v28, %v3978_v16  ;;  %v4112_v61 = vmul.f32 %v3978_v16, %v2967_v13  ;;  %v4174_v1 = vadd.f32 %v4173_v24, %v4111_v33  ;;  %v4701_v41 = vpack.c.bf16 %v2970_v38, %v2967_v13 }
 0x335   : > { %5010 = vst [vmem:[%s8169_s9 + $0x18] sm:$0xff] %v4706_v36   ;;  %v3979_v43 = vmul.f32 %v3682_v39, %v2970_v38  ;;  %v4115_v39 = vmul.f32 %v5118_v31, %v3981_v23  ;;  %v8195_v13 = vpop.permute.xlu0 %3816 }
 0x336   : > { %v4175_v45 = vadd.f32 %v4174_v1, %v4112_v61  ;;  %5009 = vst [vmem:[%s8169_s9 + $0x10] sm:$0xff] %v4701_v41  }
 0x337   : > { %v4042_v21 = vadd.f32 %v4041_v37, %v3979_v43  ;;  %v4113_v44 = vmul.f32 %v3979_v43, %v2970_v38 }
 0x338   : > { %v5121_v0 = vpop.f32.mrb[8].mxu0 }
 0x339   : > { %v4043_v42 = vadd.f32 %v4042_v21, %v3980_v34  ;;  %v4176_v49 = vadd.f32 %v4175_v45, %v4113_v44  ;;  %v2983_v7 = vpop.f32.mrb[9].mxu0  ;;  %v3984_v12 = vmul.f32 %v5121_v0, %v8134_v26  ;;  %v8202_v21 = vpop.permute.xlu1 %3821 }
 0x33a   : > { %v3982_v17 = vmul.f32 %v8130_v51, %v2983_v7  ;;  %v5122_v6 = vpop.f32.mrb[10].mxu0 }
 0x33b   : > { %v4177_v57 = vadd.f32 %v4176_v49, %v4114_v3  ;;  %v4044_v19 = vadd.f32 %v4043_v42, %v3981_v23  ;;  %v4716_v29 = vpack.c.bf16 %v5122_v6, %v5121_v0  ;;  %v2986_v53 = vpop.f32.mrb[11].mxu0  ;;  %v3985_v20 = vmul.f32 %v5122_v6, %v8136_v46 }
 0x33c   : > { %v4116_v59 = vmul.f32 %v3982_v17, %v2983_v7  ;;  %v4711_v9 = vpack.c.bf16 %v2986_v53, %v2983_v7  ;;  %v3983_v10 = vmul.f32 %v8132_v52, %v2986_v53  ;;  %v4118_v33 = vmul.f32 %v5121_v0, %v3984_v12 }
 0x33d   : > { %v4045_v18 = vadd.f32 %v4044_v19, %v3982_v17  ;;  %v4178_v25 = vadd.f32 %v4177_v57, %v4115_v39  ;;  %5012 = vst [vmem:[%s8169_s9 + $0x28] sm:$0xff] %v4716_v29   ;;  %v4119_v31 = vmul.f32 %v5122_v6, %v3985_v20 }
 0x33e   : > { %5011 = vst [vmem:[%s8169_s9 + $0x20] sm:$0xff] %v4711_v9   ;;  %v4117_v14 = vmul.f32 %v3983_v10, %v2986_v53 }
 0x33f   : > { %v4179_v51 = vadd.f32 %v4178_v25, %v4116_v59  ;;  %v4046_v22 = vadd.f32 %v4045_v18, %v3983_v10 }
 0x340   : > { %v5125_v63 = vpop.f32.mrb[12].mxu0 }
 0x341   : > { %v4047_v24 = vadd.f32 %v4046_v22, %v3984_v12  ;;  %v4180_v52 = vadd.f32 %v4179_v51, %v4117_v14  ;;  %v2999_v26 = vpop.f32.mrb[13].mxu0  ;;  %v3988_v34 = vmul.f32 %v5125_v63, %v8142_v62 }
 0x342   : > { %v3986_v16 = vmul.f32 %v8138_v50, %v2999_v26  ;;  %v5126_v28 = vpop.f32.mrb[14].mxu0  ;;  %v8204_v50 = vpop.permute.xlu0 %3826 }
 0x343   : > { %v4181_v36 = vadd.f32 %v4180_v52, %v4118_v33  ;;  %v4048_v38 = vadd.f32 %v4047_v24, %v3985_v20  ;;  %v4726_v37 = vpack.c.bf16 %v5126_v28, %v5125_v63  ;;  %v3002_v46 = vpop.f32.mrb[15].mxu0  ;;  %v3989_v0 = vmul.f32 %v5126_v28, %v8144_v2 }
 0x344   : > { %v4120_v61 = vmul.f32 %v3986_v16, %v2999_v26  ;;  %v4721_v1 = vpack.c.bf16 %v3002_v46, %v2999_v26  ;;  %v3987_v41 = vmul.f32 %v8140_v40, %v3002_v46  ;;  %v4122_v7 = vmul.f32 %v5125_v63, %v3988_v34  ;;  %v8223_v63 = vpop.permute.xlu1 %3831 }
 0x345   : > { %v4049_v43 = vadd.f32 %v4048_v38, %v3986_v16  ;;  %v4182_v45 = vadd.f32 %v4181_v36, %v4119_v31  ;;  %5014 = vst [vmem:[%s8169_s9 + $0x38] sm:$0xff] %v4726_v37   ;;  %v4123_v29 = vmul.f32 %v5126_v28, %v3989_v0 }
 0x346   : > { %5013 = vst [vmem:[%s8169_s9 + $0x30] sm:$0xff] %v4721_v1   ;;  %v4121_v23 = vmul.f32 %v3987_v41, %v3002_v46  ;;  %v8225_v33 = vpop.permute.xlu0 %3836 }
 0x347   : > { %v4183_v44 = vadd.f32 %v4182_v45, %v4120_v61  ;;  %v4050_v3 = vadd.f32 %v4049_v43, %v3987_v41  ;;  %v8207_v49 = vpop.f32.mrb[0].mxu1 }
 0x348   : > { %v5129_v42 = vpop.f32.mrb[16].mxu0  ;;  %v8209_v6 = vpop.f32.mrb[1].mxu1 }
 0x349   : > { %v4051_v40 = vadd.f32 %v4050_v3, %v3988_v34  ;;  %v4184_v17 = vadd.f32 %v4183_v44, %v4121_v23  ;;  %v3015_v62 = vpop.f32.mrb[17].mxu0  ;;  %v8212_v19 = vpop.f32.mrb[2].mxu1 }
 0x34a   : > { %v3990_v39 = vmul.f32 %v8146_v5, %v3015_v62  ;;  %v5130_v57 = vpop.f32.mrb[18].mxu0  ;;  %v8214_v9 = vpop.f32.mrb[3].mxu1  ;;  %v4776_v14 = vpack.c.bf16 %v8212_v19, %v8207_v49  ;;  %v3992_v5 = vmul.f32 %v5129_v42, %v8150_v60 }
 0x34b   : > { %v4185_v53 = vadd.f32 %v4184_v17, %v4122_v7  ;;  %v4052_v59 = vadd.f32 %v4051_v40, %v3989_v0  ;;  %v3018_v2 = vpop.f32.mrb[19].mxu0  ;;  %v4736_v12 = vpack.c.bf16 %v5130_v57, %v5129_v42  ;;  %v4771_v22 = vpack.c.bf16 %v8214_v9, %v8209_v6 }
 0x34c   : > { %v4124_v10 = vmul.f32 %v3990_v39, %v3015_v62  ;;  %v4731_v51 = vpack.c.bf16 %v3018_v2, %v3015_v62  ;;  %v3991_v20 = vmul.f32 %v8148_v58, %v3018_v2  ;;  %5024 = vst [vmem:[%s8169_s9 + $0x88] sm:$0xff] %v4776_v14   ;;  %v3993_v52 = vmul.f32 %v5130_v57, %v8152_v8  ;;  %v8247_v62 = vpop.permute.xlu1 %3841 }
 0x34d   : > { %v4053_v18 = vadd.f32 %v4052_v59, %v3990_v39  ;;  %v4186_v25 = vadd.f32 %v4185_v53, %v4123_v29  ;;  %5016 = vst [vmem:[%s8169_s9 + $0x48] sm:$0xff] %v4736_v12   ;;  %5023 = vst [vmem:[%s8169_s9 + $0x80] sm:$0xff] %v4771_v22   ;;  %v4126_v36 = vmul.f32 %v5129_v42, %v3992_v5  ;;  %v8249_v39 = vpop.permute.xlu0 %3846 }
 0x34e   : > { %5015 = vst [vmem:[%s8169_s9 + $0x40] sm:$0xff] %v4731_v51   ;;  %v4125_v16 = vmul.f32 %v3991_v20, %v3018_v2  ;;  %v4127_v43 = vmul.f32 %v5130_v57, %v3993_v52 }
 0x34f   : > { %v4187_v24 = vadd.f32 %v4186_v25, %v4124_v10  ;;  %v4054_v26 = vadd.f32 %v4053_v18, %v3991_v20  ;;  %v8231_v28 = vpop.f32.mrb[4].mxu1 }
 0x350   : > { %v5133_v60 = vpop.f32.mrb[20].mxu0  ;;  %v8233_v58 = vpop.f32.mrb[5].mxu1 }
 0x351   : > { %v3031_v31 = vpop.f32.mrb[21].mxu0  ;;  %v4055_v38 = vadd.f32 %v4054_v26, %v3992_v5  ;;  %v4188_v37 = vadd.f32 %v4187_v24, %v4125_v16  ;;  %v8236_v1 = vpop.f32.mrb[6].mxu1  ;;  %v3996_v0 = vmul.f32 %v5133_v60, %v8158_v55 }
 0x352   : > { %v3994_v46 = vmul.f32 %v8154_v48, %v3031_v31  ;;  %v5134_v61 = vpop.f32.mrb[22].mxu0  ;;  %v8238_v34 = vpop.f32.mrb[7].mxu1  ;;  %v4786_v48 = vpack.c.bf16 %v8236_v1, %v8231_v28 }
 0x353   : > { %v4746_v8 = vpack.c.bf16 %v5134_v61, %v5133_v60  ;;  %v3034_v41 = vpop.f32.mrb[23].mxu0  ;;  %v4189_v45 = vadd.f32 %v4188_v37, %v4126_v36  ;;  %v4056_v23 = vadd.f32 %v4055_v38, %v3993_v52  ;;  %v4781_v17 = vpack.c.bf16 %v8238_v34, %v8233_v58 }
 0x354   : > { %v4128_v44 = vmul.f32 %v3994_v46, %v3031_v31  ;;  %v4741_v3 = vpack.c.bf16 %v3034_v41, %v3031_v31  ;;  %v3995_v40 = vmul.f32 %v8156_v35, %v3034_v41  ;;  %5026 = vst [vmem:[%s8169_s9 + $0x98] sm:$0xff] %v4786_v48   ;;  %v3997_v57 = vmul.f32 %v5134_v61, %v8160_v4 }
 0x355   : > { %5018 = vst [vmem:[%s8169_s9 + $0x58] sm:$0xff] %v4746_v8   ;;  %v4057_v42 = vadd.f32 %v4056_v23, %v3994_v46  ;;  %v4190_v7 = vadd.f32 %v4189_v45, %v4127_v43  ;;  %5025 = vst [vmem:[%s8169_s9 + $0x90] sm:$0xff] %v4781_v17   ;;  %v4130_v12 = vmul.f32 %v5133_v60, %v3996_v0  ;;  %v8271_v8 = vpop.permute.xlu1 %3851 }
 0x356   : > { %5017 = vst [vmem:[%s8169_s9 + $0x50] sm:$0xff] %v4741_v3   ;;  %v4129_v53 = vmul.f32 %v3995_v40, %v3034_v41  ;;  %v4131_v24 = vmul.f32 %v5134_v61, %v3997_v57  ;;  %v8273_v61 = vpop.permute.xlu0 %3856 }
 0x357   : > { %v4191_v55 = vadd.f32 %v4190_v7, %v4128_v44  ;;  %v4058_v29 = vadd.f32 %v4057_v42, %v3995_v40  ;;  %v8255_v2 = vpop.f32.mrb[8].mxu1 }
 0x358   : > { %v5137_v59 = vpop.f32.mrb[24].mxu0  ;;  %v8257_v35 = vpop.f32.mrb[9].mxu1 }
 0x359   : > { %v3047_v10 = vpop.f32.mrb[25].mxu0  ;;  %v4059_v18 = vadd.f32 %v4058_v29, %v3996_v0  ;;  %v4192_v25 = vadd.f32 %v4191_v55, %v4129_v53  ;;  %v8260_v51 = vpop.f32.mrb[10].mxu1  ;;  %v4000_v31 = vmul.f32 %v5137_v59, %v8175_v15 }
 0x35a   : > { %v3998_v14 = vmul.f32 %v8162_v54, %v3047_v10  ;;  %v5138_v5 = vpop.f32.mrb[26].mxu0  ;;  %v8262_v22 = vpop.f32.mrb[11].mxu1  ;;  %v4796_v54 = vpack.c.bf16 %v8260_v51, %v8255_v2 }
 0x35b   : > { %v4756_v20 = vpack.c.bf16 %v5138_v5, %v5137_v59  ;;  %v3050_v4 = vpop.f32.mrb[27].mxu0  ;;  %v4193_v52 = vadd.f32 %v4192_v25, %v4130_v12  ;;  %v4060_v26 = vadd.f32 %v4059_v18, %v3997_v57  ;;  %v4791_v46 = vpack.c.bf16 %v8262_v22, %v8257_v35  ;;  %v8288_v18 = vpop.permute.xlu1 %3861 }
 0x35c   : > { %v4132_v16 = vmul.f32 %v3998_v14, %v3047_v10  ;;  %v4751_v60 = vpack.c.bf16 %v3050_v4, %v3047_v10  ;;  %v3999_v37 = vmul.f32 %v8172_v11, %v3050_v4  ;;  %5028 = vst [vmem:[%s8169_s9 + $0xa8] sm:$0xff] %v4796_v54   ;;  %v4001_v41 = vmul.f32 %v5138_v5, %v8177_v32 }
 0x35d   : > { %5020 = vst [vmem:[%s8169_s9 + $0x68] sm:$0xff] %v4756_v20   ;;  %v4061_v36 = vadd.f32 %v4060_v26, %v3998_v14  ;;  %v4194_v38 = vadd.f32 %v4193_v52, %v4131_v24  ;;  %5027 = vst [vmem:[%s8169_s9 + $0xa0] sm:$0xff] %v4791_v46   ;;  %v4134_v48 = vmul.f32 %v5137_v59, %v4000_v31 }
 0x35e   : > { %5019 = vst [vmem:[%s8169_s9 + $0x60] sm:$0xff] %v4751_v60   ;;  %v4133_v45 = vmul.f32 %v3999_v37, %v3050_v4  ;;  %v4135_v29 = vmul.f32 %v5138_v5, %v4001_v41  ;;  %v4007_v46 = vmul.f32 %v8202_v21, %v8214_v9 }
 0x35f   : > { %v4195_v15 = vadd.f32 %v4194_v38, %v4132_v16  ;;  %v4062_v43 = vadd.f32 %v4061_v36, %v3999_v37  ;;  %v8279_v44 = vpop.f32.mrb[12].mxu1 }
 0x360   : > { %v5141_v23 = vpop.f32.mrb[28].mxu0  ;;  %v8281_v11 = vpop.f32.mrb[13].mxu1 }
 0x361   : > { %v3063_v0 = vpop.f32.mrb[29].mxu0  ;;  %v4063_v3 = vadd.f32 %v4062_v43, %v4000_v31  ;;  %v4196_v42 = vadd.f32 %v4195_v15, %v4133_v45  ;;  %v8284_v17 = vpop.f32.mrb[14].mxu1  ;;  %v4004_v59 = vmul.f32 %v5141_v23, %v8186_v47 }
 0x362   : > { %v4002_v7 = vmul.f32 %v8179_v30, %v3063_v0  ;;  %v5142_v40 = vpop.f32.mrb[30].mxu0  ;;  %v8286_v57 = vpop.f32.mrb[15].mxu1  ;;  %v4806_v30 = vpack.c.bf16 %v8284_v17, %v8279_v44 }
 0x363   : > { %v4766_v55 = vpack.c.bf16 %v5142_v40, %v5141_v23  ;;  %v3066_v32 = vpop.f32.mrb[31].mxu0  ;;  %v4197_v53 = vadd.f32 %v4196_v42, %v4134_v48  ;;  %v4064_v10 = vadd.f32 %v4063_v3, %v4001_v41  ;;  %v4801_v5 = vpack.c.bf16 %v8286_v57, %v8281_v11  ;;  %v8303_v31 = vpop.permute.xlu0 %3866 }
 0x364   : > { %v4136_v12 = vmul.f32 %v4002_v7, %v3063_v0  ;;  %v4761_v25 = vpack.c.bf16 %v3066_v32, %v3063_v0  ;;  %v4003_v4 = vmul.f32 %v8183_v27, %v3066_v32  ;;  %5030 = vst [vmem:[%s8169_s9 + $0xb8] sm:$0xff] %v4806_v30   ;;  %v4005_v52 = vmul.f32 %v5142_v40, %v8193_v56  ;;  %v8311_v56 = vpop.permute.xlu1 %3871 }
 0x365   : > { %5022 = vst [vmem:[%s8169_s9 + $0x78] sm:$0xff] %v4766_v55   ;;  %v4065_v14 = vadd.f32 %v4064_v10, %v4002_v7  ;;  %v4198_v20 = vadd.f32 %v4197_v53, %v4135_v29  ;;  %5029 = vst [vmem:[%s8169_s9 + $0xb0] sm:$0xff] %v4801_v5   ;;  %v4006_v27 = vmul.f32 %v8195_v13, %v8209_v6 }
 0x366   : > { %5021 = vst [vmem:[%s8169_s9 + $0x70] sm:$0xff] %v4761_v25   ;;  %v4137_v16 = vmul.f32 %v4003_v4, %v3066_v32  ;;  %v4138_v60 = vmul.f32 %v5141_v23, %v4004_v59  ;;  %v4139_v43 = vmul.f32 %v5142_v40, %v4005_v52  ;;  %v4008_v23 = vmul.f32 %v8207_v49, %v8204_v50 }
 0x367   : > { %v4199_v24 = vadd.f32 %v4198_v20, %v4136_v12  ;;  %v4066_v26 = vadd.f32 %v4065_v14, %v4003_v4  ;;  %v8301_v47 = vpop.f32.mrb[16].mxu1  ;;  %v4140_v48 = vmul.f32 %v4006_v27, %v8209_v6  ;;  %v3877_v21 = vpop.permute.xlu0 %3876  ;;  %v4009_v7 = vmul.f32 %v8212_v19, %v8223_v63 }
 0x368   : > { %v8305_v54 = vpop.f32.mrb[17].mxu1  ;;  %v4141_v40 = vmul.f32 %v4007_v46, %v8214_v9  ;;  %v8331_v53 = vpop.permute.xlu1 %3881  ;;  %v4142_v50 = vmul.f32 %v8207_v49, %v4008_v23  ;;  %v4010_v6 = vmul.f32 %v8225_v33, %v8233_v58  ;;  %v4011_v14 = vmul.f32 %v8247_v62, %v8238_v34 }
 0x369   : > { %v4067_v36 = vadd.f32 %v4066_v26, %v4004_v59  ;;  %v4200_v38 = vadd.f32 %v4199_v24, %v4137_v16  ;;  %v8309_v37 = vpop.f32.mrb[18].mxu1  ;;  %v4143_v9 = vmul.f32 %v8212_v19, %v4009_v7  ;;  %v4012_v5 = vmul.f32 %v8231_v28, %v8249_v39 }
 0x36a   : > { %v4816_v15 = vpack.c.bf16 %v8309_v37, %v8301_v47  ;;  %v8317_v41 = vpop.f32.mrb[19].mxu1  ;;  %v4144_v19 = vmul.f32 %v4010_v6, %v8233_v58  ;;  %v4013_v16 = vmul.f32 %v8236_v1, %v8271_v8  ;;  %v4145_v62 = vmul.f32 %v4011_v14, %v8238_v34 }
 0x36b   : > { %v4068_v45 = vadd.f32 %v4067_v36, %v4005_v52  ;;  %v4201_v0 = vadd.f32 %v4200_v38, %v4138_v60  ;;  %v4811_v13 = vpack.c.bf16 %v8317_v41, %v8305_v54  ;;  %v3887_v4 = vpop.permute.xlu0 %3886  ;;  %v4146_v39 = vmul.f32 %v8231_v28, %v4012_v5 }
 0x36c   : > { %5032 = vst [vmem:[%s8169_s9 + $0xc8] sm:$0xff] %v4816_v15   ;;  %v3892_v26 = vpop.permute.xlu1 %3891  ;;  %v4014_v58 = vmul.f32 %v8273_v61, %v8257_v35  ;;  %v4147_v34 = vmul.f32 %v8236_v1, %v4013_v16 }
 0x36d   : > { %v4069_v3 = vadd.f32 %v4068_v45, %v4006_v27  ;;  %v4202_v42 = vadd.f32 %v4201_v0, %v4139_v43  ;;  %5031 = vst [vmem:[%s8169_s9 + $0xc0] sm:$0xff] %v4811_v13   ;;  %v4015_v13 = vmul.f32 %v8288_v18, %v8262_v22 }
 0x36e   : > { %v4148_v1 = vmul.f32 %v4014_v58, %v8257_v35  ;;  %v4018_v35 = vmul.f32 %v3877_v21, %v8281_v11 }
 0x36f   : > { %v4070_v55 = vadd.f32 %v4069_v3, %v4007_v46  ;;  %v4203_v32 = vadd.f32 %v4202_v42, %v4140_v48  ;;  %v8329_v29 = vpop.f32.mrb[20].mxu1  ;;  %v3897_v8 = vpop.permute.xlu0 %3896  ;;  %v4016_v3 = vmul.f32 %v8255_v2, %v8303_v31  ;;  %v4149_v18 = vmul.f32 %v4015_v13, %v8262_v22 }
 0x370   : > { %v8333_v10 = vpop.f32.mrb[21].mxu1  ;;  %v3902_v48 = vpop.permute.xlu1 %3901 }
 0x371   : > { %v4071_v12 = vadd.f32 %v4070_v55, %v4008_v23  ;;  %v4204_v59 = vadd.f32 %v4203_v32, %v4141_v40  ;;  %v8338_v63 = vpop.f32.mrb[22].mxu1  ;;  %v4017_v40 = vmul.f32 %v8260_v51, %v8311_v56  ;;  %v4150_v31 = vmul.f32 %v8255_v2, %v4016_v3 }
 0x372   : > { %v4826_v30 = vpack.c.bf16 %v8338_v63, %v8329_v29  ;;  %v8343_v25 = vpop.f32.mrb[23].mxu1 }
 0x373   : > { %v4072_v20 = vadd.f32 %v4071_v12, %v4009_v7  ;;  %v4205_v49 = vadd.f32 %v4204_v59, %v4142_v50  ;;  %v4821_v33 = vpack.c.bf16 %v8343_v25, %v8333_v10  ;;  %v4151_v22 = vmul.f32 %v8260_v51, %v4017_v40 }
 0x374   : > { %5034 = vst [vmem:[%s8169_s9 + $0xd8] sm:$0xff] %v4826_v30   ;;  %v3912_v56 = vpop.permute.xlu1 %3911 }
 0x375   : > { %v4073_v24 = vadd.f32 %v4072_v20, %v4010_v6  ;;  %v4206_v52 = vadd.f32 %v4205_v49, %v4143_v9  ;;  %5033 = vst [vmem:[%s8169_s9 + $0xd0] sm:$0xff] %v4821_v33   ;;  %v3907_v6 = vpop.permute.xlu0 %3906  ;;  %v4019_v49 = vmul.f32 %v8331_v53, %v8286_v57 }
 0x377   : > { %v4074_v27 = vadd.f32 %v4073_v24, %v4011_v14  ;;  %v4207_v60 = vadd.f32 %v4206_v52, %v4144_v19  ;;  %v8357_v36 = vpop.f32.mrb[24].mxu1  ;;  %v4152_v19 = vmul.f32 %v4018_v35, %v8281_v11 }
 0x378   : > { %v8359_v38 = vpop.f32.mrb[25].mxu1 }
 0x379   : > { %v4208_v46 = vadd.f32 %v4207_v60, %v4145_v62  ;;  %v4075_v15 = vadd.f32 %v4074_v27, %v4012_v5  ;;  %v8364_v43 = vpop.f32.mrb[26].mxu1  ;;  %v4020_v5 = vmul.f32 %v8279_v44, %v3887_v4  ;;  %v3917_v52 = vpop.permute.xlu0 %3916  ;;  %v4153_v27 = vmul.f32 %v4019_v49, %v8286_v57 }
 0x37a   : > { %v4836_v45 = vpack.c.bf16 %v8364_v43, %v8357_v36  ;;  %v8369_v0 = vpop.f32.mrb[27].mxu1  ;;  %v3922_v60 = vpop.permute.xlu1 %3921 }
 0x37b   : > { %v4076_v28 = vadd.f32 %v4075_v15, %v4013_v16  ;;  %v4209_v23 = vadd.f32 %v4208_v46, %v4146_v39  ;;  %v4831_v61 = vpack.c.bf16 %v8369_v0, %v8359_v38  ;;  %v4021_v16 = vmul.f32 %v8284_v17, %v3892_v26 }
 0x37c   : > { %5036 = vst [vmem:[%s8169_s9 + $0xe8] sm:$0xff] %v4836_v45   ;;  %v4154_v39 = vmul.f32 %v8279_v44, %v4020_v5  ;;  %v4022_v15 = vmul.f32 %v3897_v8, %v8305_v54  ;;  %v4023_v45 = vmul.f32 %v3902_v48, %v8317_v41  ;;  %v4024_v26 = vmul.f32 %v8301_v47, %v3907_v6 }
 0x37d   : > { %v4077_v42 = vadd.f32 %v4076_v28, %v4014_v58  ;;  %v4210_v7 = vadd.f32 %v4209_v23, %v4147_v34  ;;  %5035 = vst [vmem:[%s8169_s9 + $0xe0] sm:$0xff] %v4831_v61   ;;  %v4155_v4 = vmul.f32 %v8284_v17, %v4021_v16  ;;  %v4025_v44 = vmul.f32 %v8309_v37, %v3912_v56 }
 0x37e   : > { %v4156_v57 = vmul.f32 %v4022_v15, %v8305_v54  ;;  %v3932_v61 = vpop.permute.xlu1 %3931  ;;  %v4157_v8 = vmul.f32 %v4023_v45, %v8317_v41  ;;  %v4158_v17 = vmul.f32 %v8301_v47, %v4024_v26  ;;  %v4026_v48 = vmul.f32 %v3917_v52, %v8333_v10 }
 0x37f   : > { %v4078_v55 = vadd.f32 %v4077_v42, %v4015_v13  ;;  %v4211_v32 = vadd.f32 %v4210_v7, %v4148_v1  ;;  %v8383_v50 = vpop.f32.mrb[28].mxu1  ;;  %v3927_v13 = vpop.permute.xlu0 %3926  ;;  %v4027_v54 = vmul.f32 %v3922_v60, %v8343_v25  ;;  %v4029_v47 = vmul.f32 %v8338_v63, %v3932_v61 }
 0x380   : > { %v8385_v12 = vpop.f32.mrb[29].mxu1 }
 0x381   : > { %v4079_v59 = vadd.f32 %v4078_v55, %v4016_v3  ;;  %v4212_v9 = vadd.f32 %v4211_v32, %v4149_v18  ;;  %v8389_v30 = vpop.f32.mrb[30].mxu1  ;;  %v4159_v18 = vmul.f32 %v8309_v37, %v4025_v44 }
 0x382   : > { %v4846_v14 = vpack.c.bf16 %v8389_v30, %v8383_v50  ;;  %v8394_v20 = vpop.f32.mrb[31].mxu1  ;;  %v3942_v6 = vpop.permute.xlu1 %3941 }
 0x383   : > { %v4080_v33 = vadd.f32 %v4079_v59, %v4017_v40  ;;  %v4213_v2 = vadd.f32 %v4212_v9, %v4150_v31  ;;  %v4841_v21 = vpack.c.bf16 %v8394_v20, %v8385_v12  ;;  %v3937_v40 = vpop.permute.xlu0 %3936  ;;  %v4028_v31 = vmul.f32 %v8329_v29, %v3927_v13 }
 0x384   : > { %5038 = vst [vmem:[%s8169_s9 + $0xf8] sm:$0xff] %v4846_v14   ;;  %v4160_v59 = vmul.f32 %v4026_v48, %v8333_v10  ;;  %v4031_v10 = vmul.f32 %v3942_v6, %v8369_v0 }
 0x385   : > { %v4081_v24 = vadd.f32 %v4080_v33, %v4018_v35  ;;  %v4214_v51 = vadd.f32 %v4213_v2, %v4151_v22  ;;  %5037 = vst [vmem:[%s8169_s9 + $0xf0] sm:$0xff] %v4841_v21   ;;  %v4161_v22 = vmul.f32 %v4027_v54, %v8343_v25  ;;  %v4162_v37 = vmul.f32 %v8329_v29, %v4028_v31 }
 0x386   : > { %v4030_v2 = vmul.f32 %v3937_v40, %v8359_v38  ;;  %v3952_v21 = vpop.permute.xlu1 %3951  ;;  %v4165_v60 = vmul.f32 %v4031_v10, %v8369_v0 }
 0x387   : > { %v4082_v62 = vadd.f32 %v4081_v24, %v4019_v49  ;;  %v4215_v53 = vadd.f32 %v4214_v51, %v4152_v19  ;;  %v3947_v14 = vpop.permute.xlu0 %3946  ;;  %v4033_v29 = vmul.f32 %v8364_v43, %v3952_v21 }
 0x388   : > { %v4032_v51 = vmul.f32 %v8357_v36, %v3947_v14 }
 0x389   : > { %v4083_v58 = vadd.f32 %v4082_v62, %v4020_v5  ;;  %v4216_v46 = vadd.f32 %v4215_v53, %v4153_v27  ;;  %v4163_v5 = vmul.f32 %v8338_v63, %v4029_v47 }
 0x38a   : > { %v4166_v63 = vmul.f32 %v8357_v36, %v4032_v51 }
 0x38b   : > { %v4217_v11 = vadd.f32 %v4216_v46, %v4154_v39  ;;  %v4084_v34 = vadd.f32 %v4083_v58, %v4021_v16  ;;  %v4164_v16 = vmul.f32 %v4030_v2, %v8359_v38  ;;  %v3957_v62 = vpop.permute.xlu0 %3956  ;;  %v3962_v39 = vpop.permute.xlu1 %3961 }
 0x38c   : > { %v4035_v38 = vmul.f32 %v3962_v39, %v8394_v20 }
 0x38d   : > { %v4085_v28 = vadd.f32 %v4084_v34, %v4022_v15  ;;  %v4218_v23 = vadd.f32 %v4217_v11, %v4155_v4  ;;  %v4034_v15 = vmul.f32 %v3957_v62, %v8385_v12  ;;  %v4167_v4 = vmul.f32 %v8364_v43, %v4033_v29 }
 0x38e   : > { %v4169_v43 = vmul.f32 %v4035_v38, %v8394_v20 }
 0x38f   : > { %v4219_v3 = vadd.f32 %v4218_v23, %v4156_v57  ;;  %v4086_v1 = vadd.f32 %v4085_v28, %v4023_v45  ;;  %v3967_v45 = vpop.permute.xlu0 %3966  ;;  %v4168_v0 = vmul.f32 %v4034_v15, %v8385_v12  ;;  %v3972_v57 = vpop.permute.xlu1 %3971 }
 0x390   : > { %v4036_v13 = vmul.f32 %v8383_v50, %v3967_v45  ;;  %v4037_v23 = vmul.f32 %v8389_v30, %v3972_v57 }
 0x391   : > { %v4087_v42 = vadd.f32 %v4086_v1, %v4024_v26  ;;  %v4220_v7 = vadd.f32 %v4219_v3, %v4157_v8 }
 0x392   : > { %v4170_v3 = vmul.f32 %v8383_v50, %v4036_v13  ;;  %v4171_v8 = vmul.f32 %v8389_v30, %v4037_v23 }
 0x393   : > { %v4221_v55 = vadd.f32 %v4220_v7, %v4158_v17  ;;  %v4088_v32 = vadd.f32 %v4087_v42, %v4025_v44 }
 0x395   : > { %v4089_v35 = vadd.f32 %v4088_v32, %v4026_v48  ;;  %v4222_v41 = vadd.f32 %v4221_v55, %v4159_v18 }
 0x397   : > { %v4223_v9 = vadd.f32 %v4222_v41, %v4160_v59  ;;  %v4090_v56 = vadd.f32 %v4089_v35, %v4027_v54 }
 0x399   : > { %v4091_v49 = vadd.f32 %v4090_v56, %v4028_v31  ;;  %v4224_v33 = vadd.f32 %v4223_v9, %v4161_v22 }
 0x39b   : > { %v4225_v19 = vadd.f32 %v4224_v33, %v4162_v37  ;;  %v4092_v24 = vadd.f32 %v4091_v49, %v4029_v47 }
 0x39d   : > { %v4093_v52 = vadd.f32 %v4092_v24, %v4030_v2  ;;  %v4226_v25 = vadd.f32 %v4225_v19, %v4163_v5 }
 0x39f   : > { %v4227_v27 = vadd.f32 %v4226_v25, %v4164_v16  ;;  %v4094_v53 = vadd.f32 %v4093_v52, %v4031_v10 }
 0x3a1   : > { %v4095_v58 = vadd.f32 %v4094_v53, %v4032_v51  ;;  %v4228_v46 = vadd.f32 %v4227_v27, %v4165_v60 }
 0x3a3   : > { %v4229_v11 = vadd.f32 %v4228_v46, %v4166_v63  ;;  %v4096_v34 = vadd.f32 %v4095_v58, %v4033_v29 }
 0x3a5   : > { %v4097_v26 = vadd.f32 %v4096_v34, %v4034_v15  ;;  %v4230_v28 = vadd.f32 %v4229_v11, %v4167_v4 }
 0x3a7   : > { %v4231_v36 = vadd.f32 %v4230_v28, %v4168_v0  ;;  %v4098_v61 = vadd.f32 %v4097_v26, %v4035_v38 }
 0x3a9   : > { %v4099_v44 = vadd.f32 %v4098_v61, %v4036_v13  ;;  %v4232_v1 = vadd.f32 %v4231_v36, %v4169_v43 }
 0x3ab   : > { %v4100_v17 = vadd.f32 %v4099_v44, %v4037_v23  ;;  %v4233_v42 = vadd.f32 %v4232_v1, %v4170_v3 }
 0x3ad   : > { %v4101_v7 = vrot.slane %v4100_v17, 4  ;;  %v4234_v48 = vadd.f32 %v4233_v42, %v4171_v8 }
 0x3af   : > { %v4102_v12 = vadd.f32 %v4101_v7, %v4100_v17  ;;  %v4235_v40 = vrot.slane %v4234_v48, 4 }
 0x3b1   : > { %v4103_v18 = vrot.slane %v4102_v12, 2  ;;  %v4236_v55 = vadd.f32 %v4235_v40, %v4234_v48 }
 0x3b3   : > { %v4104_v32 = vadd.f32 %v4103_v18, %v4102_v12  ;;  %v4237_v54 = vrot.slane %v4236_v55, 2 }
 0x3b5   : > { %v4105_v6 = vrot.slane %v4104_v32, 1  ;;  %v4238_v20 = vadd.f32 %v4237_v54, %v4236_v55 }
 0x3b7   : > { %v4106_v50 = vadd.f32 %v4105_v6, %v4104_v32  ;;  %v4239_v30 = vrot.slane %v4238_v20, 1 }
 0x3b9   : > { %4107 = vst [vmem:[%s319_s11] sm:$0x1] %v4106_v50  ;;  %v4240_v31 = vadd.f32 %v4239_v30, %v4238_v20 }
 0x3bb   : > { %4241 = vst [vmem:[%s322_s14] sm:$0x1] %v4240_v31 }
 0x3bc PF: > { %s17_s21 = sadd.s32 1, %s6497_s21  }
 0x3bd   : > { %p14_p7 = scmp.ge.s32.totalorder %s17_s21, 4  }
 0x3bf   :  { %16 = sbr.rel (!%p14_p7) target bundleno = 1 (0x1), region = 96 }

</bundles_post_ra>
